<compile_context>
chip_gen: v5e
topology: v5e:2x2
jax: 0.10.0
libtpu: 0.0.40
codegen_flags: <defaults>
</compile_context>

<pallas_src>
import functools
import numpy as np

import jax
import jax.numpy as jnp
from jax.experimental import pallas as pl
from jax.experimental.pallas import tpu as pltpu


_SMEM = pl.BlockSpec(memory_space=pltpu.MemorySpace.SMEM)
GRID_TILE = 128  # lane tile over the discretisation grid axis M


# -----------------------------------------------------------------------------
# Pallas kernels
# -----------------------------------------------------------------------------
def _setconv_enc_kernel(scale_ref, xc_ref, y2_ref, xg_ref, z_ref):
    # scale_ref: (1,1) SMEM scalar = -0.5 / s^2 (hoisted out of the exp path)
    # xc_ref: (1, N, 1)   y2_ref: (1, 2, N) = [ones; y_context]   xg_ref: (1, TM)
    # z_ref:  (1, 2, TM)  -> ch0 = density, ch1 = density-normalised data
    scale = scale_ref[0, 0]
    xc = xc_ref[0]                                   # (N, 1)
    xg = xg_ref[...]                                 # (1, TM)
    diff = xc - xg                                   # (N, TM)
    w = jnp.exp(diff * diff * scale)                 # (N, TM), scale < 0
    out = jnp.dot(y2_ref[0], w,                      # MXU: (2,N) x (N,TM)
                  preferred_element_type=jnp.float32)
    dens = out[0:1, :]
    z_ref[0, 0:1, :] = dens.astype(z_ref.dtype)
    z_ref[0, 1:2, :] = (out[1:2, :] / (dens + 1e-8)).astype(z_ref.dtype)


def _setconv_dec_kernel(scale_ref, xt_ref, xg_ref, z_ref, o_ref, acc_ref):
    # scale_ref: (1,1) SMEM = -0.5 / s^2
    # xt_ref: (1, T, 1)   xg_ref: (1, TM)   z_ref: (1, TM, C)   o_ref: (1, T, C)
    # Accumulates over the M tiles (grid axis 1, "arbitrary").
    @pl.when(pl.program_id(1) == 0)
    def _():
        acc_ref[...] = jnp.zeros_like(acc_ref)

    scale = scale_ref[0, 0]
    xt = xt_ref[0]                                   # (T, 1)
    xg = xg_ref[...]                                 # (1, TM)
    diff = xt - xg                                   # (T, TM)
    w = jnp.exp(diff * diff * scale)                 # (T, TM)
    acc_ref[...] += jnp.dot(w, z_ref[0],             # MXU: (T,TM) x (TM,C)
                            preferred_element_type=jnp.float32)

    @pl.when(pl.program_id(1) == pl.num_programs(1) - 1)
    def _():
        o_ref[0] = acc_ref[...].astype(o_ref.dtype)


def _conv_taps_kernel(x_ref, w_ref, b_ref, o_ref, *, relu):
    # Generic stride-1 multi-tap conv, im2col fused via shifted slices.
    # x_ref: (1, C_in, L_in) bf16   w_ref: (K, C_out, C_in) bf16
    # b_ref: (C_out, 1) f32         o_ref: (1, C_out, L_out), L_out = L_in - K + 1
    K = w_ref.shape[0]
    C_out, L_out = o_ref.shape[1], o_ref.shape[2]
    x = x_ref[0]                                     # (C_in, L_in)
    acc = jnp.zeros((C_out, L_out), jnp.float32)
    for k in range(K):                               # K <= 3, unrolled at trace time
        acc = acc + jnp.dot(w_ref[k], x[:, k:k + L_out],
                            preferred_element_type=jnp.float32)
    acc = acc + b_ref[...]
    if relu:
        acc = jnp.maximum(acc, 0.0)
    o_ref[0] = acc.astype(o_ref.dtype)


# -----------------------------------------------------------------------------
# Pallas wrappers
# -----------------------------------------------------------------------------
def setconv_encoder(xc, yc, xg, neg_half_inv_s2, out_dtype=jnp.bfloat16):
    # xc, yc: (B, N)   xg: (1, M)   -> (B, 2, M)
    B, N = xc.shape
    M = xg.shape[1]
    TM = min(GRID_TILE, M)
    assert M % TM == 0
    xc_r = xc.reshape(B, N, 1)
    y2 = jnp.stack([jnp.ones_like(yc), yc], axis=1)          # (B, 2, N)
    return pl.pallas_call(
        _setconv_enc_kernel,
        out_shape=jax.ShapeDtypeStruct((B, 2, M), out_dtype),
        grid=(B, M // TM),
        in_specs=[
            _SMEM,
            pl.BlockSpec((1, N, 1), lambda b, j: (b, 0, 0)),
            pl.BlockSpec((1, 2, N), lambda b, j: (b, 0, 0)),
            pl.BlockSpec((1, TM), lambda b, j: (0, j)),
        ],
        out_specs=pl.BlockSpec((1, 2, TM), lambda b, j: (b, 0, j)),
        compiler_params=pltpu.CompilerParams(
            dimension_semantics=("parallel", "parallel")),
    )(neg_half_inv_s2, xc_r, y2, xg)


def setconv_decoder(xt, xg, z_ncl, neg_half_inv_s2):
    # xt: (B, T)   xg: (1, M)   z_ncl: (B, C, M)   -> (B, T, C)
    B, T = xt.shape
    C, M = z_ncl.shape[1], z_ncl.shape[2]
    TM = min(GRID_TILE, M)
    assert M % TM == 0
    xt_r = xt.reshape(B, T, 1)
    z_nlc = jnp.transpose(z_ncl, (0, 2, 1)).astype(jnp.float32)   # (B, M, C)
    return pl.pallas_call(
        _setconv_dec_kernel,
        out_shape=jax.ShapeDtypeStruct((B, T, C), jnp.float32),
        grid=(B, M // TM),
        in_specs=[
            _SMEM,
            pl.BlockSpec((1, T, 1), lambda b, j: (b, 0, 0)),
            pl.BlockSpec((1, TM), lambda b, j: (0, j)),
            pl.BlockSpec((1, TM, C), lambda b, j: (b, j, 0)),
        ],
        out_specs=pl.BlockSpec((1, T, C), lambda b, j: (b, 0, 0)),
        scratch_shapes=[pltpu.VMEM((T, C), jnp.float32)],
        compiler_params=pltpu.CompilerParams(
            dimension_semantics=("parallel", "arbitrary")),
    )(neg_half_inv_s2, xt_r, xg, z_nlc)


def conv_taps(x, taps, bias, relu, out_dtype=jnp.bfloat16):
    # x: (B, C_in, L_in)  taps: (K, C_out, C_in)  bias: (C_out, 1)
    B, C_in, L_in = x.shape
    K, C_out, _ = taps.shape
    L_out = L_in - K + 1
    return pl.pallas_call(
        functools.partial(_conv_taps_kernel, relu=relu),
        out_shape=jax.ShapeDtypeStruct((B, C_out, L_out), out_dtype),
        grid=(B,),
        in_specs=[
            pl.BlockSpec((1, C_in, L_in), lambda b: (b, 0, 0)),
            pl.BlockSpec((K, C_out, C_in), lambda b: (0, 0, 0)),
            pl.BlockSpec((C_out, 1), lambda b: (0, 0)),
        ],
        out_specs=pl.BlockSpec((1, C_out, L_out), lambda b: (b, 0, 0)),
        compiler_params=pltpu.CompilerParams(dimension_semantics=("parallel",)),
    )(x, taps, bias)


# -----------------------------------------------------------------------------
# Weight / input rearrangement (trace-time, tiny arrays)
# -----------------------------------------------------------------------------
def _prep_conv_s1(w, b):
    # plain stride-1 conv: (C_out, C_in, K) -> taps (K, C_out, C_in)
    taps = jnp.transpose(w, (2, 0, 1))
    return taps.astype(jnp.bfloat16), b.reshape(-1, 1).astype(jnp.float32)


def _prep_conv_s2(w, b):
    # stride-2 K=5 pad=2 conv == stride-1 K=3 conv on the even/odd (space-to-depth)
    # rearranged input: x2[:, ci*2+p, i] = x_pad[:, ci, 2i+p]
    C_out, C_in, _ = w.shape                                  # K == 5
    w_pad = jnp.pad(w, ((0, 0), (0, 0), (0, 1)))              # virtual tap 5 == 0
    taps = jnp.transpose(w_pad.reshape(C_out, C_in, 3, 2), (2, 0, 1, 3))
    taps = taps.reshape(3, C_out, 2 * C_in)                   # taps[j, co, ci*2+p] = w[co,ci,2j+p]
    return taps.astype(jnp.bfloat16), b.reshape(-1, 1).astype(jnp.float32)


def _prep_convT_s2(w, b):
    # ConvTranspose1d(stride=2, pad=2, K=5, output_pad=1) == one stride-1 K=3 conv
    # over x padded by 1, emitting even output positions in channels [0:C_out] and
    # odd positions in channels [C_out:2*C_out] (interleaved afterwards).
    C_in, C_out, _ = w.shape                                  # K == 5
    wt = jnp.transpose(w, (1, 0, 2))                          # (C_out, C_in, 5)
    zero = jnp.zeros((C_out, C_in), w.dtype)
    even = jnp.stack([wt[:, :, 4], wt[:, :, 2], wt[:, :, 0]], axis=0)
    odd = jnp.stack([zero, wt[:, :, 3], wt[:, :, 1]], axis=0)
    taps = jnp.concatenate([even, odd], axis=1)               # (3, 2*C_out, C_in)
    bias2 = jnp.concatenate([b, b]).reshape(-1, 1)
    return taps.astype(jnp.bfloat16), bias2.astype(jnp.float32)


def conv_down(x, taps, bias, relu=True):
    # stride-2 'before' conv; x: (B, C, L) with L even -> (B, C_out, L//2)
    B, C, L = x.shape
    x_pad = jnp.pad(x, ((0, 0), (0, 0), (2, 2)))
    Lh = (L + 4) // 2
    x2 = x_pad.reshape(B, C, Lh, 2).transpose(0, 1, 3, 2).reshape(B, 2 * C, Lh)
    return conv_taps(x2, taps, bias, relu)


def conv_up(x, taps, bias, relu=True):
    # stride-2 'after' transpose conv; x: (B, C_in, L) -> (B, C_out, 2L)
    B, _, L = x.shape
    C_out = taps.shape[1] // 2
    x_pad = jnp.pad(x, ((0, 0), (0, 0), (1, 1)))
    y = conv_taps(x_pad, taps, bias, relu)                    # (B, 2*C_out, L)
    return y.reshape(B, 2, C_out, L).transpose(0, 2, 3, 1).reshape(B, C_out, 2 * L)


# -----------------------------------------------------------------------------
# UNet (in_channels=2, out_channels=2, channels=(8,16,16,32,32,64))
# -----------------------------------------------------------------------------
def build_unet_layers(params, channels):
    n = len(channels)
    layers = {
        'initial': _prep_conv_s1(params['initial_w'], params['initial_b']),
        'final': _prep_conv_s1(params['final_w'], params['final_b']),
    }
    for i in range(n):
        layers[f'before_{i}'] = _prep_conv_s2(params[f'before_{i}_w'],
                                              params[f'before_{i}_b'])
        layers[f'after_{i}'] = _prep_convT_s2(params[f'after_{i}_w'],
                                              params[f'after_{i}_b'])
    return layers


def unet_forward(layers, x, channels):
    n = len(channels)
    h = conv_taps(x, *layers['initial'], relu=False)
    hs = []
    for i in range(n):
        inp = h if i == 0 else hs[-1]
        hs.append(conv_down(inp, *layers[f'before_{i}']))
    h = conv_up(hs[-1], *layers[f'after_{n-1}'])
    for i in reversed(range(n - 1)):
        h = conv_up(jnp.concatenate([hs[i], h], axis=1), *layers[f'after_{i}'])
    return conv_taps(h, *layers['final'], relu=False, out_dtype=jnp.float32)


# -----------------------------------------------------------------------------
# Discretisation1d (host-side, concrete data -> static grid shape)
# -----------------------------------------------------------------------------
def discretise(points_per_unit, multiple, margin, *xs):
    # TODO(synk): exact Discretisation1d arithmetic of dual-convcnp is not reproduced
    # byte-for-byte; this follows the standard ConvCNP to_multiple grid recipe.
    xs_np = [np.asarray(x) for x in xs]
    x_min = min(float(x.min()) for x in xs_np) - margin
    x_max = max(float(x.max()) for x in xs_np) + margin
    raw = points_per_unit * (x_max - x_min)
    num = int(np.ceil(raw / multiple) * multiple)
    return jnp.linspace(x_min, x_max, num, dtype=jnp.float32)


# -----------------------------------------------------------------------------
# Deterministic parameter init (shapes follow RegConvCNP.__init__)
# -----------------------------------------------------------------------------
def init_params(key, channels, sigma=0.1, points_per_unit=32.0):
    params = {
        'log_sigma': jnp.log(jnp.float32(sigma)),      # defined for parity; unused in fwd
        'enc_log_scale': jnp.log(jnp.float32(2.0 / points_per_unit)),
        'dec_log_scale': jnp.log(jnp.float32(2.0 / points_per_unit)),
    }

    def conv_init(k, c_out, c_in, ksz):
        kw, kb = jax.random.split(k)
        scale = 1.0 / np.sqrt(c_in * ksz)
        return (scale * jax.random.normal(kw, (c_out, c_in, ksz), jnp.float32),
                0.01 * jax.random.normal(kb, (c_out,), jnp.float32))

    def convT_init(k, c_in, c_out, ksz):
        kw, kb = jax.random.split(k)
        scale = 1.0 / np.sqrt(c_in * ksz)
        return (scale * jax.random.normal(kw, (c_in, c_out, ksz), jnp.float32),
                0.01 * jax.random.normal(kb, (c_out,), jnp.float32))

    n = len(channels)
    keys = jax.random.split(key, 2 * n + 2)
    params['initial_w'], params['initial_b'] = conv_init(keys[0], channels[0], 2, 1)
    for i in range(n):
        c_in = channels[max(i - 1, 0)]
        params[f'before_{i}_w'], params[f'before_{i}_b'] = conv_init(
            keys[1 + i], channels[i], c_in, 5)
    for i in range(n):
        c_in = channels[i] if i == n - 1 else 2 * channels[i]
        c_out = channels[max(i - 1, 0)]
        params[f'after_{i}_w'], params[f'after_{i}_b'] = convT_init(
            keys[1 + n + i], c_in, c_out, 5)
    params['final_w'], params['final_b'] = conv_init(keys[1 + 2 * n], 2, channels[0], 1)
    return params


# -----------------------------------------------------------------------------
# RegConvCNP.forward
# -----------------------------------------------------------------------------
def reg_convcnp_forward(params, layers, batch, x_grid, channels):
    xg = x_grid.reshape(1, -1)                       # grid, (1, M)
    xc = batch['x_context_reg'][..., 0]              # (B, N)
    yc = batch['y_context_reg'][..., 0]              # (B, N)
    xt = batch['x_target_reg'][..., 0]               # (B, T)

    # hoisted RBF scales: -0.5 / s^2
    enc_scale = (-0.5 * jnp.exp(-2.0 * params['enc_log_scale'])).reshape(1, 1)
    dec_scale = (-0.5 * jnp.exp(-2.0 * params['dec_log_scale'])).reshape(1, 1)

    z = setconv_encoder(xc, yc, xg, enc_scale)       # (B, 2, M) bf16, NCL
    z = unet_forward(layers, z, channels)            # (B, 2, M) f32,  NCL
    z = setconv_decoder(xt, xg, z, dec_scale)        # (B, T, 2) f32

    mean = z[:, :, :1]                               # (B, T, 1)
    std = jnp.exp(z[:, :, 1:])                       # (B, T, 1)
    return 0, (mean, std)


# -----------------------------------------------------------------------------
if __name__ == "__main__":
    key = jax.random.PRNGKey(0)
    B_, N, T = 2, 8, 8
    sigma, points_per_unit, margin = 0.1, 32.0, 0.1
    small = False
    channels = (8, 16, 16, 32) if small else (8, 16, 16, 32, 32, 64)
    # grid length multiple: divisible by 2**num_halving_layers AND 128 (lane-dense)
    multiple = int(np.lcm(2 ** len(channels), 128))

    k1, k2, k3, k4, k5, k6, kp = jax.random.split(key, 7)
    batch = {
        'x_context_reg': jax.random.uniform(k1, (B_, N, 1), minval=-2.0, maxval=2.0),
        'y_context_reg': jax.random.normal(k2, (B_, N, 1)),
        'x_target_reg': jax.random.uniform(k3, (B_, T, 1), minval=-2.0, maxval=2.0),
        'y_target_reg': jax.random.normal(k4, (B_, T, 1)),
        'x_context_class': jax.random.uniform(k5, (B_, N, 1), minval=-2.0, maxval=2.0),
        'x_target_class': jax.random.uniform(k6, (B_, T, 1), minval=-2.0, maxval=2.0),
    }
    params = init_params(kp, channels, sigma=sigma, points_per_unit=points_per_unit)
    layers = build_unet_layers(params, channels)

    x_grid = discretise(points_per_unit, multiple, margin,
                        batch['x_context_class'], batch['x_target_class'],
                        batch['x_context_reg'], batch['x_target_reg'])

    fwd = jax.jit(functools.partial(reg_convcnp_forward, channels=channels))
    obj, (mean, std) = fwd(params, layers, batch, x_grid)
    jax.block_until_ready((mean, std))
    assert mean.shape == (B_, T, 1) and std.shape == (B_, T, 1)
    assert bool(jnp.all(jnp.isfinite(mean))) and bool(jnp.all(std > 0))
    print("KERNEL_OK")
</pallas_src>

<mosaic_0001>
module attributes {stable_mosaic.version = 11 : i64} {
  func.func @_setconv_enc_kernel(%arg0: i32, %arg1: i32, %arg2: memref<1x1xf32, #tpu.memory_space<smem>>, %arg3: memref<1x8x1xf32, #tpu.memory_space<vmem>>, %arg4: memref<1x2x8xf32, #tpu.memory_space<vmem>>, %arg5: memref<1x128xf32, #tpu.memory_space<vmem>>, %arg6: memref<1x2x128xbf16, #tpu.memory_space<vmem>>) attributes {dimension_semantics = [#tpu.dimension_semantics<parallel>, #tpu.dimension_semantics<parallel>], iteration_bounds = array<i64: 2, 2>, scalar_prefetch = 0 : i64, scratch_operands = 0 : i64, tpu.core_type = #tpu.core_type<tc>, window_params = [{transform_indices = @transform_0, window_bounds = array<i64: 1, 1>}, {transform_indices = @transform_1, window_bounds = array<i64: 1, 8, 1>}, {transform_indices = @transform_2, window_bounds = array<i64: 1, 2, 8>}, {transform_indices = @transform_3, window_bounds = array<i64: 1, 128>}, {transform_indices = @transform_4, window_bounds = array<i64: 1, 2, 128>}]} {
    %c0 = arith.constant 0 : index
    %c0_0 = arith.constant 0 : index
    %0 = memref.load %arg2[%c0, %c0_0] : memref<1x1xf32, #tpu.memory_space<smem>>
    %c0_1 = arith.constant 0 : index
    %c0_2 = arith.constant 0 : index
    %c0_3 = arith.constant 0 : index
    %1 = vector.load %arg3[%c0_1, %c0_2, %c0_3] : memref<1x8x1xf32, #tpu.memory_space<vmem>>, vector<1x8x1xf32>
    %2 = vector.shape_cast %1 : vector<1x8x1xf32> to vector<8x1xf32>
    %c0_4 = arith.constant 0 : index
    %c0_5 = arith.constant 0 : index
    %3 = vector.load %arg5[%c0_4, %c0_5] : memref<1x128xf32, #tpu.memory_space<vmem>>, vector<1x128xf32>
    %4 = vector.broadcast %2 : vector<8x1xf32> to vector<8x128xf32>
    %5 = vector.broadcast %3 : vector<1x128xf32> to vector<8x128xf32>
    %6 = arith.subf %4, %5 : vector<8x128xf32>
    %7 = arith.mulf %6, %6 : vector<8x128xf32>
    %8 = vector.broadcast %0 : f32 to vector<8x128xf32>
    %9 = arith.mulf %7, %8 : vector<8x128xf32>
    %10 = math.exp %9 : vector<8x128xf32>
    %c0_6 = arith.constant 0 : index
    %c0_7 = arith.constant 0 : index
    %c0_8 = arith.constant 0 : index
    %11 = vector.load %arg4[%c0_6, %c0_7, %c0_8] : memref<1x2x8xf32, #tpu.memory_space<vmem>>, vector<1x2x8xf32>
    %12 = vector.shape_cast %11 : vector<1x2x8xf32> to vector<2x8xf32>
    %cst = arith.constant dense<0.000000e+00> : vector<2x128xf32>
    %13 = tpu.matmul %12, %10, %cst {dimension_numbers = #tpu.dot_dimension_numbers<[1], [0], [0], [1], [0, 0, 1, 1], [], []>} : vector<2x8xf32>, vector<8x128xf32>, vector<2x128xf32> -> vector<2x128xf32>
    %14 = vector.extract_strided_slice %13 {offsets = [0, 0], sizes = [1, 128], strides = [1, 1]} : vector<2x128xf32> to vector<1x128xf32>
    %15 = arith.truncf %14 : vector<1x128xf32> to vector<1x128xbf16>
    %c0_9 = arith.constant 0 : index
    %c0_10 = arith.constant 0 : index
    %c0_11 = arith.constant 0 : index
    %16 = vector.load %arg6[%c0_9, %c0_10, %c0_11] : memref<1x2x128xbf16, #tpu.memory_space<vmem>>, vector<1x1x128xbf16>
    %17 = vector.shape_cast %16 : vector<1x1x128xbf16> to vector<1x128xbf16>
    %18 = vector.shape_cast %15 : vector<1x128xbf16> to vector<1x1x128xbf16>
    tpu.vector_store %arg6[%c0_9, %c0_10, %c0_11], %18 {strides = array<i32>} : memref<1x2x128xbf16, #tpu.memory_space<vmem>>, vector<1x1x128xbf16>,
    %19 = vector.extract_strided_slice %13 {offsets = [1, 0], sizes = [1, 128], strides = [1, 1]} : vector<2x128xf32> to vector<1x128xf32>
    %cst_12 = arith.constant 9.99999993E-9 : f32
    %20 = vector.broadcast %cst_12 : f32 to vector<1x128xf32>
    %21 = arith.addf %14, %20 : vector<1x128xf32>
    %22 = arith.divf %19, %21 : vector<1x128xf32>
    %23 = arith.truncf %22 : vector<1x128xf32> to vector<1x128xbf16>
    %c0_13 = arith.constant 0 : index
    %c1 = arith.constant 1 : index
    %c0_14 = arith.constant 0 : index
    %24 = vector.load %arg6[%c0_13, %c1, %c0_14] : memref<1x2x128xbf16, #tpu.memory_space<vmem>>, vector<1x1x128xbf16>
    %25 = vector.shape_cast %24 : vector<1x1x128xbf16> to vector<1x128xbf16>
    %26 = vector.shape_cast %23 : vector<1x128xbf16> to vector<1x1x128xbf16>
    tpu.vector_store %arg6[%c0_13, %c1, %c0_14], %26 {strides = array<i32>} : memref<1x2x128xbf16, #tpu.memory_space<vmem>>, vector<1x1x128xbf16>,
    return
  }
  func.func @transform_0(%arg0: i32, %arg1: i32) -> (i32, i32) {
    %c0_i32 = arith.constant 0 : i32
    %c0_i32_0 = arith.constant 0 : i32
    %c0_i32_1 = arith.constant 0 : i32
    return %c0_i32, %c0_i32_0 : i32, i32
  }
  func.func @transform_1(%arg0: i32, %arg1: i32) -> (i32, i32, i32) {
    %c0_i32 = arith.constant 0 : i32
    %c0_i32_0 = arith.constant 0 : i32
    %c0_i32_1 = arith.constant 0 : i32
    return %arg0, %c0_i32, %c0_i32_0 : i32, i32, i32
  }
  func.func @transform_2(%arg0: i32, %arg1: i32) -> (i32, i32, i32) {
    %c0_i32 = arith.constant 0 : i32
    %c0_i32_0 = arith.constant 0 : i32
    %c0_i32_1 = arith.constant 0 : i32
    return %arg0, %c0_i32, %c0_i32_0 : i32, i32, i32
  }
  func.func @transform_3(%arg0: i32, %arg1: i32) -> (i32, i32) {
    %c0_i32 = arith.constant 0 : i32
    %c0_i32_0 = arith.constant 0 : i32
    return %c0_i32, %arg1 : i32, i32
  }
  func.func @transform_4(%arg0: i32, %arg1: i32) -> (i32, i32, i32) {
    %c0_i32 = arith.constant 0 : i32
    %c0_i32_0 = arith.constant 0 : i32
    return %arg0, %c0_i32, %arg1 : i32, i32, i32
  }
}

module attributes {stable_mosaic.version = 11 : i64} {
  func.func @_conv_taps_kernel(%arg0: i32, %arg1: memref<1x2x256xbf16, #tpu.memory_space<vmem>>, %arg2: memref<1x8x2xbf16, #tpu.memory_space<vmem>>, %arg3: memref<8x1xf32, #tpu.memory_space<vmem>>, %arg4: memref<1x8x256xbf16, #tpu.memory_space<vmem>>) attributes {dimension_semantics = [#tpu.dimension_semantics<parallel>], iteration_bounds = array<i64: 2>, scalar_prefetch = 0 : i64, scratch_operands = 0 : i64, tpu.core_type = #tpu.core_type<tc>, window_params = [{transform_indices = @transform_0, window_bounds = array<i64: 1, 2, 256>}, {pipeline_mode = #tpu.pipeline_mode<synchronous>, transform_indices = @transform_1, window_bounds = array<i64: 1, 8, 2>}, {pipeline_mode = #tpu.pipeline_mode<synchronous>, transform_indices = @transform_2, window_bounds = array<i64: 8, 1>}, {transform_indices = @transform_3, window_bounds = array<i64: 1, 8, 256>}]} {
    %c0 = arith.constant 0 : index
    %c0_0 = arith.constant 0 : index
    %c0_1 = arith.constant 0 : index
    %0 = vector.load %arg1[%c0, %c0_0, %c0_1] : memref<1x2x256xbf16, #tpu.memory_space<vmem>>, vector<1x2x256xbf16>
    %1 = vector.shape_cast %0 : vector<1x2x256xbf16> to vector<2x256xbf16>
    %cst = arith.constant 0.000000e+00 : f32
    %2 = vector.broadcast %cst : f32 to vector<8x256xf32>
    %c0_2 = arith.constant 0 : index
    %c0_3 = arith.constant 0 : index
    %c0_4 = arith.constant 0 : index
    %3 = vector.load %arg2[%c0_2, %c0_3, %c0_4] : memref<1x8x2xbf16, #tpu.memory_space<vmem>>, vector<1x8x2xbf16>
    %4 = vector.shape_cast %3 : vector<1x8x2xbf16> to vector<8x2xbf16>
    %cst_5 = arith.constant dense<0.000000e+00> : vector<8x256xf32>
    %5 = tpu.matmul %4, %1, %cst_5 {dimension_numbers = #tpu.dot_dimension_numbers<[1], [0], [0], [1], [0, 0, 1, 1], [], []>} : vector<8x2xbf16>, vector<2x256xbf16>, vector<8x256xf32> -> vector<8x256xf32>
    %6 = arith.addf %2, %5 : vector<8x256xf32>
    %c0_6 = arith.constant 0 : index
    %c0_7 = arith.constant 0 : index
    %7 = vector.load %arg3[%c0_6, %c0_7] : memref<8x1xf32, #tpu.memory_space<vmem>>, vector<8x1xf32>
    %8 = vector.broadcast %7 : vector<8x1xf32> to vector<8x256xf32>
    %9 = arith.addf %6, %8 : vector<8x256xf32>
    %10 = arith.truncf %9 : vector<8x256xf32> to vector<8x256xbf16>
    %c0_8 = arith.constant 0 : index
    %c0_9 = arith.constant 0 : index
    %c0_10 = arith.constant 0 : index
    %11 = vector.load %arg4[%c0_8, %c0_9, %c0_10] : memref<1x8x256xbf16, #tpu.memory_space<vmem>>, vector<1x8x256xbf16>
    %12 = vector.shape_cast %11 : vector<1x8x256xbf16> to vector<8x256xbf16>
    %13 = vector.shape_cast %10 : vector<8x256xbf16> to vector<1x8x256xbf16>
    tpu.vector_store %arg4[%c0_8, %c0_9, %c0_10], %13 {strides = array<i32>} : memref<1x8x256xbf16, #tpu.memory_space<vmem>>, vector<1x8x256xbf16>,
    return
  }
  func.func @transform_0(%arg0: i32) -> (i32, i32, i32) {
    %c0_i32 = arith.constant 0 : i32
    %c0_i32_0 = arith.constant 0 : i32
    %c0_i32_1 = arith.constant 0 : i32
    return %arg0, %c0_i32, %c0_i32_0 : i32, i32, i32
  }
  func.func @transform_1(%arg0: i32) -> (i32, i32, i32) {
    %c0_i32 = arith.constant 0 : i32
    %c0_i32_0 = arith.constant 0 : i32
    %c0_i32_1 = arith.constant 0 : i32
    %c0_i32_2 = arith.constant 0 : i32
    return %c0_i32, %c0_i32_0, %c0_i32_1 : i32, i32, i32
  }
  func.func @transform_2(%arg0: i32) -> (i32, i32) {
    %c0_i32 = arith.constant 0 : i32
    %c0_i32_0 = arith.constant 0 : i32
    %c0_i32_1 = arith.constant 0 : i32
    return %c0_i32, %c0_i32_0 : i32, i32
  }
  func.func @transform_3(%arg0: i32) -> (i32, i32, i32) {
    %c0_i32 = arith.constant 0 : i32
    %c0_i32_0 = arith.constant 0 : i32
    %c0_i32_1 = arith.constant 0 : i32
    return %arg0, %c0_i32, %c0_i32_0 : i32, i32, i32
  }
}

module attributes {stable_mosaic.version = 11 : i64} {
  func.func @_conv_taps_kernel(%arg0: i32, %arg1: memref<1x16x130xbf16, #tpu.memory_space<vmem>>, %arg2: memref<3x8x16xbf16, #tpu.memory_space<vmem>>, %arg3: memref<8x1xf32, #tpu.memory_space<vmem>>, %arg4: memref<1x8x128xbf16, #tpu.memory_space<vmem>>) attributes {dimension_semantics = [#tpu.dimension_semantics<parallel>], iteration_bounds = array<i64: 2>, scalar_prefetch = 0 : i64, scratch_operands = 0 : i64, tpu.core_type = #tpu.core_type<tc>, window_params = [{transform_indices = @transform_0, window_bounds = array<i64: 1, 16, 130>}, {pipeline_mode = #tpu.pipeline_mode<synchronous>, transform_indices = @transform_1, window_bounds = array<i64: 3, 8, 16>}, {pipeline_mode = #tpu.pipeline_mode<synchronous>, transform_indices = @transform_2, window_bounds = array<i64: 8, 1>}, {transform_indices = @transform_3, window_bounds = array<i64: 1, 8, 128>}]} {
    %c0 = arith.constant 0 : index
    %c0_0 = arith.constant 0 : index
    %c0_1 = arith.constant 0 : index
    %0 = vector.load %arg1[%c0, %c0_0, %c0_1] : memref<1x16x130xbf16, #tpu.memory_space<vmem>>, vector<1x16x130xbf16>
    %1 = vector.shape_cast %0 : vector<1x16x130xbf16> to vector<16x130xbf16>
    %cst = arith.constant 0.000000e+00 : f32
    %2 = vector.broadcast %cst : f32 to vector<8x128xf32>
    %c0_2 = arith.constant 0 : index
    %c0_3 = arith.constant 0 : index
    %c0_4 = arith.constant 0 : index
    %3 = vector.load %arg2[%c0_2, %c0_3, %c0_4] : memref<3x8x16xbf16, #tpu.memory_space<vmem>>, vector<1x8x16xbf16>
    %4 = vector.shape_cast %3 : vector<1x8x16xbf16> to vector<8x16xbf16>
    %5 = vector.extract_strided_slice %1 {offsets = [0, 0], sizes = [16, 128], strides = [1, 1]} : vector<16x130xbf16> to vector<16x128xbf16>
    %cst_5 = arith.constant dense<0.000000e+00> : vector<8x128xf32>
    %6 = tpu.matmul %4, %5, %cst_5 {dimension_numbers = #tpu.dot_dimension_numbers<[1], [0], [0], [1], [0, 0, 1, 1], [], []>} : vector<8x16xbf16>, vector<16x128xbf16>, vector<8x128xf32> -> vector<8x128xf32>
    %7 = arith.addf %2, %6 : vector<8x128xf32>
    %c1 = arith.constant 1 : index
    %c0_6 = arith.constant 0 : index
    %c0_7 = arith.constant 0 : index
    %8 = vector.load %arg2[%c1, %c0_6, %c0_7] : memref<3x8x16xbf16, #tpu.memory_space<vmem>>, vector<1x8x16xbf16>
    %9 = vector.shape_cast %8 : vector<1x8x16xbf16> to vector<8x16xbf16>
    %10 = vector.extract_strided_slice %1 {offsets = [0, 1], sizes = [16, 128], strides = [1, 1]} : vector<16x130xbf16> to vector<16x128xbf16>
    %cst_8 = arith.constant dense<0.000000e+00> : vector<8x128xf32>
    %11 = tpu.matmul %9, %10, %cst_8 {dimension_numbers = #tpu.dot_dimension_numbers<[1], [0], [0], [1], [0, 0, 1, 1], [], []>} : vector<8x16xbf16>, vector<16x128xbf16>, vector<8x128xf32> -> vector<8x128xf32>
    %12 = arith.addf %7, %11 : vector<8x128xf32>
    %c2 = arith.constant 2 : index
    %c0_9 = arith.constant 0 : index
    %c0_10 = arith.constant 0 : index
    %13 = vector.load %arg2[%c2, %c0_9, %c0_10] : memref<3x8x16xbf16, #tpu.memory_space<vmem>>, vector<1x8x16xbf16>
    %14 = vector.shape_cast %13 : vector<1x8x16xbf16> to vector<8x16xbf16>
    %15 = vector.extract_strided_slice %1 {offsets = [0, 2], sizes = [16, 128], strides = [1, 1]} : vector<16x130xbf16> to vector<16x128xbf16>
    %cst_11 = arith.constant dense<0.000000e+00> : vector<8x128xf32>
    %16 = tpu.matmul %14, %15, %cst_11 {dimension_numbers = #tpu.dot_dimension_numbers<[1], [0], [0], [1], [0, 0, 1, 1], [], []>} : vector<8x16xbf16>, vector<16x128xbf16>, vector<8x128xf32> -> vector<8x128xf32>
    %17 = arith.addf %12, %16 : vector<8x128xf32>
    %c0_12 = arith.constant 0 : index
    %c0_13 = arith.constant 0 : index
    %18 = vector.load %arg3[%c0_12, %c0_13] : memref<8x1xf32, #tpu.memory_space<vmem>>, vector<8x1xf32>
    %19 = vector.broadcast %18 : vector<8x1xf32> to vector<8x128xf32>
    %20 = arith.addf %17, %19 : vector<8x128xf32>
    %cst_14 = arith.constant 0.000000e+00 : f32
    %21 = vector.broadcast %cst_14 : f32 to vector<8x128xf32>
    %22 = arith.maximumf %20, %21 : vector<8x128xf32>
    %23 = arith.truncf %22 : vector<8x128xf32> to vector<8x128xbf16>
    %c0_15 = arith.constant 0 : index
    %c0_16 = arith.constant 0 : index
    %c0_17 = arith.constant 0 : index
    %24 = vector.load %arg4[%c0_15, %c0_16, %c0_17] : memref<1x8x128xbf16, #tpu.memory_space<vmem>>, vector<1x8x128xbf16>
    %25 = vector.shape_cast %24 : vector<1x8x128xbf16> to vector<8x128xbf16>
    %26 = vector.shape_cast %23 : vector<8x128xbf16> to vector<1x8x128xbf16>
    tpu.vector_store %arg4[%c0_15, %c0_16, %c0_17], %26 {strides = array<i32>} : memref<1x8x128xbf16, #tpu.memory_space<vmem>>, vector<1x8x128xbf16>,
    return
  }
  func.func @transform_0(%arg0: i32) -> (i32, i32, i32) {
    %c0_i32 = arith.constant 0 : i32
    %c0_i32_0 = arith.constant 0 : i32
    %c0_i32_1 = arith.constant 0 : i32
    return %arg0, %c0_i32, %c0_i32_0 : i32, i32, i32
  }
  func.func @transform_1(%arg0: i32) -> (i32, i32, i32) {
    %c0_i32 = arith.constant 0 : i32
    %c0_i32_0 = arith.constant 0 : i32
    %c0_i32_1 = arith.constant 0 : i32
    %c0_i32_2 = arith.constant 0 : i32
    return %c0_i32, %c0_i32_0, %c0_i32_1 : i32, i32, i32
  }
  func.func @transform_2(%arg0: i32) -> (i32, i32) {
    %c0_i32 = arith.constant 0 : i32
    %c0_i32_0 = arith.constant 0 : i32
    %c0_i32_1 = arith.constant 0 : i32
    return %c0_i32, %c0_i32_0 : i32, i32
  }
  func.func @transform_3(%arg0: i32) -> (i32, i32, i32) {
    %c0_i32 = arith.constant 0 : i32
    %c0_i32_0 = arith.constant 0 : i32
    %c0_i32_1 = arith.constant 0 : i32
    return %arg0, %c0_i32, %c0_i32_0 : i32, i32, i32
  }
}

module attributes {stable_mosaic.version = 11 : i64} {
  func.func @_conv_taps_kernel(%arg0: i32, %arg1: memref<1x16x66xbf16, #tpu.memory_space<vmem>>, %arg2: memref<3x16x16xbf16, #tpu.memory_space<vmem>>, %arg3: memref<16x1xf32, #tpu.memory_space<vmem>>, %arg4: memref<1x16x64xbf16, #tpu.memory_space<vmem>>) attributes {dimension_semantics = [#tpu.dimension_semantics<parallel>], iteration_bounds = array<i64: 2>, scalar_prefetch = 0 : i64, scratch_operands = 0 : i64, tpu.core_type = #tpu.core_type<tc>, window_params = [{transform_indices = @transform_0, window_bounds = array<i64: 1, 16, 66>}, {pipeline_mode = #tpu.pipeline_mode<synchronous>, transform_indices = @transform_1, window_bounds = array<i64: 3, 16, 16>}, {pipeline_mode = #tpu.pipeline_mode<synchronous>, transform_indices = @transform_2, window_bounds = array<i64: 16, 1>}, {transform_indices = @transform_3, window_bounds = array<i64: 1, 16, 64>}]} {
    %c0 = arith.constant 0 : index
    %c0_0 = arith.constant 0 : index
    %c0_1 = arith.constant 0 : index
    %0 = vector.load %arg1[%c0, %c0_0, %c0_1] : memref<1x16x66xbf16, #tpu.memory_space<vmem>>, vector<1x16x66xbf16>
    %1 = vector.shape_cast %0 : vector<1x16x66xbf16> to vector<16x66xbf16>
    %cst = arith.constant 0.000000e+00 : f32
    %2 = vector.broadcast %cst : f32 to vector<16x64xf32>
    %c0_2 = arith.constant 0 : index
    %c0_3 = arith.constant 0 : index
    %c0_4 = arith.constant 0 : index
    %3 = vector.load %arg2[%c0_2, %c0_3, %c0_4] : memref<3x16x16xbf16, #tpu.memory_space<vmem>>, vector<1x16x16xbf16>
    %4 = vector.shape_cast %3 : vector<1x16x16xbf16> to vector<16x16xbf16>
    %5 = vector.extract_strided_slice %1 {offsets = [0, 0], sizes = [16, 64], strides = [1, 1]} : vector<16x66xbf16> to vector<16x64xbf16>
    %cst_5 = arith.constant dense<0.000000e+00> : vector<16x64xf32>
    %6 = tpu.matmul %4, %5, %cst_5 {dimension_numbers = #tpu.dot_dimension_numbers<[1], [0], [0], [1], [0, 0, 1, 1], [], []>} : vector<16x16xbf16>, vector<16x64xbf16>, vector<16x64xf32> -> vector<16x64xf32>
    %7 = arith.addf %2, %6 : vector<16x64xf32>
    %c1 = arith.constant 1 : index
    %c0_6 = arith.constant 0 : index
    %c0_7 = arith.constant 0 : index
    %8 = vector.load %arg2[%c1, %c0_6, %c0_7] : memref<3x16x16xbf16, #tpu.memory_space<vmem>>, vector<1x16x16xbf16>
    %9 = vector.shape_cast %8 : vector<1x16x16xbf16> to vector<16x16xbf16>
    %10 = vector.extract_strided_slice %1 {offsets = [0, 1], sizes = [16, 64], strides = [1, 1]} : vector<16x66xbf16> to vector<16x64xbf16>
    %cst_8 = arith.constant dense<0.000000e+00> : vector<16x64xf32>
    %11 = tpu.matmul %9, %10, %cst_8 {dimension_numbers = #tpu.dot_dimension_numbers<[1], [0], [0], [1], [0, 0, 1, 1], [], []>} : vector<16x16xbf16>, vector<16x64xbf16>, vector<16x64xf32> -> vector<16x64xf32>
    %12 = arith.addf %7, %11 : vector<16x64xf32>
    %c2 = arith.constant 2 : index
    %c0_9 = arith.constant 0 : index
    %c0_10 = arith.constant 0 : index
    %13 = vector.load %arg2[%c2, %c0_9, %c0_10] : memref<3x16x16xbf16, #tpu.memory_space<vmem>>, vector<1x16x16xbf16>
    %14 = vector.shape_cast %13 : vector<1x16x16xbf16> to vector<16x16xbf16>
    %15 = vector.extract_strided_slice %1 {offsets = [0, 2], sizes = [16, 64], strides = [1, 1]} : vector<16x66xbf16> to vector<16x64xbf16>
    %cst_11 = arith.constant dense<0.000000e+00> : vector<16x64xf32>
    %16 = tpu.matmul %14, %15, %cst_11 {dimension_numbers = #tpu.dot_dimension_numbers<[1], [0], [0], [1], [0, 0, 1, 1], [], []>} : vector<16x16xbf16>, vector<16x64xbf16>, vector<16x64xf32> -> vector<16x64xf32>
    %17 = arith.addf %12, %16 : vector<16x64xf32>
    %c0_12 = arith.constant 0 : index
    %c0_13 = arith.constant 0 : index
    %18 = vector.load %arg3[%c0_12, %c0_13] : memref<16x1xf32, #tpu.memory_space<vmem>>, vector<16x1xf32>
    %19 = vector.broadcast %18 : vector<16x1xf32> to vector<16x64xf32>
    %20 = arith.addf %17, %19 : vector<16x64xf32>
    %cst_14 = arith.constant 0.000000e+00 : f32
    %21 = vector.broadcast %cst_14 : f32 to vector<16x64xf32>
    %22 = arith.maximumf %20, %21 : vector<16x64xf32>
    %23 = arith.truncf %22 : vector<16x64xf32> to vector<16x64xbf16>
    %c0_15 = arith.constant 0 : index
    %c0_16 = arith.constant 0 : index
    %c0_17 = arith.constant 0 : index
    %24 = vector.load %arg4[%c0_15, %c0_16, %c0_17] : memref<1x16x64xbf16, #tpu.memory_space<vmem>>, vector<1x16x64xbf16>
    %25 = vector.shape_cast %24 : vector<1x16x64xbf16> to vector<16x64xbf16>
    %26 = vector.shape_cast %23 : vector<16x64xbf16> to vector<1x16x64xbf16>
    tpu.vector_store %arg4[%c0_15, %c0_16, %c0_17], %26 {strides = array<i32>} : memref<1x16x64xbf16, #tpu.memory_space<vmem>>, vector<1x16x64xbf16>,
    return
  }
  func.func @transform_0(%arg0: i32) -> (i32, i32, i32) {
    %c0_i32 = arith.constant 0 : i32
    %c0_i32_0 = arith.constant 0 : i32
    %c0_i32_1 = arith.constant 0 : i32
    return %arg0, %c0_i32, %c0_i32_0 : i32, i32, i32
  }
  func.func @transform_1(%arg0: i32) -> (i32, i32, i32) {
    %c0_i32 = arith.constant 0 : i32
    %c0_i32_0 = arith.constant 0 : i32
    %c0_i32_1 = arith.constant 0 : i32
    %c0_i32_2 = arith.constant 0 : i32
    return %c0_i32, %c0_i32_0, %c0_i32_1 : i32, i32, i32
  }
  func.func @transform_2(%arg0: i32) -> (i32, i32) {
    %c0_i32 = arith.constant 0 : i32
    %c0_i32_0 = arith.constant 0 : i32
    %c0_i32_1 = arith.constant 0 : i32
    return %c0_i32, %c0_i32_0 : i32, i32
  }
  func.func @transform_3(%arg0: i32) -> (i32, i32, i32) {
    %c0_i32 = arith.constant 0 : i32
    %c0_i32_0 = arith.constant 0 : i32
    %c0_i32_1 = arith.constant 0 : i32
    return %arg0, %c0_i32, %c0_i32_0 : i32, i32, i32
  }
}

module attributes {stable_mosaic.version = 11 : i64} {
  func.func @_conv_taps_kernel(%arg0: i32, %arg1: memref<1x32x34xbf16, #tpu.memory_space<vmem>>, %arg2: memref<3x16x32xbf16, #tpu.memory_space<vmem>>, %arg3: memref<16x1xf32, #tpu.memory_space<vmem>>, %arg4: memref<1x16x32xbf16, #tpu.memory_space<vmem>>) attributes {dimension_semantics = [#tpu.dimension_semantics<parallel>], iteration_bounds = array<i64: 2>, scalar_prefetch = 0 : i64, scratch_operands = 0 : i64, tpu.core_type = #tpu.core_type<tc>, window_params = [{transform_indices = @transform_0, window_bounds = array<i64: 1, 32, 34>}, {pipeline_mode = #tpu.pipeline_mode<synchronous>, transform_indices = @transform_1, window_bounds = array<i64: 3, 16, 32>}, {pipeline_mode = #tpu.pipeline_mode<synchronous>, transform_indices = @transform_2, window_bounds = array<i64: 16, 1>}, {transform_indices = @transform_3, window_bounds = array<i64: 1, 16, 32>}]} {
    %c0 = arith.constant 0 : index
    %c0_0 = arith.constant 0 : index
    %c0_1 = arith.constant 0 : index
    %0 = vector.load %arg1[%c0, %c0_0, %c0_1] : memref<1x32x34xbf16, #tpu.memory_space<vmem>>, vector<1x32x34xbf16>
    %1 = vector.shape_cast %0 : vector<1x32x34xbf16> to vector<32x34xbf16>
    %cst = arith.constant 0.000000e+00 : f32
    %2 = vector.broadcast %cst : f32 to vector<16x32xf32>
    %c0_2 = arith.constant 0 : index
    %c0_3 = arith.constant 0 : index
    %c0_4 = arith.constant 0 : index
    %3 = vector.load %arg2[%c0_2, %c0_3, %c0_4] : memref<3x16x32xbf16, #tpu.memory_space<vmem>>, vector<1x16x32xbf16>
    %4 = vector.shape_cast %3 : vector<1x16x32xbf16> to vector<16x32xbf16>
    %5 = vector.extract_strided_slice %1 {offsets = [0, 0], sizes = [32, 32], strides = [1, 1]} : vector<32x34xbf16> to vector<32x32xbf16>
    %cst_5 = arith.constant dense<0.000000e+00> : vector<16x32xf32>
    %6 = tpu.matmul %4, %5, %cst_5 {dimension_numbers = #tpu.dot_dimension_numbers<[1], [0], [0], [1], [0, 0, 1, 1], [], []>} : vector<16x32xbf16>, vector<32x32xbf16>, vector<16x32xf32> -> vector<16x32xf32>
    %7 = arith.addf %2, %6 : vector<16x32xf32>
    %c1 = arith.constant 1 : index
    %c0_6 = arith.constant 0 : index
    %c0_7 = arith.constant 0 : index
    %8 = vector.load %arg2[%c1, %c0_6, %c0_7] : memref<3x16x32xbf16, #tpu.memory_space<vmem>>, vector<1x16x32xbf16>
    %9 = vector.shape_cast %8 : vector<1x16x32xbf16> to vector<16x32xbf16>
    %10 = vector.extract_strided_slice %1 {offsets = [0, 1], sizes = [32, 32], strides = [1, 1]} : vector<32x34xbf16> to vector<32x32xbf16>
    %cst_8 = arith.constant dense<0.000000e+00> : vector<16x32xf32>
    %11 = tpu.matmul %9, %10, %cst_8 {dimension_numbers = #tpu.dot_dimension_numbers<[1], [0], [0], [1], [0, 0, 1, 1], [], []>} : vector<16x32xbf16>, vector<32x32xbf16>, vector<16x32xf32> -> vector<16x32xf32>
    %12 = arith.addf %7, %11 : vector<16x32xf32>
    %c2 = arith.constant 2 : index
    %c0_9 = arith.constant 0 : index
    %c0_10 = arith.constant 0 : index
    %13 = vector.load %arg2[%c2, %c0_9, %c0_10] : memref<3x16x32xbf16, #tpu.memory_space<vmem>>, vector<1x16x32xbf16>
    %14 = vector.shape_cast %13 : vector<1x16x32xbf16> to vector<16x32xbf16>
    %15 = vector.extract_strided_slice %1 {offsets = [0, 2], sizes = [32, 32], strides = [1, 1]} : vector<32x34xbf16> to vector<32x32xbf16>
    %cst_11 = arith.constant dense<0.000000e+00> : vector<16x32xf32>
    %16 = tpu.matmul %14, %15, %cst_11 {dimension_numbers = #tpu.dot_dimension_numbers<[1], [0], [0], [1], [0, 0, 1, 1], [], []>} : vector<16x32xbf16>, vector<32x32xbf16>, vector<16x32xf32> -> vector<16x32xf32>
    %17 = arith.addf %12, %16 : vector<16x32xf32>
    %c0_12 = arith.constant 0 : index
    %c0_13 = arith.constant 0 : index
    %18 = vector.load %arg3[%c0_12, %c0_13] : memref<16x1xf32, #tpu.memory_space<vmem>>, vector<16x1xf32>
    %19 = vector.broadcast %18 : vector<16x1xf32> to vector<16x32xf32>
    %20 = arith.addf %17, %19 : vector<16x32xf32>
    %cst_14 = arith.constant 0.000000e+00 : f32
    %21 = vector.broadcast %cst_14 : f32 to vector<16x32xf32>
    %22 = arith.maximumf %20, %21 : vector<16x32xf32>
    %23 = arith.truncf %22 : vector<16x32xf32> to vector<16x32xbf16>
    %c0_15 = arith.constant 0 : index
    %c0_16 = arith.constant 0 : index
    %c0_17 = arith.constant 0 : index
    %24 = vector.load %arg4[%c0_15, %c0_16, %c0_17] : memref<1x16x32xbf16, #tpu.memory_space<vmem>>, vector<1x16x32xbf16>
    %25 = vector.shape_cast %24 : vector<1x16x32xbf16> to vector<16x32xbf16>
    %26 = vector.shape_cast %23 : vector<16x32xbf16> to vector<1x16x32xbf16>
    tpu.vector_store %arg4[%c0_15, %c0_16, %c0_17], %26 {strides = array<i32>} : memref<1x16x32xbf16, #tpu.memory_space<vmem>>, vector<1x16x32xbf16>,
    return
  }
  func.func @transform_0(%arg0: i32) -> (i32, i32, i32) {
    %c0_i32 = arith.constant 0 : i32
    %c0_i32_0 = arith.constant 0 : i32
    %c0_i32_1 = arith.constant 0 : i32
    return %arg0, %c0_i32, %c0_i32_0 : i32, i32, i32
  }
  func.func @transform_1(%arg0: i32) -> (i32, i32, i32) {
    %c0_i32 = arith.constant 0 : i32
    %c0_i32_0 = arith.constant 0 : i32
    %c0_i32_1 = arith.constant 0 : i32
    %c0_i32_2 = arith.constant 0 : i32
    return %c0_i32, %c0_i32_0, %c0_i32_1 : i32, i32, i32
  }
  func.func @transform_2(%arg0: i32) -> (i32, i32) {
    %c0_i32 = arith.constant 0 : i32
    %c0_i32_0 = arith.constant 0 : i32
    %c0_i32_1 = arith.constant 0 : i32
    return %c0_i32, %c0_i32_0 : i32, i32
  }
  func.func @transform_3(%arg0: i32) -> (i32, i32, i32) {
    %c0_i32 = arith.constant 0 : i32
    %c0_i32_0 = arith.constant 0 : i32
    %c0_i32_1 = arith.constant 0 : i32
    return %arg0, %c0_i32, %c0_i32_0 : i32, i32, i32
  }
}

module attributes {stable_mosaic.version = 11 : i64} {
  func.func @_conv_taps_kernel(%arg0: i32, %arg1: memref<1x32x18xbf16, #tpu.memory_space<vmem>>, %arg2: memref<3x32x32xbf16, #tpu.memory_space<vmem>>, %arg3: memref<32x1xf32, #tpu.memory_space<vmem>>, %arg4: memref<1x32x16xbf16, #tpu.memory_space<vmem>>) attributes {dimension_semantics = [#tpu.dimension_semantics<parallel>], iteration_bounds = array<i64: 2>, scalar_prefetch = 0 : i64, scratch_operands = 0 : i64, tpu.core_type = #tpu.core_type<tc>, window_params = [{transform_indices = @transform_0, window_bounds = array<i64: 1, 32, 18>}, {pipeline_mode = #tpu.pipeline_mode<synchronous>, transform_indices = @transform_1, window_bounds = array<i64: 3, 32, 32>}, {pipeline_mode = #tpu.pipeline_mode<synchronous>, transform_indices = @transform_2, window_bounds = array<i64: 32, 1>}, {transform_indices = @transform_3, window_bounds = array<i64: 1, 32, 16>}]} {
    %c0 = arith.constant 0 : index
    %c0_0 = arith.constant 0 : index
    %c0_1 = arith.constant 0 : index
    %0 = vector.load %arg1[%c0, %c0_0, %c0_1] : memref<1x32x18xbf16, #tpu.memory_space<vmem>>, vector<1x32x18xbf16>
    %1 = vector.shape_cast %0 : vector<1x32x18xbf16> to vector<32x18xbf16>
    %cst = arith.constant 0.000000e+00 : f32
    %2 = vector.broadcast %cst : f32 to vector<32x16xf32>
    %c0_2 = arith.constant 0 : index
    %c0_3 = arith.constant 0 : index
    %c0_4 = arith.constant 0 : index
    %3 = vector.load %arg2[%c0_2, %c0_3, %c0_4] : memref<3x32x32xbf16, #tpu.memory_space<vmem>>, vector<1x32x32xbf16>
    %4 = vector.shape_cast %3 : vector<1x32x32xbf16> to vector<32x32xbf16>
    %5 = vector.extract_strided_slice %1 {offsets = [0, 0], sizes = [32, 16], strides = [1, 1]} : vector<32x18xbf16> to vector<32x16xbf16>
    %cst_5 = arith.constant dense<0.000000e+00> : vector<32x16xf32>
    %6 = tpu.matmul %4, %5, %cst_5 {dimension_numbers = #tpu.dot_dimension_numbers<[1], [0], [0], [1], [0, 0, 1, 1], [], []>} : vector<32x32xbf16>, vector<32x16xbf16>, vector<32x16xf32> -> vector<32x16xf32>
    %7 = arith.addf %2, %6 : vector<32x16xf32>
    %c1 = arith.constant 1 : index
    %c0_6 = arith.constant 0 : index
    %c0_7 = arith.constant 0 : index
    %8 = vector.load %arg2[%c1, %c0_6, %c0_7] : memref<3x32x32xbf16, #tpu.memory_space<vmem>>, vector<1x32x32xbf16>
    %9 = vector.shape_cast %8 : vector<1x32x32xbf16> to vector<32x32xbf16>
    %10 = vector.extract_strided_slice %1 {offsets = [0, 1], sizes = [32, 16], strides = [1, 1]} : vector<32x18xbf16> to vector<32x16xbf16>
    %cst_8 = arith.constant dense<0.000000e+00> : vector<32x16xf32>
    %11 = tpu.matmul %9, %10, %cst_8 {dimension_numbers = #tpu.dot_dimension_numbers<[1], [0], [0], [1], [0, 0, 1, 1], [], []>} : vector<32x32xbf16>, vector<32x16xbf16>, vector<32x16xf32> -> vector<32x16xf32>
    %12 = arith.addf %7, %11 : vector<32x16xf32>
    %c2 = arith.constant 2 : index
    %c0_9 = arith.constant 0 : index
    %c0_10 = arith.constant 0 : index
    %13 = vector.load %arg2[%c2, %c0_9, %c0_10] : memref<3x32x32xbf16, #tpu.memory_space<vmem>>, vector<1x32x32xbf16>
    %14 = vector.shape_cast %13 : vector<1x32x32xbf16> to vector<32x32xbf16>
    %15 = vector.extract_strided_slice %1 {offsets = [0, 2], sizes = [32, 16], strides = [1, 1]} : vector<32x18xbf16> to vector<32x16xbf16>
    %cst_11 = arith.constant dense<0.000000e+00> : vector<32x16xf32>
    %16 = tpu.matmul %14, %15, %cst_11 {dimension_numbers = #tpu.dot_dimension_numbers<[1], [0], [0], [1], [0, 0, 1, 1], [], []>} : vector<32x32xbf16>, vector<32x16xbf16>, vector<32x16xf32> -> vector<32x16xf32>
    %17 = arith.addf %12, %16 : vector<32x16xf32>
    %c0_12 = arith.constant 0 : index
    %c0_13 = arith.constant 0 : index
    %18 = vector.load %arg3[%c0_12, %c0_13] : memref<32x1xf32, #tpu.memory_space<vmem>>, vector<32x1xf32>
    %19 = vector.broadcast %18 : vector<32x1xf32> to vector<32x16xf32>
    %20 = arith.addf %17, %19 : vector<32x16xf32>
    %cst_14 = arith.constant 0.000000e+00 : f32
    %21 = vector.broadcast %cst_14 : f32 to vector<32x16xf32>
    %22 = arith.maximumf %20, %21 : vector<32x16xf32>
    %23 = arith.truncf %22 : vector<32x16xf32> to vector<32x16xbf16>
    %c0_15 = arith.constant 0 : index
    %c0_16 = arith.constant 0 : index
    %c0_17 = arith.constant 0 : index
    %24 = vector.load %arg4[%c0_15, %c0_16, %c0_17] : memref<1x32x16xbf16, #tpu.memory_space<vmem>>, vector<1x32x16xbf16>
    %25 = vector.shape_cast %24 : vector<1x32x16xbf16> to vector<32x16xbf16>
    %26 = vector.shape_cast %23 : vector<32x16xbf16> to vector<1x32x16xbf16>
    tpu.vector_store %arg4[%c0_15, %c0_16, %c0_17], %26 {strides = array<i32>} : memref<1x32x16xbf16, #tpu.memory_space<vmem>>, vector<1x32x16xbf16>,
    return
  }
  func.func @transform_0(%arg0: i32) -> (i32, i32, i32) {
    %c0_i32 = arith.constant 0 : i32
    %c0_i32_0 = arith.constant 0 : i32
    %c0_i32_1 = arith.constant 0 : i32
    return %arg0, %c0_i32, %c0_i32_0 : i32, i32, i32
  }
  func.func @transform_1(%arg0: i32) -> (i32, i32, i32) {
    %c0_i32 = arith.constant 0 : i32
    %c0_i32_0 = arith.constant 0 : i32
    %c0_i32_1 = arith.constant 0 : i32
    %c0_i32_2 = arith.constant 0 : i32
    return %c0_i32, %c0_i32_0, %c0_i32_1 : i32, i32, i32
  }
  func.func @transform_2(%arg0: i32) -> (i32, i32) {
    %c0_i32 = arith.constant 0 : i32
    %c0_i32_0 = arith.constant 0 : i32
    %c0_i32_1 = arith.constant 0 : i32
    return %c0_i32, %c0_i32_0 : i32, i32
  }
  func.func @transform_3(%arg0: i32) -> (i32, i32, i32) {
    %c0_i32 = arith.constant 0 : i32
    %c0_i32_0 = arith.constant 0 : i32
    %c0_i32_1 = arith.constant 0 : i32
    return %arg0, %c0_i32, %c0_i32_0 : i32, i32, i32
  }
}

module attributes {stable_mosaic.version = 11 : i64} {
  func.func @_conv_taps_kernel(%arg0: i32, %arg1: memref<1x64x10xbf16, #tpu.memory_space<vmem>>, %arg2: memref<3x32x64xbf16, #tpu.memory_space<vmem>>, %arg3: memref<32x1xf32, #tpu.memory_space<vmem>>, %arg4: memref<1x32x8xbf16, #tpu.memory_space<vmem>>) attributes {dimension_semantics = [#tpu.dimension_semantics<parallel>], iteration_bounds = array<i64: 2>, scalar_prefetch = 0 : i64, scratch_operands = 0 : i64, tpu.core_type = #tpu.core_type<tc>, window_params = [{transform_indices = @transform_0, window_bounds = array<i64: 1, 64, 10>}, {pipeline_mode = #tpu.pipeline_mode<synchronous>, transform_indices = @transform_1, window_bounds = array<i64: 3, 32, 64>}, {pipeline_mode = #tpu.pipeline_mode<synchronous>, transform_indices = @transform_2, window_bounds = array<i64: 32, 1>}, {transform_indices = @transform_3, window_bounds = array<i64: 1, 32, 8>}]} {
    %c0 = arith.constant 0 : index
    %c0_0 = arith.constant 0 : index
    %c0_1 = arith.constant 0 : index
    %0 = vector.load %arg1[%c0, %c0_0, %c0_1] : memref<1x64x10xbf16, #tpu.memory_space<vmem>>, vector<1x64x10xbf16>
    %1 = vector.shape_cast %0 : vector<1x64x10xbf16> to vector<64x10xbf16>
    %cst = arith.constant 0.000000e+00 : f32
    %2 = vector.broadcast %cst : f32 to vector<32x8xf32>
    %c0_2 = arith.constant 0 : index
    %c0_3 = arith.constant 0 : index
    %c0_4 = arith.constant 0 : index
    %3 = vector.load %arg2[%c0_2, %c0_3, %c0_4] : memref<3x32x64xbf16, #tpu.memory_space<vmem>>, vector<1x32x64xbf16>
    %4 = vector.shape_cast %3 : vector<1x32x64xbf16> to vector<32x64xbf16>
    %5 = vector.extract_strided_slice %1 {offsets = [0, 0], sizes = [64, 8], strides = [1, 1]} : vector<64x10xbf16> to vector<64x8xbf16>
    %cst_5 = arith.constant dense<0.000000e+00> : vector<32x8xf32>
    %6 = tpu.matmul %4, %5, %cst_5 {dimension_numbers = #tpu.dot_dimension_numbers<[1], [0], [0], [1], [0, 0, 1, 1], [], []>} : vector<32x64xbf16>, vector<64x8xbf16>, vector<32x8xf32> -> vector<32x8xf32>
    %7 = arith.addf %2, %6 : vector<32x8xf32>
    %c1 = arith.constant 1 : index
    %c0_6 = arith.constant 0 : index
    %c0_7 = arith.constant 0 : index
    %8 = vector.load %arg2[%c1, %c0_6, %c0_7] : memref<3x32x64xbf16, #tpu.memory_space<vmem>>, vector<1x32x64xbf16>
    %9 = vector.shape_cast %8 : vector<1x32x64xbf16> to vector<32x64xbf16>
    %10 = vector.extract_strided_slice %1 {offsets = [0, 1], sizes = [64, 8], strides = [1, 1]} : vector<64x10xbf16> to vector<64x8xbf16>
    %cst_8 = arith.constant dense<0.000000e+00> : vector<32x8xf32>
    %11 = tpu.matmul %9, %10, %cst_8 {dimension_numbers = #tpu.dot_dimension_numbers<[1], [0], [0], [1], [0, 0, 1, 1], [], []>} : vector<32x64xbf16>, vector<64x8xbf16>, vector<32x8xf32> -> vector<32x8xf32>
    %12 = arith.addf %7, %11 : vector<32x8xf32>
    %c2 = arith.constant 2 : index
    %c0_9 = arith.constant 0 : index
    %c0_10 = arith.constant 0 : index
    %13 = vector.load %arg2[%c2, %c0_9, %c0_10] : memref<3x32x64xbf16, #tpu.memory_space<vmem>>, vector<1x32x64xbf16>
    %14 = vector.shape_cast %13 : vector<1x32x64xbf16> to vector<32x64xbf16>
    %15 = vector.extract_strided_slice %1 {offsets = [0, 2], sizes = [64, 8], strides = [1, 1]} : vector<64x10xbf16> to vector<64x8xbf16>
    %cst_11 = arith.constant dense<0.000000e+00> : vector<32x8xf32>
    %16 = tpu.matmul %14, %15, %cst_11 {dimension_numbers = #tpu.dot_dimension_numbers<[1], [0], [0], [1], [0, 0, 1, 1], [], []>} : vector<32x64xbf16>, vector<64x8xbf16>, vector<32x8xf32> -> vector<32x8xf32>
    %17 = arith.addf %12, %16 : vector<32x8xf32>
    %c0_12 = arith.constant 0 : index
    %c0_13 = arith.constant 0 : index
    %18 = vector.load %arg3[%c0_12, %c0_13] : memref<32x1xf32, #tpu.memory_space<vmem>>, vector<32x1xf32>
    %19 = vector.broadcast %18 : vector<32x1xf32> to vector<32x8xf32>
    %20 = arith.addf %17, %19 : vector<32x8xf32>
    %cst_14 = arith.constant 0.000000e+00 : f32
    %21 = vector.broadcast %cst_14 : f32 to vector<32x8xf32>
    %22 = arith.maximumf %20, %21 : vector<32x8xf32>
    %23 = arith.truncf %22 : vector<32x8xf32> to vector<32x8xbf16>
    %c0_15 = arith.constant 0 : index
    %c0_16 = arith.constant 0 : index
    %c0_17 = arith.constant 0 : index
    %24 = vector.load %arg4[%c0_15, %c0_16, %c0_17] : memref<1x32x8xbf16, #tpu.memory_space<vmem>>, vector<1x32x8xbf16>
    %25 = vector.shape_cast %24 : vector<1x32x8xbf16> to vector<32x8xbf16>
    %26 = vector.shape_cast %23 : vector<32x8xbf16> to vector<1x32x8xbf16>
    tpu.vector_store %arg4[%c0_15, %c0_16, %c0_17], %26 {strides = array<i32>} : memref<1x32x8xbf16, #tpu.memory_space<vmem>>, vector<1x32x8xbf16>,
    return
  }
  func.func @transform_0(%arg0: i32) -> (i32, i32, i32) {
    %c0_i32 = arith.constant 0 : i32
    %c0_i32_0 = arith.constant 0 : i32
    %c0_i32_1 = arith.constant 0 : i32
    return %arg0, %c0_i32, %c0_i32_0 : i32, i32, i32
  }
  func.func @transform_1(%arg0: i32) -> (i32, i32, i32) {
    %c0_i32 = arith.constant 0 : i32
    %c0_i32_0 = arith.constant 0 : i32
    %c0_i32_1 = arith.constant 0 : i32
    %c0_i32_2 = arith.constant 0 : i32
    return %c0_i32, %c0_i32_0, %c0_i32_1 : i32, i32, i32
  }
  func.func @transform_2(%arg0: i32) -> (i32, i32) {
    %c0_i32 = arith.constant 0 : i32
    %c0_i32_0 = arith.constant 0 : i32
    %c0_i32_1 = arith.constant 0 : i32
    return %c0_i32, %c0_i32_0 : i32, i32
  }
  func.func @transform_3(%arg0: i32) -> (i32, i32, i32) {
    %c0_i32 = arith.constant 0 : i32
    %c0_i32_0 = arith.constant 0 : i32
    %c0_i32_1 = arith.constant 0 : i32
    return %arg0, %c0_i32, %c0_i32_0 : i32, i32, i32
  }
}

module attributes {stable_mosaic.version = 11 : i64} {
  func.func @_conv_taps_kernel(%arg0: i32, %arg1: memref<1x64x6xbf16, #tpu.memory_space<vmem>>, %arg2: memref<3x64x64xbf16, #tpu.memory_space<vmem>>, %arg3: memref<64x1xf32, #tpu.memory_space<vmem>>, %arg4: memref<1x64x4xbf16, #tpu.memory_space<vmem>>) attributes {dimension_semantics = [#tpu.dimension_semantics<parallel>], iteration_bounds = array<i64: 2>, scalar_prefetch = 0 : i64, scratch_operands = 0 : i64, tpu.core_type = #tpu.core_type<tc>, window_params = [{transform_indices = @transform_0, window_bounds = array<i64: 1, 64, 6>}, {pipeline_mode = #tpu.pipeline_mode<synchronous>, transform_indices = @transform_1, window_bounds = array<i64: 3, 64, 64>}, {pipeline_mode = #tpu.pipeline_mode<synchronous>, transform_indices = @transform_2, window_bounds = array<i64: 64, 1>}, {transform_indices = @transform_3, window_bounds = array<i64: 1, 64, 4>}]} {
    %c0 = arith.constant 0 : index
    %c0_0 = arith.constant 0 : index
    %c0_1 = arith.constant 0 : index
    %0 = vector.load %arg1[%c0, %c0_0, %c0_1] : memref<1x64x6xbf16, #tpu.memory_space<vmem>>, vector<1x64x6xbf16>
    %1 = vector.shape_cast %0 : vector<1x64x6xbf16> to vector<64x6xbf16>
    %cst = arith.constant 0.000000e+00 : f32
    %2 = vector.broadcast %cst : f32 to vector<64x4xf32>
    %c0_2 = arith.constant 0 : index
    %c0_3 = arith.constant 0 : index
    %c0_4 = arith.constant 0 : index
    %3 = vector.load %arg2[%c0_2, %c0_3, %c0_4] : memref<3x64x64xbf16, #tpu.memory_space<vmem>>, vector<1x64x64xbf16>
    %4 = vector.shape_cast %3 : vector<1x64x64xbf16> to vector<64x64xbf16>
    %5 = vector.extract_strided_slice %1 {offsets = [0, 0], sizes = [64, 4], strides = [1, 1]} : vector<64x6xbf16> to vector<64x4xbf16>
    %cst_5 = arith.constant dense<0.000000e+00> : vector<64x4xf32>
    %6 = tpu.matmul %4, %5, %cst_5 {dimension_numbers = #tpu.dot_dimension_numbers<[1], [0], [0], [1], [0, 0, 1, 1], [], []>} : vector<64x64xbf16>, vector<64x4xbf16>, vector<64x4xf32> -> vector<64x4xf32>
    %7 = arith.addf %2, %6 : vector<64x4xf32>
    %c1 = arith.constant 1 : index
    %c0_6 = arith.constant 0 : index
    %c0_7 = arith.constant 0 : index
    %8 = vector.load %arg2[%c1, %c0_6, %c0_7] : memref<3x64x64xbf16, #tpu.memory_space<vmem>>, vector<1x64x64xbf16>
    %9 = vector.shape_cast %8 : vector<1x64x64xbf16> to vector<64x64xbf16>
    %10 = vector.extract_strided_slice %1 {offsets = [0, 1], sizes = [64, 4], strides = [1, 1]} : vector<64x6xbf16> to vector<64x4xbf16>
    %cst_8 = arith.constant dense<0.000000e+00> : vector<64x4xf32>
    %11 = tpu.matmul %9, %10, %cst_8 {dimension_numbers = #tpu.dot_dimension_numbers<[1], [0], [0], [1], [0, 0, 1, 1], [], []>} : vector<64x64xbf16>, vector<64x4xbf16>, vector<64x4xf32> -> vector<64x4xf32>
    %12 = arith.addf %7, %11 : vector<64x4xf32>
    %c2 = arith.constant 2 : index
    %c0_9 = arith.constant 0 : index
    %c0_10 = arith.constant 0 : index
    %13 = vector.load %arg2[%c2, %c0_9, %c0_10] : memref<3x64x64xbf16, #tpu.memory_space<vmem>>, vector<1x64x64xbf16>
    %14 = vector.shape_cast %13 : vector<1x64x64xbf16> to vector<64x64xbf16>
    %15 = vector.extract_strided_slice %1 {offsets = [0, 2], sizes = [64, 4], strides = [1, 1]} : vector<64x6xbf16> to vector<64x4xbf16>
    %cst_11 = arith.constant dense<0.000000e+00> : vector<64x4xf32>
    %16 = tpu.matmul %14, %15, %cst_11 {dimension_numbers = #tpu.dot_dimension_numbers<[1], [0], [0], [1], [0, 0, 1, 1], [], []>} : vector<64x64xbf16>, vector<64x4xbf16>, vector<64x4xf32> -> vector<64x4xf32>
    %17 = arith.addf %12, %16 : vector<64x4xf32>
    %c0_12 = arith.constant 0 : index
    %c0_13 = arith.constant 0 : index
    %18 = vector.load %arg3[%c0_12, %c0_13] : memref<64x1xf32, #tpu.memory_space<vmem>>, vector<64x1xf32>
    %19 = vector.broadcast %18 : vector<64x1xf32> to vector<64x4xf32>
    %20 = arith.addf %17, %19 : vector<64x4xf32>
    %cst_14 = arith.constant 0.000000e+00 : f32
    %21 = vector.broadcast %cst_14 : f32 to vector<64x4xf32>
    %22 = arith.maximumf %20, %21 : vector<64x4xf32>
    %23 = arith.truncf %22 : vector<64x4xf32> to vector<64x4xbf16>
    %c0_15 = arith.constant 0 : index
    %c0_16 = arith.constant 0 : index
    %c0_17 = arith.constant 0 : index
    %24 = vector.load %arg4[%c0_15, %c0_16, %c0_17] : memref<1x64x4xbf16, #tpu.memory_space<vmem>>, vector<1x64x4xbf16>
    %25 = vector.shape_cast %24 : vector<1x64x4xbf16> to vector<64x4xbf16>
    %26 = vector.shape_cast %23 : vector<64x4xbf16> to vector<1x64x4xbf16>
    tpu.vector_store %arg4[%c0_15, %c0_16, %c0_17], %26 {strides = array<i32>} : memref<1x64x4xbf16, #tpu.memory_space<vmem>>, vector<1x64x4xbf16>,
    return
  }
  func.func @transform_0(%arg0: i32) -> (i32, i32, i32) {
    %c0_i32 = arith.constant 0 : i32
    %c0_i32_0 = arith.constant 0 : i32
    %c0_i32_1 = arith.constant 0 : i32
    return %arg0, %c0_i32, %c0_i32_0 : i32, i32, i32
  }
  func.func @transform_1(%arg0: i32) -> (i32, i32, i32) {
    %c0_i32 = arith.constant 0 : i32
    %c0_i32_0 = arith.constant 0 : i32
    %c0_i32_1 = arith.constant 0 : i32
    %c0_i32_2 = arith.constant 0 : i32
    return %c0_i32, %c0_i32_0, %c0_i32_1 : i32, i32, i32
  }
  func.func @transform_2(%arg0: i32) -> (i32, i32) {
    %c0_i32 = arith.constant 0 : i32
    %c0_i32_0 = arith.constant 0 : i32
    %c0_i32_1 = arith.constant 0 : i32
    return %c0_i32, %c0_i32_0 : i32, i32
  }
  func.func @transform_3(%arg0: i32) -> (i32, i32, i32) {
    %c0_i32 = arith.constant 0 : i32
    %c0_i32_0 = arith.constant 0 : i32
    %c0_i32_1 = arith.constant 0 : i32
    return %arg0, %c0_i32, %c0_i32_0 : i32, i32, i32
  }
}

module attributes {stable_mosaic.version = 11 : i64} {
  func.func @_conv_taps_kernel(%arg0: i32, %arg1: memref<1x64x10xbf16, #tpu.memory_space<vmem>>, %arg2: memref<3x64x64xbf16, #tpu.memory_space<vmem>>, %arg3: memref<64x1xf32, #tpu.memory_space<vmem>>, %arg4: memref<1x64x8xbf16, #tpu.memory_space<vmem>>) attributes {dimension_semantics = [#tpu.dimension_semantics<parallel>], iteration_bounds = array<i64: 2>, scalar_prefetch = 0 : i64, scratch_operands = 0 : i64, tpu.core_type = #tpu.core_type<tc>, window_params = [{transform_indices = @transform_0, window_bounds = array<i64: 1, 64, 10>}, {pipeline_mode = #tpu.pipeline_mode<synchronous>, transform_indices = @transform_1, window_bounds = array<i64: 3, 64, 64>}, {pipeline_mode = #tpu.pipeline_mode<synchronous>, transform_indices = @transform_2, window_bounds = array<i64: 64, 1>}, {transform_indices = @transform_3, window_bounds = array<i64: 1, 64, 8>}]} {
    %c0 = arith.constant 0 : index
    %c0_0 = arith.constant 0 : index
    %c0_1 = arith.constant 0 : index
    %0 = vector.load %arg1[%c0, %c0_0, %c0_1] : memref<1x64x10xbf16, #tpu.memory_space<vmem>>, vector<1x64x10xbf16>
    %1 = vector.shape_cast %0 : vector<1x64x10xbf16> to vector<64x10xbf16>
    %cst = arith.constant 0.000000e+00 : f32
    %2 = vector.broadcast %cst : f32 to vector<64x8xf32>
    %c0_2 = arith.constant 0 : index
    %c0_3 = arith.constant 0 : index
    %c0_4 = arith.constant 0 : index
    %3 = vector.load %arg2[%c0_2, %c0_3, %c0_4] : memref<3x64x64xbf16, #tpu.memory_space<vmem>>, vector<1x64x64xbf16>
    %4 = vector.shape_cast %3 : vector<1x64x64xbf16> to vector<64x64xbf16>
    %5 = vector.extract_strided_slice %1 {offsets = [0, 0], sizes = [64, 8], strides = [1, 1]} : vector<64x10xbf16> to vector<64x8xbf16>
    %cst_5 = arith.constant dense<0.000000e+00> : vector<64x8xf32>
    %6 = tpu.matmul %4, %5, %cst_5 {dimension_numbers = #tpu.dot_dimension_numbers<[1], [0], [0], [1], [0, 0, 1, 1], [], []>} : vector<64x64xbf16>, vector<64x8xbf16>, vector<64x8xf32> -> vector<64x8xf32>
    %7 = arith.addf %2, %6 : vector<64x8xf32>
    %c1 = arith.constant 1 : index
    %c0_6 = arith.constant 0 : index
    %c0_7 = arith.constant 0 : index
    %8 = vector.load %arg2[%c1, %c0_6, %c0_7] : memref<3x64x64xbf16, #tpu.memory_space<vmem>>, vector<1x64x64xbf16>
    %9 = vector.shape_cast %8 : vector<1x64x64xbf16> to vector<64x64xbf16>
    %10 = vector.extract_strided_slice %1 {offsets = [0, 1], sizes = [64, 8], strides = [1, 1]} : vector<64x10xbf16> to vector<64x8xbf16>
    %cst_8 = arith.constant dense<0.000000e+00> : vector<64x8xf32>
    %11 = tpu.matmul %9, %10, %cst_8 {dimension_numbers = #tpu.dot_dimension_numbers<[1], [0], [0], [1], [0, 0, 1, 1], [], []>} : vector<64x64xbf16>, vector<64x8xbf16>, vector<64x8xf32> -> vector<64x8xf32>
    %12 = arith.addf %7, %11 : vector<64x8xf32>
    %c2 = arith.constant 2 : index
    %c0_9 = arith.constant 0 : index
    %c0_10 = arith.constant 0 : index
    %13 = vector.load %arg2[%c2, %c0_9, %c0_10] : memref<3x64x64xbf16, #tpu.memory_space<vmem>>, vector<1x64x64xbf16>
    %14 = vector.shape_cast %13 : vector<1x64x64xbf16> to vector<64x64xbf16>
    %15 = vector.extract_strided_slice %1 {offsets = [0, 2], sizes = [64, 8], strides = [1, 1]} : vector<64x10xbf16> to vector<64x8xbf16>
    %cst_11 = arith.constant dense<0.000000e+00> : vector<64x8xf32>
    %16 = tpu.matmul %14, %15, %cst_11 {dimension_numbers = #tpu.dot_dimension_numbers<[1], [0], [0], [1], [0, 0, 1, 1], [], []>} : vector<64x64xbf16>, vector<64x8xbf16>, vector<64x8xf32> -> vector<64x8xf32>
    %17 = arith.addf %12, %16 : vector<64x8xf32>
    %c0_12 = arith.constant 0 : index
    %c0_13 = arith.constant 0 : index
    %18 = vector.load %arg3[%c0_12, %c0_13] : memref<64x1xf32, #tpu.memory_space<vmem>>, vector<64x1xf32>
    %19 = vector.broadcast %18 : vector<64x1xf32> to vector<64x8xf32>
    %20 = arith.addf %17, %19 : vector<64x8xf32>
    %cst_14 = arith.constant 0.000000e+00 : f32
    %21 = vector.broadcast %cst_14 : f32 to vector<64x8xf32>
    %22 = arith.maximumf %20, %21 : vector<64x8xf32>
    %23 = arith.truncf %22 : vector<64x8xf32> to vector<64x8xbf16>
    %c0_15 = arith.constant 0 : index
    %c0_16 = arith.constant 0 : index
    %c0_17 = arith.constant 0 : index
    %24 = vector.load %arg4[%c0_15, %c0_16, %c0_17] : memref<1x64x8xbf16, #tpu.memory_space<vmem>>, vector<1x64x8xbf16>
    %25 = vector.shape_cast %24 : vector<1x64x8xbf16> to vector<64x8xbf16>
    %26 = vector.shape_cast %23 : vector<64x8xbf16> to vector<1x64x8xbf16>
    tpu.vector_store %arg4[%c0_15, %c0_16, %c0_17], %26 {strides = array<i32>} : memref<1x64x8xbf16, #tpu.memory_space<vmem>>, vector<1x64x8xbf16>,
    return
  }
  func.func @transform_0(%arg0: i32) -> (i32, i32, i32) {
    %c0_i32 = arith.constant 0 : i32
    %c0_i32_0 = arith.constant 0 : i32
    %c0_i32_1 = arith.constant 0 : i32
    return %arg0, %c0_i32, %c0_i32_0 : i32, i32, i32
  }
  func.func @transform_1(%arg0: i32) -> (i32, i32, i32) {
    %c0_i32 = arith.constant 0 : i32
    %c0_i32_0 = arith.constant 0 : i32
    %c0_i32_1 = arith.constant 0 : i32
    %c0_i32_2 = arith.constant 0 : i32
    return %c0_i32, %c0_i32_0, %c0_i32_1 : i32, i32, i32
  }
  func.func @transform_2(%arg0: i32) -> (i32, i32) {
    %c0_i32 = arith.constant 0 : i32
    %c0_i32_0 = arith.constant 0 : i32
    %c0_i32_1 = arith.constant 0 : i32
    return %c0_i32, %c0_i32_0 : i32, i32
  }
  func.func @transform_3(%arg0: i32) -> (i32, i32, i32) {
    %c0_i32 = arith.constant 0 : i32
    %c0_i32_0 = arith.constant 0 : i32
    %c0_i32_1 = arith.constant 0 : i32
    return %arg0, %c0_i32, %c0_i32_0 : i32, i32, i32
  }
}

module attributes {stable_mosaic.version = 11 : i64} {
  func.func @_conv_taps_kernel(%arg0: i32, %arg1: memref<1x64x18xbf16, #tpu.memory_space<vmem>>, %arg2: memref<3x32x64xbf16, #tpu.memory_space<vmem>>, %arg3: memref<32x1xf32, #tpu.memory_space<vmem>>, %arg4: memref<1x32x16xbf16, #tpu.memory_space<vmem>>) attributes {dimension_semantics = [#tpu.dimension_semantics<parallel>], iteration_bounds = array<i64: 2>, scalar_prefetch = 0 : i64, scratch_operands = 0 : i64, tpu.core_type = #tpu.core_type<tc>, window_params = [{transform_indices = @transform_0, window_bounds = array<i64: 1, 64, 18>}, {pipeline_mode = #tpu.pipeline_mode<synchronous>, transform_indices = @transform_1, window_bounds = array<i64: 3, 32, 64>}, {pipeline_mode = #tpu.pipeline_mode<synchronous>, transform_indices = @transform_2, window_bounds = array<i64: 32, 1>}, {transform_indices = @transform_3, window_bounds = array<i64: 1, 32, 16>}]} {
    %c0 = arith.constant 0 : index
    %c0_0 = arith.constant 0 : index
    %c0_1 = arith.constant 0 : index
    %0 = vector.load %arg1[%c0, %c0_0, %c0_1] : memref<1x64x18xbf16, #tpu.memory_space<vmem>>, vector<1x64x18xbf16>
    %1 = vector.shape_cast %0 : vector<1x64x18xbf16> to vector<64x18xbf16>
    %cst = arith.constant 0.000000e+00 : f32
    %2 = vector.broadcast %cst : f32 to vector<32x16xf32>
    %c0_2 = arith.constant 0 : index
    %c0_3 = arith.constant 0 : index
    %c0_4 = arith.constant 0 : index
    %3 = vector.load %arg2[%c0_2, %c0_3, %c0_4] : memref<3x32x64xbf16, #tpu.memory_space<vmem>>, vector<1x32x64xbf16>
    %4 = vector.shape_cast %3 : vector<1x32x64xbf16> to vector<32x64xbf16>
    %5 = vector.extract_strided_slice %1 {offsets = [0, 0], sizes = [64, 16], strides = [1, 1]} : vector<64x18xbf16> to vector<64x16xbf16>
    %cst_5 = arith.constant dense<0.000000e+00> : vector<32x16xf32>
    %6 = tpu.matmul %4, %5, %cst_5 {dimension_numbers = #tpu.dot_dimension_numbers<[1], [0], [0], [1], [0, 0, 1, 1], [], []>} : vector<32x64xbf16>, vector<64x16xbf16>, vector<32x16xf32> -> vector<32x16xf32>
    %7 = arith.addf %2, %6 : vector<32x16xf32>
    %c1 = arith.constant 1 : index
    %c0_6 = arith.constant 0 : index
    %c0_7 = arith.constant 0 : index
    %8 = vector.load %arg2[%c1, %c0_6, %c0_7] : memref<3x32x64xbf16, #tpu.memory_space<vmem>>, vector<1x32x64xbf16>
    %9 = vector.shape_cast %8 : vector<1x32x64xbf16> to vector<32x64xbf16>
    %10 = vector.extract_strided_slice %1 {offsets = [0, 1], sizes = [64, 16], strides = [1, 1]} : vector<64x18xbf16> to vector<64x16xbf16>
    %cst_8 = arith.constant dense<0.000000e+00> : vector<32x16xf32>
    %11 = tpu.matmul %9, %10, %cst_8 {dimension_numbers = #tpu.dot_dimension_numbers<[1], [0], [0], [1], [0, 0, 1, 1], [], []>} : vector<32x64xbf16>, vector<64x16xbf16>, vector<32x16xf32> -> vector<32x16xf32>
    %12 = arith.addf %7, %11 : vector<32x16xf32>
    %c2 = arith.constant 2 : index
    %c0_9 = arith.constant 0 : index
    %c0_10 = arith.constant 0 : index
    %13 = vector.load %arg2[%c2, %c0_9, %c0_10] : memref<3x32x64xbf16, #tpu.memory_space<vmem>>, vector<1x32x64xbf16>
    %14 = vector.shape_cast %13 : vector<1x32x64xbf16> to vector<32x64xbf16>
    %15 = vector.extract_strided_slice %1 {offsets = [0, 2], sizes = [64, 16], strides = [1, 1]} : vector<64x18xbf16> to vector<64x16xbf16>
    %cst_11 = arith.constant dense<0.000000e+00> : vector<32x16xf32>
    %16 = tpu.matmul %14, %15, %cst_11 {dimension_numbers = #tpu.dot_dimension_numbers<[1], [0], [0], [1], [0, 0, 1, 1], [], []>} : vector<32x64xbf16>, vector<64x16xbf16>, vector<32x16xf32> -> vector<32x16xf32>
    %17 = arith.addf %12, %16 : vector<32x16xf32>
    %c0_12 = arith.constant 0 : index
    %c0_13 = arith.constant 0 : index
    %18 = vector.load %arg3[%c0_12, %c0_13] : memref<32x1xf32, #tpu.memory_space<vmem>>, vector<32x1xf32>
    %19 = vector.broadcast %18 : vector<32x1xf32> to vector<32x16xf32>
    %20 = arith.addf %17, %19 : vector<32x16xf32>
    %cst_14 = arith.constant 0.000000e+00 : f32
    %21 = vector.broadcast %cst_14 : f32 to vector<32x16xf32>
    %22 = arith.maximumf %20, %21 : vector<32x16xf32>
    %23 = arith.truncf %22 : vector<32x16xf32> to vector<32x16xbf16>
    %c0_15 = arith.constant 0 : index
    %c0_16 = arith.constant 0 : index
    %c0_17 = arith.constant 0 : index
    %24 = vector.load %arg4[%c0_15, %c0_16, %c0_17] : memref<1x32x16xbf16, #tpu.memory_space<vmem>>, vector<1x32x16xbf16>
    %25 = vector.shape_cast %24 : vector<1x32x16xbf16> to vector<32x16xbf16>
    %26 = vector.shape_cast %23 : vector<32x16xbf16> to vector<1x32x16xbf16>
    tpu.vector_store %arg4[%c0_15, %c0_16, %c0_17], %26 {strides = array<i32>} : memref<1x32x16xbf16, #tpu.memory_space<vmem>>, vector<1x32x16xbf16>,
    return
  }
  func.func @transform_0(%arg0: i32) -> (i32, i32, i32) {
    %c0_i32 = arith.constant 0 : i32
    %c0_i32_0 = arith.constant 0 : i32
    %c0_i32_1 = arith.constant 0 : i32
    return %arg0, %c0_i32, %c0_i32_0 : i32, i32, i32
  }
  func.func @transform_1(%arg0: i32) -> (i32, i32, i32) {
    %c0_i32 = arith.constant 0 : i32
    %c0_i32_0 = arith.constant 0 : i32
    %c0_i32_1 = arith.constant 0 : i32
    %c0_i32_2 = arith.constant 0 : i32
    return %c0_i32, %c0_i32_0, %c0_i32_1 : i32, i32, i32
  }
  func.func @transform_2(%arg0: i32) -> (i32, i32) {
    %c0_i32 = arith.constant 0 : i32
    %c0_i32_0 = arith.constant 0 : i32
    %c0_i32_1 = arith.constant 0 : i32
    return %c0_i32, %c0_i32_0 : i32, i32
  }
  func.func @transform_3(%arg0: i32) -> (i32, i32, i32) {
    %c0_i32 = arith.constant 0 : i32
    %c0_i32_0 = arith.constant 0 : i32
    %c0_i32_1 = arith.constant 0 : i32
    return %arg0, %c0_i32, %c0_i32_0 : i32, i32, i32
  }
}

module attributes {stable_mosaic.version = 11 : i64} {
  func.func @_conv_taps_kernel(%arg0: i32, %arg1: memref<1x32x34xbf16, #tpu.memory_space<vmem>>, %arg2: memref<3x32x32xbf16, #tpu.memory_space<vmem>>, %arg3: memref<32x1xf32, #tpu.memory_space<vmem>>, %arg4: memref<1x32x32xbf16, #tpu.memory_space<vmem>>) attributes {dimension_semantics = [#tpu.dimension_semantics<parallel>], iteration_bounds = array<i64: 2>, scalar_prefetch = 0 : i64, scratch_operands = 0 : i64, tpu.core_type = #tpu.core_type<tc>, window_params = [{transform_indices = @transform_0, window_bounds = array<i64: 1, 32, 34>}, {pipeline_mode = #tpu.pipeline_mode<synchronous>, transform_indices = @transform_1, window_bounds = array<i64: 3, 32, 32>}, {pipeline_mode = #tpu.pipeline_mode<synchronous>, transform_indices = @transform_2, window_bounds = array<i64: 32, 1>}, {transform_indices = @transform_3, window_bounds = array<i64: 1, 32, 32>}]} {
    %c0 = arith.constant 0 : index
    %c0_0 = arith.constant 0 : index
    %c0_1 = arith.constant 0 : index
    %0 = vector.load %arg1[%c0, %c0_0, %c0_1] : memref<1x32x34xbf16, #tpu.memory_space<vmem>>, vector<1x32x34xbf16>
    %1 = vector.shape_cast %0 : vector<1x32x34xbf16> to vector<32x34xbf16>
    %cst = arith.constant 0.000000e+00 : f32
    %2 = vector.broadcast %cst : f32 to vector<32x32xf32>
    %c0_2 = arith.constant 0 : index
    %c0_3 = arith.constant 0 : index
    %c0_4 = arith.constant 0 : index
    %3 = vector.load %arg2[%c0_2, %c0_3, %c0_4] : memref<3x32x32xbf16, #tpu.memory_space<vmem>>, vector<1x32x32xbf16>
    %4 = vector.shape_cast %3 : vector<1x32x32xbf16> to vector<32x32xbf16>
    %5 = vector.extract_strided_slice %1 {offsets = [0, 0], sizes = [32, 32], strides = [1, 1]} : vector<32x34xbf16> to vector<32x32xbf16>
    %cst_5 = arith.constant dense<0.000000e+00> : vector<32x32xf32>
    %6 = tpu.matmul %4, %5, %cst_5 {dimension_numbers = #tpu.dot_dimension_numbers<[1], [0], [0], [1], [0, 0, 1, 1], [], []>} : vector<32x32xbf16>, vector<32x32xbf16>, vector<32x32xf32> -> vector<32x32xf32>
    %7 = arith.addf %2, %6 : vector<32x32xf32>
    %c1 = arith.constant 1 : index
    %c0_6 = arith.constant 0 : index
    %c0_7 = arith.constant 0 : index
    %8 = vector.load %arg2[%c1, %c0_6, %c0_7] : memref<3x32x32xbf16, #tpu.memory_space<vmem>>, vector<1x32x32xbf16>
    %9 = vector.shape_cast %8 : vector<1x32x32xbf16> to vector<32x32xbf16>
    %10 = vector.extract_strided_slice %1 {offsets = [0, 1], sizes = [32, 32], strides = [1, 1]} : vector<32x34xbf16> to vector<32x32xbf16>
    %cst_8 = arith.constant dense<0.000000e+00> : vector<32x32xf32>
    %11 = tpu.matmul %9, %10, %cst_8 {dimension_numbers = #tpu.dot_dimension_numbers<[1], [0], [0], [1], [0, 0, 1, 1], [], []>} : vector<32x32xbf16>, vector<32x32xbf16>, vector<32x32xf32> -> vector<32x32xf32>
    %12 = arith.addf %7, %11 : vector<32x32xf32>
    %c2 = arith.constant 2 : index
    %c0_9 = arith.constant 0 : index
    %c0_10 = arith.constant 0 : index
    %13 = vector.load %arg2[%c2, %c0_9, %c0_10] : memref<3x32x32xbf16, #tpu.memory_space<vmem>>, vector<1x32x32xbf16>
    %14 = vector.shape_cast %13 : vector<1x32x32xbf16> to vector<32x32xbf16>
    %15 = vector.extract_strided_slice %1 {offsets = [0, 2], sizes = [32, 32], strides = [1, 1]} : vector<32x34xbf16> to vector<32x32xbf16>
    %cst_11 = arith.constant dense<0.000000e+00> : vector<32x32xf32>
    %16 = tpu.matmul %14, %15, %cst_11 {dimension_numbers = #tpu.dot_dimension_numbers<[1], [0], [0], [1], [0, 0, 1, 1], [], []>} : vector<32x32xbf16>, vector<32x32xbf16>, vector<32x32xf32> -> vector<32x32xf32>
    %17 = arith.addf %12, %16 : vector<32x32xf32>
    %c0_12 = arith.constant 0 : index
    %c0_13 = arith.constant 0 : index
    %18 = vector.load %arg3[%c0_12, %c0_13] : memref<32x1xf32, #tpu.memory_space<vmem>>, vector<32x1xf32>
    %19 = vector.broadcast %18 : vector<32x1xf32> to vector<32x32xf32>
    %20 = arith.addf %17, %19 : vector<32x32xf32>
    %cst_14 = arith.constant 0.000000e+00 : f32
    %21 = vector.broadcast %cst_14 : f32 to vector<32x32xf32>
    %22 = arith.maximumf %20, %21 : vector<32x32xf32>
    %23 = arith.truncf %22 : vector<32x32xf32> to vector<32x32xbf16>
    %c0_15 = arith.constant 0 : index
    %c0_16 = arith.constant 0 : index
    %c0_17 = arith.constant 0 : index
    %24 = vector.load %arg4[%c0_15, %c0_16, %c0_17] : memref<1x32x32xbf16, #tpu.memory_space<vmem>>, vector<1x32x32xbf16>
    %25 = vector.shape_cast %24 : vector<1x32x32xbf16> to vector<32x32xbf16>
    %26 = vector.shape_cast %23 : vector<32x32xbf16> to vector<1x32x32xbf16>
    tpu.vector_store %arg4[%c0_15, %c0_16, %c0_17], %26 {strides = array<i32>} : memref<1x32x32xbf16, #tpu.memory_space<vmem>>, vector<1x32x32xbf16>,
    return
  }
  func.func @transform_0(%arg0: i32) -> (i32, i32, i32) {
    %c0_i32 = arith.constant 0 : i32
    %c0_i32_0 = arith.constant 0 : i32
    %c0_i32_1 = arith.constant 0 : i32
    return %arg0, %c0_i32, %c0_i32_0 : i32, i32, i32
  }
  func.func @transform_1(%arg0: i32) -> (i32, i32, i32) {
    %c0_i32 = arith.constant 0 : i32
    %c0_i32_0 = arith.constant 0 : i32
    %c0_i32_1 = arith.constant 0 : i32
    %c0_i32_2 = arith.constant 0 : i32
    return %c0_i32, %c0_i32_0, %c0_i32_1 : i32, i32, i32
  }
  func.func @transform_2(%arg0: i32) -> (i32, i32) {
    %c0_i32 = arith.constant 0 : i32
    %c0_i32_0 = arith.constant 0 : i32
    %c0_i32_1 = arith.constant 0 : i32
    return %c0_i32, %c0_i32_0 : i32, i32
  }
  func.func @transform_3(%arg0: i32) -> (i32, i32, i32) {
    %c0_i32 = arith.constant 0 : i32
    %c0_i32_0 = arith.constant 0 : i32
    %c0_i32_1 = arith.constant 0 : i32
    return %arg0, %c0_i32, %c0_i32_0 : i32, i32, i32
  }
}

module attributes {stable_mosaic.version = 11 : i64} {
  func.func @_conv_taps_kernel(%arg0: i32, %arg1: memref<1x32x66xbf16, #tpu.memory_space<vmem>>, %arg2: memref<3x16x32xbf16, #tpu.memory_space<vmem>>, %arg3: memref<16x1xf32, #tpu.memory_space<vmem>>, %arg4: memref<1x16x64xbf16, #tpu.memory_space<vmem>>) attributes {dimension_semantics = [#tpu.dimension_semantics<parallel>], iteration_bounds = array<i64: 2>, scalar_prefetch = 0 : i64, scratch_operands = 0 : i64, tpu.core_type = #tpu.core_type<tc>, window_params = [{transform_indices = @transform_0, window_bounds = array<i64: 1, 32, 66>}, {pipeline_mode = #tpu.pipeline_mode<synchronous>, transform_indices = @transform_1, window_bounds = array<i64: 3, 16, 32>}, {pipeline_mode = #tpu.pipeline_mode<synchronous>, transform_indices = @transform_2, window_bounds = array<i64: 16, 1>}, {transform_indices = @transform_3, window_bounds = array<i64: 1, 16, 64>}]} {
    %c0 = arith.constant 0 : index
    %c0_0 = arith.constant 0 : index
    %c0_1 = arith.constant 0 : index
    %0 = vector.load %arg1[%c0, %c0_0, %c0_1] : memref<1x32x66xbf16, #tpu.memory_space<vmem>>, vector<1x32x66xbf16>
    %1 = vector.shape_cast %0 : vector<1x32x66xbf16> to vector<32x66xbf16>
    %cst = arith.constant 0.000000e+00 : f32
    %2 = vector.broadcast %cst : f32 to vector<16x64xf32>
    %c0_2 = arith.constant 0 : index
    %c0_3 = arith.constant 0 : index
    %c0_4 = arith.constant 0 : index
    %3 = vector.load %arg2[%c0_2, %c0_3, %c0_4] : memref<3x16x32xbf16, #tpu.memory_space<vmem>>, vector<1x16x32xbf16>
    %4 = vector.shape_cast %3 : vector<1x16x32xbf16> to vector<16x32xbf16>
    %5 = vector.extract_strided_slice %1 {offsets = [0, 0], sizes = [32, 64], strides = [1, 1]} : vector<32x66xbf16> to vector<32x64xbf16>
    %cst_5 = arith.constant dense<0.000000e+00> : vector<16x64xf32>
    %6 = tpu.matmul %4, %5, %cst_5 {dimension_numbers = #tpu.dot_dimension_numbers<[1], [0], [0], [1], [0, 0, 1, 1], [], []>} : vector<16x32xbf16>, vector<32x64xbf16>, vector<16x64xf32> -> vector<16x64xf32>
    %7 = arith.addf %2, %6 : vector<16x64xf32>
    %c1 = arith.constant 1 : index
    %c0_6 = arith.constant 0 : index
    %c0_7 = arith.constant 0 : index
    %8 = vector.load %arg2[%c1, %c0_6, %c0_7] : memref<3x16x32xbf16, #tpu.memory_space<vmem>>, vector<1x16x32xbf16>
    %9 = vector.shape_cast %8 : vector<1x16x32xbf16> to vector<16x32xbf16>
    %10 = vector.extract_strided_slice %1 {offsets = [0, 1], sizes = [32, 64], strides = [1, 1]} : vector<32x66xbf16> to vector<32x64xbf16>
    %cst_8 = arith.constant dense<0.000000e+00> : vector<16x64xf32>
    %11 = tpu.matmul %9, %10, %cst_8 {dimension_numbers = #tpu.dot_dimension_numbers<[1], [0], [0], [1], [0, 0, 1, 1], [], []>} : vector<16x32xbf16>, vector<32x64xbf16>, vector<16x64xf32> -> vector<16x64xf32>
    %12 = arith.addf %7, %11 : vector<16x64xf32>
    %c2 = arith.constant 2 : index
    %c0_9 = arith.constant 0 : index
    %c0_10 = arith.constant 0 : index
    %13 = vector.load %arg2[%c2, %c0_9, %c0_10] : memref<3x16x32xbf16, #tpu.memory_space<vmem>>, vector<1x16x32xbf16>
    %14 = vector.shape_cast %13 : vector<1x16x32xbf16> to vector<16x32xbf16>
    %15 = vector.extract_strided_slice %1 {offsets = [0, 2], sizes = [32, 64], strides = [1, 1]} : vector<32x66xbf16> to vector<32x64xbf16>
    %cst_11 = arith.constant dense<0.000000e+00> : vector<16x64xf32>
    %16 = tpu.matmul %14, %15, %cst_11 {dimension_numbers = #tpu.dot_dimension_numbers<[1], [0], [0], [1], [0, 0, 1, 1], [], []>} : vector<16x32xbf16>, vector<32x64xbf16>, vector<16x64xf32> -> vector<16x64xf32>
    %17 = arith.addf %12, %16 : vector<16x64xf32>
    %c0_12 = arith.constant 0 : index
    %c0_13 = arith.constant 0 : index
    %18 = vector.load %arg3[%c0_12, %c0_13] : memref<16x1xf32, #tpu.memory_space<vmem>>, vector<16x1xf32>
    %19 = vector.broadcast %18 : vector<16x1xf32> to vector<16x64xf32>
    %20 = arith.addf %17, %19 : vector<16x64xf32>
    %cst_14 = arith.constant 0.000000e+00 : f32
    %21 = vector.broadcast %cst_14 : f32 to vector<16x64xf32>
    %22 = arith.maximumf %20, %21 : vector<16x64xf32>
    %23 = arith.truncf %22 : vector<16x64xf32> to vector<16x64xbf16>
    %c0_15 = arith.constant 0 : index
    %c0_16 = arith.constant 0 : index
    %c0_17 = arith.constant 0 : index
    %24 = vector.load %arg4[%c0_15, %c0_16, %c0_17] : memref<1x16x64xbf16, #tpu.memory_space<vmem>>, vector<1x16x64xbf16>
    %25 = vector.shape_cast %24 : vector<1x16x64xbf16> to vector<16x64xbf16>
    %26 = vector.shape_cast %23 : vector<16x64xbf16> to vector<1x16x64xbf16>
    tpu.vector_store %arg4[%c0_15, %c0_16, %c0_17], %26 {strides = array<i32>} : memref<1x16x64xbf16, #tpu.memory_space<vmem>>, vector<1x16x64xbf16>,
    return
  }
  func.func @transform_0(%arg0: i32) -> (i32, i32, i32) {
    %c0_i32 = arith.constant 0 : i32
    %c0_i32_0 = arith.constant 0 : i32
    %c0_i32_1 = arith.constant 0 : i32
    return %arg0, %c0_i32, %c0_i32_0 : i32, i32, i32
  }
  func.func @transform_1(%arg0: i32) -> (i32, i32, i32) {
    %c0_i32 = arith.constant 0 : i32
    %c0_i32_0 = arith.constant 0 : i32
    %c0_i32_1 = arith.constant 0 : i32
    %c0_i32_2 = arith.constant 0 : i32
    return %c0_i32, %c0_i32_0, %c0_i32_1 : i32, i32, i32
  }
  func.func @transform_2(%arg0: i32) -> (i32, i32) {
    %c0_i32 = arith.constant 0 : i32
    %c0_i32_0 = arith.constant 0 : i32
    %c0_i32_1 = arith.constant 0 : i32
    return %c0_i32, %c0_i32_0 : i32, i32
  }
  func.func @transform_3(%arg0: i32) -> (i32, i32, i32) {
    %c0_i32 = arith.constant 0 : i32
    %c0_i32_0 = arith.constant 0 : i32
    %c0_i32_1 = arith.constant 0 : i32
    return %arg0, %c0_i32, %c0_i32_0 : i32, i32, i32
  }
}

module attributes {stable_mosaic.version = 11 : i64} {
  func.func @_conv_taps_kernel(%arg0: i32, %arg1: memref<1x16x130xbf16, #tpu.memory_space<vmem>>, %arg2: memref<3x16x16xbf16, #tpu.memory_space<vmem>>, %arg3: memref<16x1xf32, #tpu.memory_space<vmem>>, %arg4: memref<1x16x128xbf16, #tpu.memory_space<vmem>>) attributes {dimension_semantics = [#tpu.dimension_semantics<parallel>], iteration_bounds = array<i64: 2>, scalar_prefetch = 0 : i64, scratch_operands = 0 : i64, tpu.core_type = #tpu.core_type<tc>, window_params = [{transform_indices = @transform_0, window_bounds = array<i64: 1, 16, 130>}, {pipeline_mode = #tpu.pipeline_mode<synchronous>, transform_indices = @transform_1, window_bounds = array<i64: 3, 16, 16>}, {pipeline_mode = #tpu.pipeline_mode<synchronous>, transform_indices = @transform_2, window_bounds = array<i64: 16, 1>}, {transform_indices = @transform_3, window_bounds = array<i64: 1, 16, 128>}]} {
    %c0 = arith.constant 0 : index
    %c0_0 = arith.constant 0 : index
    %c0_1 = arith.constant 0 : index
    %0 = vector.load %arg1[%c0, %c0_0, %c0_1] : memref<1x16x130xbf16, #tpu.memory_space<vmem>>, vector<1x16x130xbf16>
    %1 = vector.shape_cast %0 : vector<1x16x130xbf16> to vector<16x130xbf16>
    %cst = arith.constant 0.000000e+00 : f32
    %2 = vector.broadcast %cst : f32 to vector<16x128xf32>
    %c0_2 = arith.constant 0 : index
    %c0_3 = arith.constant 0 : index
    %c0_4 = arith.constant 0 : index
    %3 = vector.load %arg2[%c0_2, %c0_3, %c0_4] : memref<3x16x16xbf16, #tpu.memory_space<vmem>>, vector<1x16x16xbf16>
    %4 = vector.shape_cast %3 : vector<1x16x16xbf16> to vector<16x16xbf16>
    %5 = vector.extract_strided_slice %1 {offsets = [0, 0], sizes = [16, 128], strides = [1, 1]} : vector<16x130xbf16> to vector<16x128xbf16>
    %cst_5 = arith.constant dense<0.000000e+00> : vector<16x128xf32>
    %6 = tpu.matmul %4, %5, %cst_5 {dimension_numbers = #tpu.dot_dimension_numbers<[1], [0], [0], [1], [0, 0, 1, 1], [], []>} : vector<16x16xbf16>, vector<16x128xbf16>, vector<16x128xf32> -> vector<16x128xf32>
    %7 = arith.addf %2, %6 : vector<16x128xf32>
    %c1 = arith.constant 1 : index
    %c0_6 = arith.constant 0 : index
    %c0_7 = arith.constant 0 : index
    %8 = vector.load %arg2[%c1, %c0_6, %c0_7] : memref<3x16x16xbf16, #tpu.memory_space<vmem>>, vector<1x16x16xbf16>
    %9 = vector.shape_cast %8 : vector<1x16x16xbf16> to vector<16x16xbf16>
    %10 = vector.extract_strided_slice %1 {offsets = [0, 1], sizes = [16, 128], strides = [1, 1]} : vector<16x130xbf16> to vector<16x128xbf16>
    %cst_8 = arith.constant dense<0.000000e+00> : vector<16x128xf32>
    %11 = tpu.matmul %9, %10, %cst_8 {dimension_numbers = #tpu.dot_dimension_numbers<[1], [0], [0], [1], [0, 0, 1, 1], [], []>} : vector<16x16xbf16>, vector<16x128xbf16>, vector<16x128xf32> -> vector<16x128xf32>
    %12 = arith.addf %7, %11 : vector<16x128xf32>
    %c2 = arith.constant 2 : index
    %c0_9 = arith.constant 0 : index
    %c0_10 = arith.constant 0 : index
    %13 = vector.load %arg2[%c2, %c0_9, %c0_10] : memref<3x16x16xbf16, #tpu.memory_space<vmem>>, vector<1x16x16xbf16>
    %14 = vector.shape_cast %13 : vector<1x16x16xbf16> to vector<16x16xbf16>
    %15 = vector.extract_strided_slice %1 {offsets = [0, 2], sizes = [16, 128], strides = [1, 1]} : vector<16x130xbf16> to vector<16x128xbf16>
    %cst_11 = arith.constant dense<0.000000e+00> : vector<16x128xf32>
    %16 = tpu.matmul %14, %15, %cst_11 {dimension_numbers = #tpu.dot_dimension_numbers<[1], [0], [0], [1], [0, 0, 1, 1], [], []>} : vector<16x16xbf16>, vector<16x128xbf16>, vector<16x128xf32> -> vector<16x128xf32>
    %17 = arith.addf %12, %16 : vector<16x128xf32>
    %c0_12 = arith.constant 0 : index
    %c0_13 = arith.constant 0 : index
    %18 = vector.load %arg3[%c0_12, %c0_13] : memref<16x1xf32, #tpu.memory_space<vmem>>, vector<16x1xf32>
    %19 = vector.broadcast %18 : vector<16x1xf32> to vector<16x128xf32>
    %20 = arith.addf %17, %19 : vector<16x128xf32>
    %cst_14 = arith.constant 0.000000e+00 : f32
    %21 = vector.broadcast %cst_14 : f32 to vector<16x128xf32>
    %22 = arith.maximumf %20, %21 : vector<16x128xf32>
    %23 = arith.truncf %22 : vector<16x128xf32> to vector<16x128xbf16>
    %c0_15 = arith.constant 0 : index
    %c0_16 = arith.constant 0 : index
    %c0_17 = arith.constant 0 : index
    %24 = vector.load %arg4[%c0_15, %c0_16, %c0_17] : memref<1x16x128xbf16, #tpu.memory_space<vmem>>, vector<1x16x128xbf16>
    %25 = vector.shape_cast %24 : vector<1x16x128xbf16> to vector<16x128xbf16>
    %26 = vector.shape_cast %23 : vector<16x128xbf16> to vector<1x16x128xbf16>
    tpu.vector_store %arg4[%c0_15, %c0_16, %c0_17], %26 {strides = array<i32>} : memref<1x16x128xbf16, #tpu.memory_space<vmem>>, vector<1x16x128xbf16>,
    return
  }
  func.func @transform_0(%arg0: i32) -> (i32, i32, i32) {
    %c0_i32 = arith.constant 0 : i32
    %c0_i32_0 = arith.constant 0 : i32
    %c0_i32_1 = arith.constant 0 : i32
    return %arg0, %c0_i32, %c0_i32_0 : i32, i32, i32
  }
  func.func @transform_1(%arg0: i32) -> (i32, i32, i32) {
    %c0_i32 = arith.constant 0 : i32
    %c0_i32_0 = arith.constant 0 : i32
    %c0_i32_1 = arith.constant 0 : i32
    %c0_i32_2 = arith.constant 0 : i32
    return %c0_i32, %c0_i32_0, %c0_i32_1 : i32, i32, i32
  }
  func.func @transform_2(%arg0: i32) -> (i32, i32) {
    %c0_i32 = arith.constant 0 : i32
    %c0_i32_0 = arith.constant 0 : i32
    %c0_i32_1 = arith.constant 0 : i32
    return %c0_i32, %c0_i32_0 : i32, i32
  }
  func.func @transform_3(%arg0: i32) -> (i32, i32, i32) {
    %c0_i32 = arith.constant 0 : i32
    %c0_i32_0 = arith.constant 0 : i32
    %c0_i32_1 = arith.constant 0 : i32
    return %arg0, %c0_i32, %c0_i32_0 : i32, i32, i32
  }
}

module attributes {stable_mosaic.version = 11 : i64} {
  func.func @_conv_taps_kernel(%arg0: i32, %arg1: memref<1x8x256xbf16, #tpu.memory_space<vmem>>, %arg2: memref<1x2x8xbf16, #tpu.memory_space<vmem>>, %arg3: memref<2x1xf32, #tpu.memory_space<vmem>>, %arg4: memref<1x2x256xf32, #tpu.memory_space<vmem>>) attributes {dimension_semantics = [#tpu.dimension_semantics<parallel>], iteration_bounds = array<i64: 2>, scalar_prefetch = 0 : i64, scratch_operands = 0 : i64, tpu.core_type = #tpu.core_type<tc>, window_params = [{transform_indices = @transform_0, window_bounds = array<i64: 1, 8, 256>}, {pipeline_mode = #tpu.pipeline_mode<synchronous>, transform_indices = @transform_1, window_bounds = array<i64: 1, 2, 8>}, {pipeline_mode = #tpu.pipeline_mode<synchronous>, transform_indices = @transform_2, window_bounds = array<i64: 2, 1>}, {transform_indices = @transform_3, window_bounds = array<i64: 1, 2, 256>}]} {
    %c0 = arith.constant 0 : index
    %c0_0 = arith.constant 0 : index
    %c0_1 = arith.constant 0 : index
    %0 = vector.load %arg1[%c0, %c0_0, %c0_1] : memref<1x8x256xbf16, #tpu.memory_space<vmem>>, vector<1x8x256xbf16>
    %1 = vector.shape_cast %0 : vector<1x8x256xbf16> to vector<8x256xbf16>
    %cst = arith.constant 0.000000e+00 : f32
    %2 = vector.broadcast %cst : f32 to vector<2x256xf32>
    %c0_2 = arith.constant 0 : index
    %c0_3 = arith.constant 0 : index
    %c0_4 = arith.constant 0 : index
    %3 = vector.load %arg2[%c0_2, %c0_3, %c0_4] : memref<1x2x8xbf16, #tpu.memory_space<vmem>>, vector<1x2x8xbf16>
    %4 = vector.shape_cast %3 : vector<1x2x8xbf16> to vector<2x8xbf16>
    %cst_5 = arith.constant dense<0.000000e+00> : vector<2x256xf32>
    %5 = tpu.matmul %4, %1, %cst_5 {dimension_numbers = #tpu.dot_dimension_numbers<[1], [0], [0], [1], [0, 0, 1, 1], [], []>} : vector<2x8xbf16>, vector<8x256xbf16>, vector<2x256xf32> -> vector<2x256xf32>
    %6 = arith.addf %2, %5 : vector<2x256xf32>
    %c0_6 = arith.constant 0 : index
    %c0_7 = arith.constant 0 : index
    %7 = vector.load %arg3[%c0_6, %c0_7] : memref<2x1xf32, #tpu.memory_space<vmem>>, vector<2x1xf32>
    %8 = vector.broadcast %7 : vector<2x1xf32> to vector<2x256xf32>
    %9 = arith.addf %6, %8 : vector<2x256xf32>
    %c0_8 = arith.constant 0 : index
    %c0_9 = arith.constant 0 : index
    %c0_10 = arith.constant 0 : index
    %10 = vector.load %arg4[%c0_8, %c0_9, %c0_10] : memref<1x2x256xf32, #tpu.memory_space<vmem>>, vector<1x2x256xf32>
    %11 = vector.shape_cast %10 : vector<1x2x256xf32> to vector<2x256xf32>
    %12 = vector.shape_cast %9 : vector<2x256xf32> to vector<1x2x256xf32>
    tpu.vector_store %arg4[%c0_8, %c0_9, %c0_10], %12 {strides = array<i32>} : memref<1x2x256xf32, #tpu.memory_space<vmem>>, vector<1x2x256xf32>,
    return
  }
  func.func @transform_0(%arg0: i32) -> (i32, i32, i32) {
    %c0_i32 = arith.constant 0 : i32
    %c0_i32_0 = arith.constant 0 : i32
    %c0_i32_1 = arith.constant 0 : i32
    return %arg0, %c0_i32, %c0_i32_0 : i32, i32, i32
  }
  func.func @transform_1(%arg0: i32) -> (i32, i32, i32) {
    %c0_i32 = arith.constant 0 : i32
    %c0_i32_0 = arith.constant 0 : i32
    %c0_i32_1 = arith.constant 0 : i32
    %c0_i32_2 = arith.constant 0 : i32
    return %c0_i32, %c0_i32_0, %c0_i32_1 : i32, i32, i32
  }
  func.func @transform_2(%arg0: i32) -> (i32, i32) {
    %c0_i32 = arith.constant 0 : i32
    %c0_i32_0 = arith.constant 0 : i32
    %c0_i32_1 = arith.constant 0 : i32
    return %c0_i32, %c0_i32_0 : i32, i32
  }
  func.func @transform_3(%arg0: i32) -> (i32, i32, i32) {
    %c0_i32 = arith.constant 0 : i32
    %c0_i32_0 = arith.constant 0 : i32
    %c0_i32_1 = arith.constant 0 : i32
    return %arg0, %c0_i32, %c0_i32_0 : i32, i32, i32
  }
}

module attributes {stable_mosaic.version = 11 : i64} {
  func.func @_setconv_dec_kernel(%arg0: i32, %arg1: i32, %arg2: memref<1x1xf32, #tpu.memory_space<smem>>, %arg3: memref<1x8x1xf32, #tpu.memory_space<vmem>>, %arg4: memref<1x128xf32, #tpu.memory_space<vmem>>, %arg5: memref<1x128x2xf32, #tpu.memory_space<vmem>>, %arg6: memref<1x8x2xf32, #tpu.memory_space<vmem>>, %arg7: memref<8x2xf32, #tpu.memory_space<vmem>>) attributes {dimension_semantics = [#tpu.dimension_semantics<parallel>, #tpu.dimension_semantics<arbitrary>], iteration_bounds = array<i64: 2, 2>, scalar_prefetch = 0 : i64, scratch_operands = 1 : i64, tpu.core_type = #tpu.core_type<tc>, window_params = [{transform_indices = @transform_0, window_bounds = array<i64: 1, 1>}, {transform_indices = @transform_1, window_bounds = array<i64: 1, 8, 1>}, {transform_indices = @transform_2, window_bounds = array<i64: 1, 128>}, {transform_indices = @transform_3, window_bounds = array<i64: 1, 128, 2>}, {transform_indices = @transform_4, window_bounds = array<i64: 1, 8, 2>}]} {
    %c0_i32 = arith.constant 0 : i32
    %0 = arith.cmpi eq, %arg1, %c0_i32 : i32
    %1 = arith.extui %0 : i1 to i32
    %c0_i32_0 = arith.constant 0 : i32
    %2 = arith.cmpi ne, %1, %c0_i32_0 : i32
    scf.if %2 {
      %cst_15 = arith.constant 0.000000e+00 : f32
      %23 = vector.broadcast %cst_15 : f32 to vector<8x2xf32>
      %c0_16 = arith.constant 0 : index
      %c0_17 = arith.constant 0 : index
      %24 = vector.load %arg7[%c0_16, %c0_17] : memref<8x2xf32, #tpu.memory_space<vmem>>, vector<8x2xf32>
      tpu.vector_store %arg7[%c0_16, %c0_17], %23 {strides = array<i32>} : memref<8x2xf32, #tpu.memory_space<vmem>>, vector<8x2xf32>,
    } else {
    }
    %c0 = arith.constant 0 : index
    %c0_1 = arith.constant 0 : index
    %3 = memref.load %arg2[%c0, %c0_1] : memref<1x1xf32, #tpu.memory_space<smem>>
    %c0_2 = arith.constant 0 : index
    %c0_3 = arith.constant 0 : index
    %c0_4 = arith.constant 0 : index
    %4 = vector.load %arg3[%c0_2, %c0_3, %c0_4] : memref<1x8x1xf32, #tpu.memory_space<vmem>>, vector<1x8x1xf32>
    %5 = vector.shape_cast %4 : vector<1x8x1xf32> to vector<8x1xf32>
    %c0_5 = arith.constant 0 : index
    %c0_6 = arith.constant 0 : index
    %6 = vector.load %arg4[%c0_5, %c0_6] : memref<1x128xf32, #tpu.memory_space<vmem>>, vector<1x128xf32>
    %7 = vector.broadcast %5 : vector<8x1xf32> to vector<8x128xf32>
    %8 = vector.broadcast %6 : vector<1x128xf32> to vector<8x128xf32>
    %9 = arith.subf %7, %8 : vector<8x128xf32>
    %10 = arith.mulf %9, %9 : vector<8x128xf32>
    %11 = vector.broadcast %3 : f32 to vector<8x128xf32>
    %12 = arith.mulf %10, %11 : vector<8x128xf32>
    %13 = math.exp %12 : vector<8x128xf32>
    %c0_7 = arith.constant 0 : index
    %c0_8 = arith.constant 0 : index
    %14 = vector.load %arg7[%c0_7, %c0_8] : memref<8x2xf32, #tpu.memory_space<vmem>>, vector<8x2xf32>
    %c0_9 = arith.constant 0 : index
    %c0_10 = arith.constant 0 : index
    %c0_11 = arith.constant 0 : index
    %15 = vector.load %arg5[%c0_9, %c0_10, %c0_11] : memref<1x128x2xf32, #tpu.memory_space<vmem>>, vector<1x128x2xf32>
    %16 = vector.shape_cast %15 : vector<1x128x2xf32> to vector<128x2xf32>
    %cst = arith.constant dense<0.000000e+00> : vector<8x2xf32>
    %17 = tpu.matmul %13, %16, %cst {dimension_numbers = #tpu.dot_dimension_numbers<[1], [0], [0], [1], [0, 0, 1, 1], [], []>} : vector<8x128xf32>, vector<128x2xf32>, vector<8x2xf32> -> vector<8x2xf32>
    %18 = arith.addf %14, %17 : vector<8x2xf32>
    %c0_12 = arith.constant 0 : index
    %c0_13 = arith.constant 0 : index
    %19 = vector.load %arg7[%c0_12, %c0_13] : memref<8x2xf32, #tpu.memory_space<vmem>>, vector<8x2xf32>
    tpu.vector_store %arg7[%c0_12, %c0_13], %18 {strides = array<i32>} : memref<8x2xf32, #tpu.memory_space<vmem>>, vector<8x2xf32>,
    %c1_i32 = arith.constant 1 : i32
    %20 = arith.cmpi eq, %arg1, %c1_i32 : i32
    %21 = arith.extui %20 : i1 to i32
    %c0_i32_14 = arith.constant 0 : i32
    %22 = arith.cmpi ne, %21, %c0_i32_14 : i32
    scf.if %22 {
      %c0_15 = arith.constant 0 : index
      %c0_16 = arith.constant 0 : index
      %23 = vector.load %arg7[%c0_15, %c0_16] : memref<8x2xf32, #tpu.memory_space<vmem>>, vector<8x2xf32>
      %c0_17 = arith.constant 0 : index
      %c0_18 = arith.constant 0 : index
      %c0_19 = arith.constant 0 : index
      %24 = vector.load %arg6[%c0_17, %c0_18, %c0_19] : memref<1x8x2xf32, #tpu.memory_space<vmem>>, vector<1x8x2xf32>
      %25 = vector.shape_cast %24 : vector<1x8x2xf32> to vector<8x2xf32>
      %26 = vector.shape_cast %23 : vector<8x2xf32> to vector<1x8x2xf32>
      tpu.vector_store %arg6[%c0_17, %c0_18, %c0_19], %26 {strides = array<i32>} : memref<1x8x2xf32, #tpu.memory_space<vmem>>, vector<1x8x2xf32>,
    } else {
    }
    return
  }
  func.func @transform_0(%arg0: i32, %arg1: i32) -> (i32, i32) {
    %c0_i32 = arith.constant 0 : i32
    %c0_i32_0 = arith.constant 0 : i32
    %c0_i32_1 = arith.constant 0 : i32
    return %c0_i32, %c0_i32_0 : i32, i32
  }
  func.func @transform_1(%arg0: i32, %arg1: i32) -> (i32, i32, i32) {
    %c0_i32 = arith.constant 0 : i32
    %c0_i32_0 = arith.constant 0 : i32
    %c0_i32_1 = arith.constant 0 : i32
    return %arg0, %c0_i32, %c0_i32_0 : i32, i32, i32
  }
  func.func @transform_2(%arg0: i32, %arg1: i32) -> (i32, i32) {
    %c0_i32 = arith.constant 0 : i32
    %c0_i32_0 = arith.constant 0 : i32
    return %c0_i32, %arg1 : i32, i32
  }
  func.func @transform_3(%arg0: i32, %arg1: i32) -> (i32, i32, i32) {
    %c0_i32 = arith.constant 0 : i32
    %c0_i32_0 = arith.constant 0 : i32
    return %arg0, %arg1, %c0_i32 : i32, i32, i32
  }
  func.func @transform_4(%arg0: i32, %arg1: i32) -> (i32, i32, i32) {
    %c0_i32 = arith.constant 0 : i32
    %c0_i32_0 = arith.constant 0 : i32
    %c0_i32_1 = arith.constant 0 : i32
    return %arg0, %c0_i32, %c0_i32_0 : i32, i32, i32
  }
}

</mosaic_0001>

<bundles_post_ra>
// kernel: reg_convcnp_forward.16
= control target key start
LH: loop header
LB: loop body
LE: loop exit
PB: predicated region body
PF: predicated region fallthrough
CT: control target
= control target key end

     0   :  { %s541_s17 = smov 0   ;;  %s543_s18 = smov 0   ;;  %s606_s0 = inlined_call_operand.<no memory space> [shape: f32[1,1], index: 0, kind: input, shape index: {}]   ;;  %s607_s1 = inlined_call_operand.vmem [shape: f32[2,8,1], index: 1, kind: input, shape index: {}]   ;;  %s608_s2 = inlined_call_operand.vmem [shape: f32[2,2,8], index: 2, kind: input, shape index: {}]   ;;  %s609_s3 = inlined_call_operand.vmem [shape: f32[1,256], index: 3, kind: input, shape index: {}]   ;;  %s610_s4 = inlined_call_operand.vmem [shape: bf16[2,2,256], index: 4, kind: output, shape index: {}]  }
   0x1   :  { %9 = sst [smem:[#allocation2]] %s606_s0  ;;  %s545_s19 = smov 0  }
   0x2   :  { %s547_s20 = smov 0   ;;  %s549_s21 = smov 0  }
   0x3 LB: > { %s24_s0 = sadd.s32 1, %s502_s19  ;;  %s27_s22 = sadd.s32 1, %s506_s20  ;;  %s510_s21 = sphi %s549_s21, %s15_s21   ;;  %s506_s20 = sphi %s547_s20, %s614_s20   ;;  %s502_s19 = sphi %s545_s19, %s613_s19   ;;  %s498_s18 = sphi %s543_s18, %s612_s18   ;;  %s494_s17 = sphi %s541_s17, %s611_s17  }
   0x4   : > { %p25_p0 = scmp.ge.s32.totalorder %s24_s0, 2  ;;  %p418_p1 = scmp.ge.s32.totalorder %s510_s21, 1 }
   0x5   : > { %p193_p2 = scmp.lt.s32.totalorder %s510_s21, 5 }
   0x6   : > { %s616_s0 = smov (%p25_p0, %s24_s0), 0  ;;  %s618_s22 = smov (!%p25_p0, %s27_s22), %s506_s20 }
   0x7   : > { %p194_p3 = pnand %p418_p1, %p193_p2  ;;  %p29_p4 = scmp.ge.s32.totalorder %s618_s22, 2 }
   0x8   : > { %p227_p5 = scmp.lt.s32.totalorder (!%p194_p3), %s498_s18, 1  ;;  %p235_p6 = scmp.lt.s32.totalorder (!%p194_p3), %s494_s17, 1 }
   0x9   : > { %s620_s22 = smov (%p29_p4, %s618_s22), 0  ;;  %197 = sbr.rel (%p194_p3) target bundleno = 302 (0x12e), region = 36 }
   0xa   : > { %s245_s6 = sld [smem:[#allocation2]] (!%p194_p3) }
   0xe   : > { %v512_v0 = vmov 0   ;;  %s622_s18 = smov (!%p227_p5, %s498_s18), 1  ;;  %s624_s17 = smov (!%p235_p6, %s494_s17), 1  ;;  %vm263_vm0 = vcmask 64512   ;;  %vm288_vm1 = vcmask 1040384  }
   0xf   : > { %466 = vset.pattern.permute.xlu0 %v512_v0  ;;  %s419_s23 = sshll.u32 %s622_s18, 3  ;;  %s237_s29 = scalar_lea.vmem %s609_s3, %s624_s17  ;;  %vm289_vm2 = vsmask.f32 256  ;;  %vm314_vm8 = vsmask.f32 7938 }
  0x10   : > { %s230_s26 = scalar_lea.vmem %s607_s1, %s419_s23  ;;  %s420_s30 = sshll.u32 %s622_s18, 1  ;;  %v467_v2 = vld [vmem:[%s237_s29] ss:$0 sm:$0xff]  ;;  %v258_v5 = vstv %s245_s6  ;;  %vm290_vm3 = vmand %vm288_vm1, %vm289_vm2 }
  0x11   : > { %v246_v1 = vld [vmem:[%s230_s26] sm:$0xff]  ;;  %s243_s5 = sadd.s32 %s420_s30, %s624_s17  ;;  %s234_s9 = scalar_lea.vmem %s608_s2, %s420_s30  ;;  %vm315_vm9 = vmand %vm288_vm1, %vm314_vm8 }
  0x12   : > { %250 = vperm.xlu0 %466, %v246_v1   ;;  %v262_v9 = vld [vmem:[%s234_s9] sm:$0x3]  ;;  %s583_s12 = scalar_lea.vmem %s610_s4, %s243_s5 }
  0x13   : > { %v291_v11 = vld [vmem:[%s583_s12] sm:$0x1] }
  0x84   : > { %v251_v3 = vpop.permute.xlu0 %250 }
  0x85   : > { %v256_v4 = vsub.f32 %v251_v3, %v467_v2 }
  0x87   : > { %v257_v6 = vmul.f32 %v256_v4, %v256_v4 }
  0x89   : > { %v259_v7 = vmul.f32 %v258_v5, %v257_v6 }
  0x8b   : > { %v260_v8 = vmul.f32 1.442695, %v259_v7 }
  0x8d   : > { %468 = vpow2.f32 %v260_v8 }
  0x93   : > { %v469_v10 = vpop.eup %468 }
  0x94   : > { %282 = vmatpush.msra.mxu0 %v469_v10 }
  0x95   : > { %422 = vmatmul.msk.f32.vlgmr.msra.gmra.mxu0 %vm263_vm0, %v262_v9 }
 0x112   : > { %v284_v12 = vpop.f32.mrf.mxu0 }
 0x113   : > { %v287_v13 = vpack.c.bf16 %v284_v12, %v284_v12  ;;  %v294_v14 = vadd.f32 1e-08, %v284_v12 }
 0x115   : > { %v292_v15 = vsel %vm290_vm3, %v287_v13, %v291_v11  ;;  %v296_v16 = vrot.slane %v294_v14, 7 }
 0x116   : > { %293 = vst [vmem:[%s583_s12] sm:$0x1] %v292_v15 }
 0x117   : > { %470 = vrcp.f32 %v296_v16  ;;  %v309_v20 = vand.u32 2147483648, %v296_v16  ;;  %v307_v22 = vand.u32 2147483647, %v296_v16  ;;  %vm303_vm5 = vweird.f32 %v296_v16 }
 0x119   : > { %v310_v24 = vor.u32 1.1754944e-38, %v309_v20  ;;  %vm308_vm7 = vcmp.eq.f32.partialorder %v307_v22, 8.507059e+37 }
 0x11d   : > { %v471_v17 = vpop.eup %470  ;;  %v316_v29 = vld [vmem:[%s583_s12] sm:$0x1] }
 0x11e   : > { %v299_v18 = vmul.f32 %v471_v17, %v296_v16  ;;  %vm304_vm4 = vweird.f32 %v471_v17 }
 0x11f   : > { %vm305_vm6 = vmor %vm303_vm5, %vm304_vm4 }
 0x120   : > { %v300_v19 = vsub.f32 1.0, %v299_v18 }
 0x122   : > { %v301_v21 = vmul.f32 %v471_v17, %v300_v19 }
 0x124   : > { %v302_v23 = vadd.f32 %v471_v17, %v301_v21 }
 0x126   : > { %v306_v25 = vsel %vm305_vm6, %v471_v17, %v302_v23 }
 0x127   : > { %v311_v26 = vsel %vm308_vm7, %v310_v24, %v306_v25 }
 0x128   : > { %v312_v27 = vmul.f32 %v311_v26, %v284_v12 }
 0x12a   : > { %v313_v28 = vpack.c.bf16 %v312_v27, %v312_v27 }
 0x12c   : > { %v317_v30 = vsel %vm315_vm9, %v313_v28, %v316_v29 }
 0x12d   : > { %318 = vst [vmem:[%s583_s12] sm:$0x1] %v317_v30 }
 0x12e PF: > { %s15_s21 = sadd.s32 1, %s510_s21   ;;  %s611_s17 = smov %s502_s19 }
 0x12f   : > { %p12_p7 = scmp.ge.s32.totalorder %s15_s21, 6   ;;  %s612_s18 = smov %s506_s20 }
 0x130   : > { %s613_s19 = smov %s616_s0  ;;  %s614_s20 = smov %s620_s22 }
 0x131   :  { %14 = sbr.rel (!%p12_p7) target bundleno = 3 (0x3), region = 72 }

// kernel: reg_convcnp_forward.17
= control target key start
LH: loop header
LB: loop body
LE: loop exit
PB: predicated region body
PF: predicated region fallthrough
CT: control target
= control target key end

     0   :  { %s325_s12 = smov 0   ;;  %s348_s0 = inlined_call_operand.vmem [shape: bf16[2,2,256], index: 0, kind: input, shape index: {}]   ;;  %s349_s1 = inlined_call_operand.vmem [shape: bf16[1,8,2], index: 1, kind: input, shape index: {}]   ;;  %s350_s2 = inlined_call_operand.vmem [shape: f32[8,1], index: 2, kind: input, shape index: {}]   ;;  %s351_s3 = inlined_call_operand.vmem [shape: bf16[2,8,256], index: 3, kind: output, shape index: {}]  }
   0x1 LB: > { %s273_s13 = sadd.s32 4294967295, %s302_s12   ;;  %p277_p0 = scmp.ge.s32.totalorder %s302_s12, 1  ;;  %s302_s12 = sphi %s325_s12, %s13_s12  }
   0x2   : > { %p136_p1 = scmp.lt.s32.totalorder %s302_s12, 3 }
   0x4   : > { %p137_p2 = pnand %p277_p0, %p136_p1 }
   0x5   : > { %p159_p3 = scmp.lt.s32.totalorder (!%p137_p2), %s273_s13, 1 }
   0x6   : > { %140 = sbr.rel (%p137_p2) target bundleno = 161 (0xa1), region = 32 }
   0xb   : > { %v304_v0 = vmov 0   ;;  %v171_v1 = vld [vmem:[%s350_s2] sm:$0xff]  ;;  %s353_s13 = smov (!%p159_p3, %s273_s13), 1  ;;  %vm185_vm0 = vcmask 1040384   ;;  %vm181_vm1 = vcmask 15360  }
   0xc   : > { %295 = vset.pattern.permute.xlu0 %v304_v0  ;;  %s278_s16 = sshll.u32 %s353_s13, 1  ;;  %v170_v7 = vld [vmem:[%s349_s1] sm:$0xf]  ;;  %s285_s22 = sshll.u32 %s353_s13, 3 }
   0xd   : > { %174 = vperm.xlu0 %295, %v171_v1   ;;  %s162_s19 = scalar_lea.vmem %s348_s0, %s278_s16  ;;  %s167_s25 = scalar_lea.vmem %s351_s3, %s285_s22 }
   0xe   : > { %v169_v2 = vld [vmem:[%s162_s19] sm:$0x3] }
   0xf   : > { %178 = vst [vmem:[#allocation1] ss:$9 sm:$0xff] %v169_v2 }
  0x16   : > { %v179_v3 = vld [vmem:[#allocation1] sm:$0xff]  ;;  %v180_v4 = vld [vmem:[#allocation1 + $0x9] sm:$0xff] }
  0x17   : > { %v186_v5 = vsel %vm185_vm0, %v179_v3, 0  ;;  %v188_v6 = vsel %vm185_vm0, %v180_v4, 0 }
  0x18   : > { %197 = vmatpush.bf16.msra.mxu0 %v186_v5  ;;  %210 = vmatpush.bf16.msra.mxu1 %v188_v6 }
  0x1b   : > { %281 = vmatmul.msk.bf16.vlgmr.msra.gmra.mxu0 %vm181_vm1, %v170_v7  ;;  %282 = vmatmul.msk.bf16.vlgmr.msra.gmra.mxu1 %vm181_vm1, %v170_v7 }
  0x7f   : > { %v175_v8 = vpop.permute.xlu0 %174 }
  0x98   : > { %v199_v9 = vpop.f32.mrf.mxu0  ;;  %v212_v10 = vpop.f32.mrf.mxu1 }
  0x99   : > { %v200_v11 = vadd.f32 %v199_v9, %v175_v8  ;;  %v213_v12 = vadd.f32 %v212_v10, %v175_v8 }
  0x9b   : > { %v216_v13 = vpack.c.bf16 %v213_v12, %v200_v11 }
  0x9d   : > { %217 = vst [vmem:[%s167_s25] sm:$0xff] %v216_v13 }
  0xa0   : > { %v201_v14 = vpop.f32.mrf.mxu0  ;;  %v214_v15 = vpop.f32.mrf.mxu1 }
  0xa1 PF: > { %s13_s12 = sadd.s32 1, %s302_s12  }
  0xa2   : > { %p10_p4 = scmp.ge.s32.totalorder %s13_s12, 4  }
  0xa4   :  { %12 = sbr.rel (!%p10_p4) target bundleno = 1 (0x1), region = 62 }

// kernel: reg_convcnp_forward.18
= control target key start
LH: loop header
LB: loop body
LE: loop exit
PB: predicated region body
PF: predicated region fallthrough
CT: control target
= control target key end

     0   :  { %s383_s12 = smov 0   ;;  %s419_s0 = inlined_call_operand.vmem [shape: bf16[2,16,130], index: 0, kind: input, shape index: {}]   ;;  %s420_s1 = inlined_call_operand.vmem [shape: bf16[3,8,16], index: 1, kind: input, shape index: {}]   ;;  %s421_s2 = inlined_call_operand.vmem [shape: f32[8,1], index: 2, kind: input, shape index: {}]   ;;  %s422_s3 = inlined_call_operand.vmem [shape: bf16[2,8,128], index: 3, kind: output, shape index: {}]  }
   0x1 LB: > { %s313_s13 = sadd.s32 4294967295, %s358_s12   ;;  %p317_p0 = scmp.ge.s32.totalorder %s358_s12, 1  ;;  %s358_s12 = sphi %s383_s12, %s13_s12  }
   0x2   : > { %p137_p1 = scmp.lt.s32.totalorder %s358_s12, 3 }
   0x4   : > { %p138_p2 = pnand %p317_p0, %p137_p1 }
   0x5   : > { %p160_p3 = scmp.lt.s32.totalorder (!%p138_p2), %s313_s13, 1  ;;  %s360_s18 = smov (!%p138_p2), 127  }
   0x6   : > { %141 = sbr.rel (%p138_p2) target bundleno = 285 (0x11d), region = 32  ;;  %s361_s19 = smov (!%p138_p2), 126  }
   0xb   : > { %s424_s13 = smov (!%p160_p3, %s313_s13), 1  ;;  %v172_v6 = vld [vmem:[%s420_s1] sm:$0xf]  ;;  %vm190_vm0 = vcmask 130048   ;;  %v362_v8 = vmov 0   ;;  %vm187_vm1 = vcmask 1039360  }
   0xc   : > { %s336_s14 = sshll.u32 %s424_s13, 4  ;;  %v250_v7 = vld [vmem:[%s421_s2] sm:$0xff]  ;;  %350 = vset.pattern.permute.xlu2 %v362_v8  ;;  %351 = vset.pattern.permute.xlu0 %v362_v8  ;;  %vm230_vm2 = vcmask 1031168   ;;  %v332_v16 = vld [vmem:[%s420_s1 + $0x8] sm:$0xf]  ;;  %s320_s28 = sshll.u32 %s424_s13, 2 }
   0xd   : > { %s164_s17 = scalar_lea.vmem %s419_s0, %s336_s14  ;;  %253 = vperm.xlu2 %350, %v250_v7   ;;  %v321_v15 = vld [vmem:[%s420_s1 + $0x4] sm:$0xf]  ;;  %s168_s4 = scalar_lea.vmem %s422_s3, %s320_s28 }
   0xe   : > { %v324_v0 = vld [vmem:[%s164_s17] sm:$0xf]  ;;  %v338_v1 = vld [vmem:[%s164_s17 + $0x4] sm:$0xf0]  ;;  %v337_v3 = vld [vmem:[%s164_s17 + $0x4] sm:$0xf] }
   0xf   : > { %v325_v2 = vor.u32 %v338_v1, %v324_v0  ;;  %v326_v4 = vld [vmem:[%s164_s17 + $0x8] sm:$0xf0] }
  0x10   : > { %v329_v5 = vor.u32 %v337_v3, %v326_v4 }
  0x11   : > { %183 = vrot.lane.b32.xlu1 %v325_v2, %s360_s18  ;;  %226 = vrot.lane.b32.xlu0 %v325_v2, %s361_s19 }
  0x12   : > { %218 = vmatpush.bf16.msra.mxu1 %v325_v2 }
  0x15   : > { %331 = vmatmul.msk.bf16.vlgmr.msra.gmra.mxu1 %vm190_vm0, %v172_v6 }
  0x19   : > { %185 = vrot.lane.b32.xlu1 %v329_v5, %s360_s18  ;;  %228 = vrot.lane.b32.xlu0 %v329_v5, %s361_s19 }
  0x67   : > { %v254_v22 = vpop.permute.xlu2 %253 }
  0x83   : > { %v184_v9 = vpop.permute.xlu1 %183  ;;  %v227_v10 = vpop.permute.xlu0 %226 }
  0x8b   : > { %v186_v11 = vpop.permute.xlu1 %185  ;;  %v229_v12 = vpop.permute.xlu0 %228 }
  0x8c   : > { %v188_v13 = vsel %vm187_vm1, %v184_v9, %v186_v11  ;;  %v231_v14 = vsel %vm230_vm2, %v227_v10, %v229_v12 }
  0x8d   : > { %201 = vmatpush.bf16.msra.mxu0 %v188_v13  ;;  %243 = vmatpush.bf16.msra.mxu2 %v231_v14 }
  0x90   : > { %330 = vmatmul.msk.bf16.vlgmr.msra.gmra.mxu0 %vm190_vm0, %v321_v15  ;;  %333 = vmatmul.msk.bf16.vlgmr.msra.gmra.mxu2 %vm190_vm0, %v332_v16 }
  0x92   : > { %v220_v17 = vpop.f32.mrf.mxu1 }
  0x9a   : > { %v222_v18 = vpop.f32.mrf.mxu1 }
 0x10d   : > { %v203_v19 = vpop.f32.mrf.mxu0 }
 0x10e   : > { %v221_v20 = vadd.f32 %v220_v17, %v203_v19 }
 0x113   : > { %v245_v21 = vpop.f32.mrf.mxu2 }
 0x114   : > { %v249_v23 = vadd.f32 %v245_v21, %v221_v20 }
 0x115   : > { %v205_v24 = vpop.f32.mrf.mxu0 }
 0x116   : > { %v256_v25 = vadd.f32 %v254_v22, %v249_v23 }
 0x118   : > { %v257_v26 = vmax.f32 %v256_v25, 0.0 }
 0x11a   : > { %v258_v27 = vpack.c.bf16 %v257_v26, %v257_v26 }
 0x11b   : > { %v247_v28 = vpop.f32.mrf.mxu2 }
 0x11c   : > { %259 = vst [vmem:[%s168_s4] sm:$0xf] %v258_v27 }
 0x11d PF: > { %s13_s12 = sadd.s32 1, %s358_s12  }
 0x11e   : > { %p10_p4 = scmp.ge.s32.totalorder %s13_s12, 4  }
 0x120   :  { %12 = sbr.rel (!%p10_p4) target bundleno = 1 (0x1), region = 64 }

// kernel: reg_convcnp_forward.19
= control target key start
LH: loop header
LB: loop body
LE: loop exit
PB: predicated region body
PF: predicated region fallthrough
CT: control target
= control target key end

     0   :  { %s423_s12 = smov 0   ;;  %s465_s0 = inlined_call_operand.vmem [shape: bf16[2,16,66], index: 0, kind: input, shape index: {}]   ;;  %s466_s1 = inlined_call_operand.vmem [shape: bf16[3,16,16], index: 1, kind: input, shape index: {}]   ;;  %s467_s2 = inlined_call_operand.vmem [shape: f32[16,1], index: 2, kind: input, shape index: {}]   ;;  %s468_s3 = inlined_call_operand.vmem [shape: bf16[2,16,64], index: 3, kind: output, shape index: {}]  }
   0x1 LB: > { %s339_s13 = sadd.s32 4294967295, %s398_s12   ;;  %p343_p0 = scmp.ge.s32.totalorder %s398_s12, 1  ;;  %s398_s12 = sphi %s423_s12, %s13_s12  }
   0x2   : > { %p137_p1 = scmp.lt.s32.totalorder %s398_s12, 3 }
   0x4   : > { %p138_p2 = pnand %p343_p0, %p137_p1 }
   0x5   : > { %p161_p3 = scmp.lt.s32.totalorder (!%p138_p2), %s339_s13, 1  ;;  %s400_s18 = smov (!%p138_p2), 126  }
   0x6   : > { %141 = sbr.rel (%p138_p2) target bundleno = 286 (0x11e), region = 32  ;;  %s401_s19 = smov (!%p138_p2), 127  }
   0xb   : > { %s470_s13 = smov (!%p161_p3, %s339_s13), 1  ;;  %v376_v1 = vld [vmem:[%s466_s1] sm:$0xff]  ;;  %vm192_vm0 = vcmask 130048   ;;  %v402_v3 = vmov 0   ;;  %v264_v4 = vld [vmem:[%s467_s2 + $0x8] sm:$0xff]  ;;  %v378_v6 = vld [vmem:[%s466_s1 + $0x10] sm:$0xff] }
   0xc   : > { %s373_s14 = sshll.u32 %s470_s13, 3  ;;  %v263_v2 = vld [vmem:[%s467_s2] sm:$0xff]  ;;  %390 = vset.pattern.permute.xlu1 %v402_v3  ;;  %391 = vset.pattern.permute.xlu0 %v402_v3  ;;  %v377_v8 = vld [vmem:[%s466_s1 + $0x8] sm:$0xff]  ;;  %vm281_vm1 = vcmask 519168  }
   0xd   : > { %s165_s17 = scalar_lea.vmem %s465_s0, %s373_s14  ;;  %267 = vperm.xlu1 %390, %v263_v2   ;;  %s170_s5 = scalar_lea.vmem %s468_s3, %s373_s14 }
   0xe   : > { %v375_v0 = vld [vmem:[%s165_s17] sm:$0xff] }
   0xf   : > { %241 = vrot.lane.b32.xlu0 %v375_v0, %s400_s18  ;;  %226 = vmatpush.bf16.msra.mxu1 %v375_v0 }
  0x12   : > { %363 = vmatmul.msk.bf16.vlgmr.msra.gmra.mxu1 %vm192_vm0, %v376_v1 }
  0x15   : > { %272 = vperm.xlu1 %390, %v264_v4  }
  0x17   : > { %189 = vrot.lane.b32.xlu0 %v375_v0, %s401_s19 }
  0x7f   : > { %v268_v13 = vpop.permute.xlu1 %267 }
  0x81   : > { %v242_v5 = vpop.permute.xlu0 %241 }
  0x82   : > { %254 = vmatpush.bf16.msra.mxu2 %v242_v5 }
  0x85   : > { %370 = vmatmul.msk.bf16.vlgmr.msra.gmra.mxu2 %vm192_vm0, %v378_v6 }
  0x87   : > { %v273_v23 = vpop.permute.xlu1 %272 }
  0x89   : > { %v190_v7 = vpop.permute.xlu0 %189 }
  0x8a   : > { %203 = vmatpush.bf16.msra.mxu0 %v190_v7 }
  0x8d   : > { %358 = vmatmul.msk.bf16.vlgmr.msra.gmra.mxu0 %vm192_vm0, %v377_v8 }
  0x8f   : > { %v228_v9 = vpop.f32.mrf.mxu1 }
  0x97   : > { %v230_v17 = vpop.f32.mrf.mxu1 }
 0x108   : > { %v256_v10 = vpop.f32.mrf.mxu2 }
 0x10a   : > { %v205_v11 = vpop.f32.mrf.mxu0 }
 0x10b   : > { %v229_v12 = vadd.f32 %v228_v9, %v205_v11 }
 0x10d   : > { %v261_v14 = vadd.f32 %v256_v10, %v229_v12 }
 0x10f   : > { %v275_v15 = vadd.f32 %v268_v13, %v261_v14 }
 0x110   : > { %v258_v21 = vpop.f32.mrf.mxu2 }
 0x111   : > { %v277_v16 = vmax.f32 %v275_v15, 0.0 }
 0x112   : > { %v207_v18 = vpop.f32.mrf.mxu0 }
 0x113   : > { %v279_v19 = vpack.c.bf16 %v277_v16, %v277_v16  ;;  %v231_v20 = vadd.f32 %v230_v17, %v207_v18 }
 0x115   : > { %282 = vst.msk [vmem:[%s170_s5] sm:$0xf] %vm281_vm1, %v279_v19  ;;  %v262_v22 = vadd.f32 %v258_v21, %v231_v20 }
 0x117   : > { %v276_v24 = vadd.f32 %v273_v23, %v262_v22 }
 0x119   : > { %v278_v25 = vmax.f32 %v276_v24, 0.0 }
 0x11b   : > { %v280_v26 = vpack.c.bf16 %v278_v25, %v278_v25 }
 0x11d   : > { %283 = vst.msk [vmem:[%s170_s5 + $0x4] sm:$0xf] %vm281_vm1, %v280_v26 }
 0x11e PF: > { %s13_s12 = sadd.s32 1, %s398_s12  }
 0x11f   : > { %p10_p4 = scmp.ge.s32.totalorder %s13_s12, 4  }
 0x121   :  { %12 = sbr.rel (!%p10_p4) target bundleno = 1 (0x1), region = 64 }

// kernel: reg_convcnp_forward.20
= control target key start
LH: loop header
LB: loop body
LE: loop exit
PB: predicated region body
PF: predicated region fallthrough
CT: control target
= control target key end

     0   :  { %s442_s12 = smov 0   ;;  %s481_s0 = inlined_call_operand.vmem [shape: bf16[2,32,34], index: 0, kind: input, shape index: {}]   ;;  %s482_s1 = inlined_call_operand.vmem [shape: bf16[3,16,32], index: 1, kind: input, shape index: {}]   ;;  %s483_s2 = inlined_call_operand.vmem [shape: f32[16,1], index: 2, kind: input, shape index: {}]   ;;  %s484_s3 = inlined_call_operand.vmem [shape: bf16[2,16,32], index: 3, kind: output, shape index: {}]  }
   0x1 LB: > { %s353_s13 = sadd.s32 4294967295, %s417_s12   ;;  %p357_p0 = scmp.ge.s32.totalorder %s417_s12, 1  ;;  %s417_s12 = sphi %s442_s12, %s13_s12  }
   0x2   : > { %p137_p1 = scmp.lt.s32.totalorder %s417_s12, 3 }
   0x4   : > { %p138_p2 = pnand %p357_p0, %p137_p1 }
   0x5   : > { %p161_p3 = scmp.lt.s32.totalorder (!%p138_p2), %s353_s13, 1  ;;  %s419_s18 = smov (!%p138_p2), 126  }
   0x6   : > { %141 = sbr.rel (%p138_p2) target bundleno = 290 (0x122), region = 32  ;;  %s420_s19 = smov (!%p138_p2), 127  }
   0xb   : > { %s486_s13 = smov (!%p161_p3, %s353_s13), 1  ;;  %v395_v2 = vld [vmem:[%s482_s1] sm:$0xff]  ;;  %vm202_vm0 = vcmask 261120   ;;  %v421_v4 = vmov 0   ;;  %v278_v5 = vld [vmem:[%s483_s2 + $0x8] sm:$0xff]  ;;  %v397_v8 = vld [vmem:[%s482_s1 + $0x10] sm:$0xff] }
   0xc   : > { %s391_s14 = sshll.u32 %s486_s13, 4  ;;  %v277_v3 = vld [vmem:[%s483_s2] sm:$0xff]  ;;  %409 = vset.pattern.permute.xlu2 %v421_v4  ;;  %410 = vset.pattern.permute.xlu0 %v421_v4  ;;  %v396_v11 = vld [vmem:[%s482_s1 + $0x8] sm:$0xff]  ;;  %s392_s30 = sshll.u32 %s486_s13, 3  ;;  %vm295_vm1 = vcmask 257024  }
   0xd   : > { %s165_s17 = scalar_lea.vmem %s481_s0, %s391_s14  ;;  %281 = vperm.xlu2 %409, %v277_v3   ;;  %s170_s6 = scalar_lea.vmem %s484_s3, %s392_s30 }
   0xe   : > { %v394_v0 = vld [vmem:[%s165_s17 + $0x8] sm:$0xff]  ;;  %v393_v1 = vld [vmem:[%s165_s17] sm:$0xff] }
   0xf   : > { %254 = vrot.lane.b32.xlu0 %v394_v0, %s419_s18  ;;  %252 = vrot.lane.b32.xlu1 %v393_v1, %s419_s18 }
  0x10   : > { %236 = vmatpush.bf16.msra.mxu1 %v394_v0 }
  0x14   : > { %237 = vmatpush.bf16.msra.mxu1 %v393_v1 }
  0x15   : > { %286 = vperm.xlu2 %409, %v278_v5  }
  0x17   : > { %198 = vrot.lane.b32.xlu0 %v394_v0, %s420_s19  ;;  %196 = vrot.lane.b32.xlu1 %v393_v1, %s420_s19 }
  0x18   : > { %381 = vmatmul.msk.bf16.vlgmr.msra.gmra.mxu1 %vm202_vm0, %v395_v2 }
  0x67   : > { %v282_v16 = vpop.permute.xlu2 %281 }
  0x6f   : > { %v287_v26 = vpop.permute.xlu2 %286 }
  0x81   : > { %v255_v6 = vpop.permute.xlu0 %254  ;;  %v253_v7 = vpop.permute.xlu1 %252 }
  0x82   : > { %267 = vmatpush.bf16.msra.mxu2 %v255_v6 }
  0x86   : > { %268 = vmatpush.bf16.msra.mxu2 %v253_v7 }
  0x89   : > { %v199_v9 = vpop.permute.xlu0 %198  ;;  %388 = vmatmul.msk.bf16.vlgmr.msra.gmra.mxu2 %vm202_vm0, %v397_v8  ;;  %v197_v10 = vpop.permute.xlu1 %196 }
  0x8a   : > { %212 = vmatpush.bf16.msra.mxu0 %v199_v9 }
  0x8e   : > { %213 = vmatpush.bf16.msra.mxu0 %v197_v10 }
  0x91   : > { %376 = vmatmul.msk.bf16.vlgmr.msra.gmra.mxu0 %vm202_vm0, %v396_v11 }
  0x95   : > { %v239_v12 = vpop.f32.mrf.mxu1 }
  0x9d   : > { %v241_v20 = vpop.f32.mrf.mxu1 }
 0x10c   : > { %v270_v13 = vpop.f32.mrf.mxu2 }
 0x10e   : > { %v215_v14 = vpop.f32.mrf.mxu0 }
 0x10f   : > { %v240_v15 = vadd.f32 %v239_v12, %v215_v14 }
 0x111   : > { %v275_v17 = vadd.f32 %v270_v13, %v240_v15 }
 0x113   : > { %v289_v18 = vadd.f32 %v282_v16, %v275_v17 }
 0x114   : > { %v272_v24 = vpop.f32.mrf.mxu2 }
 0x115   : > { %v291_v19 = vmax.f32 %v289_v18, 0.0 }
 0x116   : > { %v217_v21 = vpop.f32.mrf.mxu0 }
 0x117   : > { %v293_v22 = vpack.c.bf16 %v291_v19, %v291_v19  ;;  %v242_v23 = vadd.f32 %v241_v20, %v217_v21 }
 0x119   : > { %296 = vst.msk [vmem:[%s170_s6] sm:$0xf] %vm295_vm1, %v293_v22  ;;  %v276_v25 = vadd.f32 %v272_v24, %v242_v23 }
 0x11b   : > { %v290_v27 = vadd.f32 %v287_v26, %v276_v25 }
 0x11d   : > { %v292_v28 = vmax.f32 %v290_v27, 0.0 }
 0x11f   : > { %v294_v29 = vpack.c.bf16 %v292_v28, %v292_v28 }
 0x121   : > { %297 = vst.msk [vmem:[%s170_s6 + $0x4] sm:$0xf] %vm295_vm1, %v294_v29 }
 0x122 PF: > { %s13_s12 = sadd.s32 1, %s417_s12  }
 0x123   : > { %p10_p4 = scmp.ge.s32.totalorder %s13_s12, 4  }
 0x125   :  { %12 = sbr.rel (!%p10_p4) target bundleno = 1 (0x1), region = 64 }

// kernel: reg_convcnp_forward.21
= control target key start
LH: loop header
LB: loop body
LE: loop exit
PB: predicated region body
PF: predicated region fallthrough
CT: control target
= control target key end

     0   :  { %s534_s12 = smov 0   ;;  %s598_s0 = inlined_call_operand.vmem [shape: bf16[2,32,18], index: 0, kind: input, shape index: {}]   ;;  %s599_s1 = inlined_call_operand.vmem [shape: bf16[3,32,32], index: 1, kind: input, shape index: {}]   ;;  %s600_s2 = inlined_call_operand.vmem [shape: f32[32,1], index: 2, kind: input, shape index: {}]   ;;  %s601_s3 = inlined_call_operand.vmem [shape: bf16[2,32,16], index: 3, kind: output, shape index: {}]  }
   0x1 LB: > { %s420_s13 = sadd.s32 4294967295, %s509_s12   ;;  %p424_p0 = scmp.ge.s32.totalorder %s509_s12, 1  ;;  %s509_s12 = sphi %s534_s12, %s13_s12  }
   0x2   : > { %p137_p1 = scmp.lt.s32.totalorder %s509_s12, 3 }
   0x4   : > { %p138_p2 = pnand %p424_p0, %p137_p1 }
   0x5   : > { %p161_p3 = scmp.lt.s32.totalorder (!%p138_p2), %s420_s13, 1  ;;  %s511_s18 = smov (!%p138_p2), 127  }
   0x6   : > { %141 = sbr.rel (%p138_p2) target bundleno = 306 (0x132), region = 32  ;;  %s512_s19 = smov (!%p138_p2), 126  }
   0xb   : > { %s603_s13 = smov (!%p161_p3, %s420_s13), 1  ;;  %v481_v2 = vld [vmem:[%s599_s1] sm:$0xff]  ;;  %vm211_vm0 = vcmask 261120   ;;  %v482_v3 = vld [vmem:[%s599_s1 + $0x8] sm:$0xff]  ;;  %v326_v4 = vld [vmem:[%s600_s2 + $0x10] sm:$0xff]  ;;  %v513_v7 = vmov 0  }
   0xc   : > { %s477_s14 = sshll.u32 %s603_s13, 4  ;;  %v324_v5 = vld [vmem:[%s600_s2] sm:$0xff]  ;;  %v327_v6 = vld [vmem:[%s600_s2 + $0x18] sm:$0xff]  ;;  %501 = vset.pattern.permute.xlu0 %v513_v7  ;;  %502 = vset.pattern.permute.xlu1 %v513_v7  ;;  %v325_v10 = vld [vmem:[%s600_s2 + $0x8] sm:$0xff]  ;;  %vm360_vm1 = vcmask 125952  }
   0xd   : > { %s165_s17 = scalar_lea.vmem %s598_s0, %s477_s14  ;;  %500 = vset.pattern.permute.xlu2 %v513_v7  ;;  %v483_v13 = vld [vmem:[%s599_s1 + $0x10] sm:$0xff]  ;;  %v485_v14 = vld [vmem:[%s599_s1 + $0x20] sm:$0xff]  ;;  %v484_v15 = vld [vmem:[%s599_s1 + $0x18] sm:$0xff] }
   0xe   : > { %v480_v0 = vld [vmem:[%s165_s17 + $0x8] sm:$0xff]  ;;  %v479_v1 = vld [vmem:[%s165_s17] sm:$0xff]  ;;  %330 = vperm.xlu2 %500, %v324_v5  }
   0xf   : > { %207 = vrot.lane.b32.xlu1 %v480_v0, %s511_s18  ;;  %291 = vrot.lane.b32.xlu0 %v480_v0, %s512_s19  ;;  %v486_v16 = vld [vmem:[%s599_s1 + $0x28] sm:$0xff] }
  0x10   : > { %261 = vmatpush.bf16.msra.mxu1 %v480_v0 }
  0x14   : > { %262 = vmatpush.bf16.msra.mxu1 %v479_v1 }
  0x16   : > { %335 = vperm.xlu2 %500, %v325_v10  }
  0x17   : > { %205 = vrot.lane.b32.xlu1 %v479_v1, %s511_s18  ;;  %289 = vrot.lane.b32.xlu0 %v479_v1, %s512_s19  ;;  %s170_s18 = scalar_lea.vmem %s601_s3, %s477_s14 }
  0x18   : > { %459 = vmatmul.msk.bf16.vlgmr.msra.gmra.mxu1 %vm211_vm0, %v481_v2 }
  0x1f   : > { %340 = vperm.xlu0 %501, %v326_v4   ;;  %345 = vperm.xlu1 %502, %v327_v6  }
  0x28   : > { %460 = vmatmul.msk.bf16.gmra.mxu1 %vm211_vm0, %v482_v3 }
  0x68   : > { %v331_v20 = vpop.permute.xlu2 %330 }
  0x70   : > { %v336_v30 = vpop.permute.xlu2 %335 }
  0x81   : > { %v208_v8 = vpop.permute.xlu1 %207  ;;  %v292_v9 = vpop.permute.xlu0 %291 }
  0x82   : > { %307 = vmatpush.bf16.msra.mxu2 %v292_v9  ;;  %224 = vmatpush.bf16.msra.mxu0 %v208_v8 }
  0x83   : > { %487 = vmatpush.bf16.msra.mxu3 %v208_v8 }
  0x89   : > { %v206_v11 = vpop.permute.xlu1 %205  ;;  %v290_v12 = vpop.permute.xlu0 %289 }
  0x8a   : > { %225 = vmatpush.bf16.msra.mxu0 %v206_v11  ;;  %308 = vmatpush.bf16.msra.mxu2 %v290_v12 }
  0x8b   : > { %488 = vmatpush.bf16.msra.mxu3 %v206_v11 }
  0x8d   : > { %449 = vmatmul.msk.bf16.vlgmr.msra.gmra.mxu0 %vm211_vm0, %v483_v13  ;;  %473 = vmatmul.msk.bf16.vlgmr.msra.gmra.mxu2 %vm211_vm0, %v485_v14 }
  0x8e   : > { %450 = vmatmul.msk.bf16.vlgmr.msra.gmra.mxu3 %vm211_vm0, %v484_v15 }
  0x91   : > { %v341_v39 = vpop.permute.xlu0 %340  ;;  %v346_v48 = vpop.permute.xlu1 %345 }
  0x95   : > { %v264_v17 = vpop.f32.mrf.mxu1 }
  0x9d   : > { %474 = vmatmul.msk.bf16.gmra.mxu2 %vm211_vm0, %v486_v16  ;;  %v266_v21 = vpop.f32.mrf.mxu1 }
  0xa5   : > { %v269_v33 = vpop.f32.mrf.mxu1 }
  0xad   : > { %v271_v43 = vpop.f32.mrf.mxu1 }
 0x10a   : > { %v227_v18 = vpop.f32.mrf.mxu0 }
 0x10b   : > { %v265_v19 = vadd.f32 %v264_v17, %v227_v18 }
 0x110   : > { %v310_v22 = vpop.f32.mrf.mxu2 }
 0x111   : > { %v320_v23 = vadd.f32 %v310_v22, %v265_v19  ;;  %v232_v32 = vpop.f32.mrf.mxu3 }
 0x112   : > { %v229_v25 = vpop.f32.mrf.mxu0  ;;  %v270_v35 = vadd.f32 %v269_v33, %v232_v32 }
 0x113   : > { %v348_v24 = vadd.f32 %v331_v20, %v320_v23  ;;  %v267_v28 = vadd.f32 %v266_v21, %v229_v25 }
 0x115   : > { %v352_v26 = vmax.f32 %v348_v24, 0.0 }
 0x117   : > { %v356_v27 = vpack.c.bf16 %v352_v26, %v352_v26 }
 0x118   : > { %v312_v29 = vpop.f32.mrf.mxu2 }
 0x119   : > { %361 = vst.msk [vmem:[%s170_s18] sm:$0xf] %vm360_vm1, %v356_v27  ;;  %v321_v31 = vadd.f32 %v312_v29, %v267_v28  ;;  %v234_v42 = vpop.f32.mrf.mxu3 }
 0x11a   : > { %v272_v45 = vadd.f32 %v271_v43, %v234_v42 }
 0x11b   : > { %v349_v34 = vadd.f32 %v336_v30, %v321_v31 }
 0x11d   : > { %v353_v36 = vmax.f32 %v349_v34, 0.0 }
 0x11f   : > { %v357_v37 = vpack.c.bf16 %v353_v36, %v353_v36 }
 0x120   : > { %v315_v38 = vpop.f32.mrf.mxu2 }
 0x121   : > { %362 = vst.msk [vmem:[%s170_s18 + $0x4] sm:$0xf] %vm360_vm1, %v357_v37  ;;  %v322_v40 = vadd.f32 %v315_v38, %v270_v35 }
 0x123   : > { %v350_v41 = vadd.f32 %v341_v39, %v322_v40 }
 0x125   : > { %v354_v44 = vmax.f32 %v350_v41, 0.0 }
 0x127   : > { %v358_v46 = vpack.c.bf16 %v354_v44, %v354_v44 }
 0x128   : > { %v317_v47 = vpop.f32.mrf.mxu2 }
 0x129   : > { %363 = vst.msk [vmem:[%s170_s18 + $0x8] sm:$0xf] %vm360_vm1, %v358_v46  ;;  %v323_v49 = vadd.f32 %v317_v47, %v272_v45 }
 0x12b   : > { %v351_v50 = vadd.f32 %v346_v48, %v323_v49 }
 0x12d   : > { %v355_v51 = vmax.f32 %v351_v50, 0.0 }
 0x12f   : > { %v359_v52 = vpack.c.bf16 %v355_v51, %v355_v51 }
 0x131   : > { %364 = vst.msk [vmem:[%s170_s18 + $0xc] sm:$0xf] %vm360_vm1, %v359_v52 }
 0x132 PF: > { %s13_s12 = sadd.s32 1, %s509_s12  }
 0x133   : > { %p10_p4 = scmp.ge.s32.totalorder %s13_s12, 4  }
 0x135   :  { %12 = sbr.rel (!%p10_p4) target bundleno = 1 (0x1), region = 64 }

// kernel: reg_convcnp_forward.22
= control target key start
LH: loop header
LB: loop body
LE: loop exit
PB: predicated region body
PF: predicated region fallthrough
CT: control target
= control target key end

     0   :  { %s574_s12 = smov 0   ;;  %s641_s0 = inlined_call_operand.vmem [shape: bf16[2,64,10], index: 0, kind: input, shape index: {}]   ;;  %s642_s1 = inlined_call_operand.vmem [shape: bf16[3,32,64], index: 1, kind: input, shape index: {}]   ;;  %s643_s2 = inlined_call_operand.vmem [shape: f32[32,1], index: 2, kind: input, shape index: {}]   ;;  %s644_s3 = inlined_call_operand.vmem [shape: bf16[2,32,8], index: 3, kind: output, shape index: {}]  }
   0x1 LB: > { %s448_s13 = sadd.s32 4294967295, %s549_s12   ;;  %p452_p0 = scmp.ge.s32.totalorder %s549_s12, 1  ;;  %s549_s12 = sphi %s574_s12, %s13_s12  }
   0x2   : > { %p137_p1 = scmp.lt.s32.totalorder %s549_s12, 3 }
   0x4   : > { %p138_p2 = pnand %p452_p0, %p137_p1 }
   0x5   : > { %p161_p3 = scmp.lt.s32.totalorder (!%p138_p2), %s448_s13, 1  ;;  %s551_s18 = smov (!%p138_p2), 126  }
   0x6   : > { %141 = sbr.rel (%p138_p2) target bundleno = 314 (0x13a), region = 32  ;;  %s552_s19 = smov (!%p138_p2), 127  }
   0xb   : > { %s646_s13 = smov (!%p161_p3, %s448_s13), 1  ;;  %v519_v5 = vld [vmem:[%s642_s1] sm:$0xff]  ;;  %vm231_vm0 = vcmask 523264   ;;  %v520_v7 = vld [vmem:[%s642_s1 + $0x8] sm:$0xff]  ;;  %v354_v11 = vld [vmem:[%s643_s2 + $0x10] sm:$0xff]  ;;  %v553_v12 = vmov 0  }
   0xc   : > { %s513_s14 = sshll.u32 %s646_s13, 5  ;;  %v353_v10 = vld [vmem:[%s643_s2 + $0x8] sm:$0xff]  ;;  %541 = vset.pattern.permute.xlu0 %v553_v12  ;;  %542 = vset.pattern.permute.xlu1 %v553_v12  ;;  %v352_v13 = vld [vmem:[%s643_s2] sm:$0xff]  ;;  %v355_v16 = vld [vmem:[%s643_s2 + $0x18] sm:$0xff]  ;;  %s514_s15 = sshll.u32 %s646_s13, 4  ;;  %vm388_vm1 = vcmask 60416  }
   0xd   : > { %s165_s17 = scalar_lea.vmem %s641_s0, %s513_s14  ;;  %540 = vset.pattern.permute.xlu2 %v553_v12  ;;  %v523_v18 = vld [vmem:[%s642_s1 + $0x20] sm:$0xff]  ;;  %v521_v20 = vld [vmem:[%s642_s1 + $0x10] sm:$0xff]  ;;  %v522_v21 = vld [vmem:[%s642_s1 + $0x18] sm:$0xff] }
   0xe   : > { %v518_v0 = vld [vmem:[%s165_s17 + $0x18] sm:$0xff]  ;;  %v516_v1 = vld [vmem:[%s165_s17 + $0x8] sm:$0xff]  ;;  %v517_v2 = vld [vmem:[%s165_s17 + $0x10] sm:$0xff] }
   0xf   : > { %317 = vrot.lane.b32.xlu0 %v518_v0, %s551_s18  ;;  %313 = vrot.lane.b32.xlu1 %v516_v1, %s551_s18  ;;  %v515_v3 = vld [vmem:[%s165_s17] sm:$0xff]  ;;  %v524_v22 = vld [vmem:[%s642_s1 + $0x28] sm:$0xff] }
  0x10   : > { %225 = vrot.lane.b32.xlu2 %v518_v0, %s552_s19  ;;  %281 = vmatpush.bf16.msra.mxu1 %v518_v0 }
  0x14   : > { %282 = vmatpush.bf16.msra.mxu1 %v517_v2 }
  0x17   : > { %315 = vrot.lane.b32.xlu0 %v517_v2, %s551_s18  ;;  %311 = vrot.lane.b32.xlu1 %v515_v3, %s551_s18  ;;  %s628_s18 = scalar_lea.vmem %s644_s3, %s514_s15 }
  0x18   : > { %223 = vrot.lane.b32.xlu2 %v517_v2, %s552_s19  ;;  %283 = vmatpush.bf16.msra.mxu1 %v516_v1 }
  0x1c   : > { %284 = vmatpush.bf16.msra.mxu1 %v515_v3 }
  0x1f   : > { %221 = vrot.lane.b32.xlu0 %v516_v1, %s552_s19  ;;  %219 = vrot.lane.b32.xlu1 %v515_v3, %s552_s19 }
  0x20   : > { %495 = vmatmul.msk.bf16.vlgmr.msra.gmra.mxu1 %vm231_vm0, %v519_v5  ;;  %358 = vperm.xlu2 %540, %v352_v13  }
  0x27   : > { %363 = vperm.xlu0 %541, %v353_v10   ;;  %368 = vperm.xlu1 %542, %v354_v11  }
  0x28   : > { %373 = vperm.xlu2 %540, %v355_v16  }
  0x30   : > { %496 = vmatmul.msk.bf16.gmra.mxu1 %vm231_vm0, %v520_v7 }
  0x6a   : > { %v226_v4 = vpop.permute.xlu2 %225 }
  0x6b   : > { %242 = vmatpush.bf16.msra.mxu0 %v226_v4  ;;  %525 = vmatpush.bf16.msra.mxu3 %v226_v4 }
  0x72   : > { %v224_v6 = vpop.permute.xlu2 %223 }
  0x73   : > { %243 = vmatpush.bf16.msra.mxu0 %v224_v6  ;;  %526 = vmatpush.bf16.msra.mxu3 %v224_v6 }
  0x7a   : > { %v359_v28 = vpop.permute.xlu2 %358 }
  0x81   : > { %v318_v8 = vpop.permute.xlu0 %317  ;;  %v314_v9 = vpop.permute.xlu1 %313 }
  0x82   : > { %333 = vmatpush.bf16.msra.mxu2 %v318_v8  ;;  %v374_v55 = vpop.permute.xlu2 %373 }
  0x89   : > { %v316_v14 = vpop.permute.xlu0 %315  ;;  %v312_v15 = vpop.permute.xlu1 %311 }
  0x8a   : > { %334 = vmatpush.bf16.msra.mxu2 %v316_v14 }
  0x8e   : > { %335 = vmatpush.bf16.msra.mxu2 %v314_v9 }
  0x91   : > { %v222_v17 = vpop.permute.xlu0 %221  ;;  %v220_v19 = vpop.permute.xlu1 %219 }
  0x92   : > { %244 = vmatpush.bf16.msra.mxu0 %v222_v17  ;;  %336 = vmatpush.bf16.msra.mxu2 %v312_v15 }
  0x93   : > { %527 = vmatpush.bf16.msra.mxu3 %v222_v17 }
  0x95   : > { %509 = vmatmul.msk.bf16.vlgmr.msra.gmra.mxu2 %vm231_vm0, %v523_v18 }
  0x96   : > { %245 = vmatpush.bf16.msra.mxu0 %v220_v19 }
  0x97   : > { %528 = vmatpush.bf16.msra.mxu3 %v220_v19 }
  0x99   : > { %485 = vmatmul.msk.bf16.vlgmr.msra.gmra.mxu0 %vm231_vm0, %v521_v20  ;;  %v364_v36 = vpop.permute.xlu0 %363  ;;  %v369_v45 = vpop.permute.xlu1 %368 }
  0x9a   : > { %486 = vmatmul.msk.bf16.vlgmr.msra.gmra.mxu3 %vm231_vm0, %v522_v21 }
  0x9d   : > { %v286_v23 = vpop.f32.mrf.mxu1 }
  0xa5   : > { %510 = vmatmul.msk.bf16.gmra.mxu2 %vm231_vm0, %v524_v22  ;;  %v288_v26 = vpop.f32.mrf.mxu1 }
  0xad   : > { %v291_v39 = vpop.f32.mrf.mxu1 }
  0xb5   : > { %v293_v49 = vpop.f32.mrf.mxu1 }
 0x116   : > { %v247_v24 = vpop.f32.mrf.mxu0 }
 0x117   : > { %v287_v25 = vadd.f32 %v286_v23, %v247_v24 }
 0x118   : > { %v338_v27 = vpop.f32.mrf.mxu2 }
 0x119   : > { %v348_v29 = vadd.f32 %v338_v27, %v287_v25 }
 0x11b   : > { %v376_v30 = vadd.f32 %v359_v28, %v348_v29 }
 0x11d   : > { %v380_v31 = vmax.f32 %v376_v30, 0.0  ;;  %v252_v38 = vpop.f32.mrf.mxu3 }
 0x11e   : > { %v249_v32 = vpop.f32.mrf.mxu0  ;;  %v292_v41 = vadd.f32 %v291_v39, %v252_v38 }
 0x11f   : > { %v384_v33 = vpack.c.bf16 %v380_v31, %v380_v31  ;;  %v289_v34 = vadd.f32 %v288_v26, %v249_v32 }
 0x120   : > { %v340_v35 = vpop.f32.mrf.mxu2 }
 0x121   : > { %389 = vst.msk [vmem:[%s628_s18] sm:$0xf] %vm388_vm1, %v384_v33  ;;  %v349_v37 = vadd.f32 %v340_v35, %v289_v34 }
 0x123   : > { %v377_v40 = vadd.f32 %v364_v36, %v349_v37 }
 0x125   : > { %v381_v42 = vmax.f32 %v377_v40, 0.0  ;;  %v254_v48 = vpop.f32.mrf.mxu3 }
 0x126   : > { %v294_v51 = vadd.f32 %v293_v49, %v254_v48 }
 0x127   : > { %v385_v43 = vpack.c.bf16 %v381_v42, %v381_v42 }
 0x128   : > { %v343_v44 = vpop.f32.mrf.mxu2 }
 0x129   : > { %390 = vst.msk [vmem:[%s628_s18 + $0x4] sm:$0xf] %vm388_vm1, %v385_v43  ;;  %v350_v46 = vadd.f32 %v343_v44, %v292_v41 }
 0x12b   : > { %v378_v47 = vadd.f32 %v369_v45, %v350_v46 }
 0x12d   : > { %v382_v50 = vmax.f32 %v378_v47, 0.0 }
 0x12f   : > { %v386_v52 = vpack.c.bf16 %v382_v50, %v382_v50 }
 0x130   : > { %v345_v53 = vpop.f32.mrf.mxu2 }
 0x131   : > { %391 = vst.msk [vmem:[%s628_s18 + $0x8] sm:$0xf] %vm388_vm1, %v386_v52  ;;  %v351_v54 = vadd.f32 %v345_v53, %v294_v51 }
 0x133   : > { %v379_v56 = vadd.f32 %v374_v55, %v351_v54 }
 0x135   : > { %v383_v57 = vmax.f32 %v379_v56, 0.0 }
 0x137   : > { %v387_v58 = vpack.c.bf16 %v383_v57, %v383_v57 }
 0x139   : > { %392 = vst.msk [vmem:[%s628_s18 + $0xc] sm:$0xf] %vm388_vm1, %v387_v58 }
 0x13a PF: > { %s13_s12 = sadd.s32 1, %s549_s12  }
 0x13b   : > { %p10_p4 = scmp.ge.s32.totalorder %s13_s12, 4  }
 0x13d   :  { %12 = sbr.rel (!%p10_p4) target bundleno = 1 (0x1), region = 64 }

// kernel: reg_convcnp_forward.23
= control target key start
LH: loop header
LB: loop body
LE: loop exit
PB: predicated region body
PF: predicated region fallthrough
CT: control target
= control target key end

     0   :  { %s760_s12 = smov 0   ;;  %s874_s0 = inlined_call_operand.vmem [shape: bf16[2,64,6], index: 0, kind: input, shape index: {}]   ;;  %s875_s1 = inlined_call_operand.vmem [shape: bf16[3,64,64], index: 1, kind: input, shape index: {}]   ;;  %s876_s2 = inlined_call_operand.vmem [shape: f32[64,1], index: 2, kind: input, shape index: {}]   ;;  %s877_s3 = inlined_call_operand.vmem [shape: bf16[2,64,4], index: 3, kind: output, shape index: {}]  }
   0x1 LB: > { %s582_s13 = sadd.s32 4294967295, %s735_s12   ;;  %p586_p0 = scmp.ge.s32.totalorder %s735_s12, 1  ;;  %s735_s12 = sphi %s760_s12, %s13_s12  }
   0x2   : > { %p137_p1 = scmp.lt.s32.totalorder %s735_s12, 3 }
   0x4   : > { %p138_p2 = pnand %p586_p0, %p137_p1 }
   0x5   : > { %p161_p3 = scmp.lt.s32.totalorder (!%p138_p2), %s582_s13, 1  ;;  %s737_s18 = smov (!%p138_p2), 127  }
   0x6   : > { %141 = sbr.rel (%p138_p2) target bundleno = 335 (0x14f), region = 32  ;;  %s738_s19 = smov (!%p138_p2), 126  }
   0xb   : > { %s879_s13 = smov (!%p161_p3, %s582_s13), 1  ;;  %vm249_vm0 = vcmask 523264   ;;  %v692_v4 = vld [vmem:[%s875_s1 + $0x8] sm:$0xff]  ;;  %v693_v7 = vld [vmem:[%s875_s1 + $0x10] sm:$0xff]  ;;  %v739_v12 = vmov 0   ;;  %v695_v15 = vld [vmem:[%s875_s1 + $0x20] sm:$0xff] }
   0xc   : > { %s685_s14 = sshll.u32 %s879_s13, 5  ;;  %v448_v11 = vld [vmem:[%s876_s2 + $0x10] sm:$0xff]  ;;  %728 = vset.pattern.permute.xlu1 %v739_v12  ;;  %727 = vset.pattern.permute.xlu0 %v739_v12  ;;  %v696_v16 = vld [vmem:[%s875_s1 + $0x28] sm:$0xff]  ;;  %v694_v18 = vld [vmem:[%s875_s1 + $0x18] sm:$0xff]  ;;  %vm518_vm1 = vcmask 27648  }
   0xd   : > { %s165_s17 = scalar_lea.vmem %s874_s0, %s685_s14  ;;  %726 = vset.pattern.permute.xlu2 %v739_v12  ;;  %v700_v19 = vld [vmem:[%s875_s1 + $0x48] sm:$0xff]  ;;  %v450_v20 = vld [vmem:[%s876_s2 + $0x20] sm:$0xff]  ;;  %v453_v23 = vld [vmem:[%s876_s2 + $0x38] sm:$0xff]  ;;  %s853_s11 = scalar_lea.vmem %s877_s3, %s685_s14 }
   0xe   : > { %v690_v0 = vld [vmem:[%s165_s17 + $0x18] sm:$0xff]  ;;  %v689_v1 = vld [vmem:[%s165_s17 + $0x10] sm:$0xff]  ;;  %v688_v2 = vld [vmem:[%s165_s17 + $0x8] sm:$0xff] }
   0xf   : > { %243 = vrot.lane.b32.xlu0 %v690_v0, %s737_s18  ;;  %241 = vrot.lane.b32.xlu1 %v689_v1, %s737_s18  ;;  %v687_v3 = vld [vmem:[%s165_s17] sm:$0xff]  ;;  %v447_v22 = vld [vmem:[%s876_s2 + $0x8] sm:$0xff] }
  0x10   : > { %239 = vrot.lane.b32.xlu2 %v688_v2, %s737_s18  ;;  %707 = vmatpush.bf16.msra.mxu1 %v690_v0  ;;  %v446_v21 = vld [vmem:[%s876_s2] sm:$0xff]  ;;  %v697_v24 = vld [vmem:[%s875_s1 + $0x30] sm:$0xff]  ;;  %v449_v26 = vld [vmem:[%s876_s2 + $0x18] sm:$0xff] }
  0x11   : > { %v691_v25 = vld [vmem:[%s875_s1] sm:$0xff]  ;;  %v452_v27 = vld [vmem:[%s876_s2 + $0x30] sm:$0xff]  ;;  %v451_v29 = vld [vmem:[%s876_s2 + $0x28] sm:$0xff] }
  0x12   : > { %v701_v28 = vld [vmem:[%s875_s1 + $0x50] sm:$0xff]  ;;  %v698_v30 = vld [vmem:[%s875_s1 + $0x38] sm:$0xff]  ;;  %v699_v31 = vld [vmem:[%s875_s1 + $0x40] sm:$0xff] }
  0x13   : > { %v702_v32 = vld [vmem:[%s875_s1 + $0x58] sm:$0xff] }
  0x14   : > { %708 = vmatpush.bf16.msra.mxu1 %v689_v1 }
  0x17   : > { %391 = vrot.lane.b32.xlu0 %v690_v0, %s738_s19  ;;  %389 = vrot.lane.b32.xlu1 %v689_v1, %s738_s19 }
  0x18   : > { %387 = vrot.lane.b32.xlu2 %v688_v2, %s738_s19  ;;  %709 = vmatpush.bf16.msra.mxu1 %v688_v2 }
  0x1c   : > { %710 = vmatpush.bf16.msra.mxu1 %v687_v3 }
  0x1f   : > { %237 = vrot.lane.b32.xlu0 %v687_v3, %s737_s18  ;;  %385 = vrot.lane.b32.xlu1 %v687_v3, %s738_s19 }
  0x20   : > { %652 = vmatmul.msk.bf16.vlgmr.msra.gmra.mxu1 %vm249_vm0, %v692_v4  ;;  %456 = vperm.xlu2 %726, %v446_v21  }
  0x27   : > { %466 = vperm.xlu1 %728, %v448_v11   ;;  %461 = vperm.xlu0 %727, %v447_v22  }
  0x28   : > { %471 = vperm.xlu2 %726, %v449_v26  }
  0x2f   : > { %476 = vperm.xlu1 %728, %v450_v20   ;;  %486 = vperm.xlu0 %727, %v452_v27  }
  0x30   : > { %653 = vmatmul.msk.bf16.gmra.mxu1 %vm249_vm0, %v693_v7  ;;  %481 = vperm.xlu2 %726, %v451_v29  }
  0x37   : > { %491 = vperm.xlu1 %728, %v453_v23  }
  0x40   : > { %654 = vmatmul.msk.bf16.gmra.mxu1 %vm249_vm0, %v694_v18 }
  0x6a   : > { %v240_v8 = vpop.permute.xlu2 %239 }
  0x72   : > { %v388_v13 = vpop.permute.xlu2 %387 }
  0x7a   : > { %v457_v39 = vpop.permute.xlu2 %456 }
  0x81   : > { %v244_v5 = vpop.permute.xlu0 %243  ;;  %v242_v6 = vpop.permute.xlu1 %241 }
  0x82   : > { %266 = vmatpush.bf16.msra.mxu0 %v244_v5  ;;  %703 = vmatpush.bf16.msra.mxu3 %v244_v5  ;;  %v472_v51 = vpop.permute.xlu2 %471 }
  0x86   : > { %267 = vmatpush.bf16.msra.mxu0 %v242_v6  ;;  %704 = vmatpush.bf16.msra.mxu3 %v242_v6 }
  0x89   : > { %v392_v9 = vpop.permute.xlu0 %391  ;;  %v390_v10 = vpop.permute.xlu1 %389 }
  0x8a   : > { %268 = vmatpush.bf16.msra.mxu0 %v240_v8  ;;  %705 = vmatpush.bf16.msra.mxu3 %v240_v8 }
  0x8b   : > { %711 = vmatpush.bf16.msra.mxu2 %v392_v9 }
  0x8f   : > { %712 = vmatpush.bf16.msra.mxu2 %v390_v10 }
  0x91   : > { %v238_v14 = vpop.permute.xlu0 %237  ;;  %v386_v17 = vpop.permute.xlu1 %385 }
  0x92   : > { %269 = vmatpush.bf16.msra.mxu0 %v238_v14  ;;  %706 = vmatpush.bf16.msra.mxu3 %v238_v14 }
  0x93   : > { %713 = vmatpush.bf16.msra.mxu2 %v388_v13 }
  0x95   : > { %631 = vmatmul.msk.bf16.vlgmr.msra.gmra.mxu0 %vm249_vm0, %v695_v15  ;;  %632 = vmatmul.msk.bf16.vlgmr.msra.gmra.mxu3 %vm249_vm0, %v696_v16 }
  0x96   : > { %331 = vmatpush.bf16.msrb.mxu0 %v690_v0 }
  0x97   : > { %714 = vmatpush.bf16.msra.mxu2 %v386_v17 }
  0x99   : > { %v467_v41 = vpop.permute.xlu1 %466  ;;  %v462_v5 = vpop.permute.xlu0 %461 }
  0x9a   : > { %332 = vmatpush.bf16.msrb.mxu0 %v689_v1  ;;  %680 = vmatmul.msk.bf16.vlgmr.msra.gmra.mxu2 %vm249_vm0, %v700_v19 }
  0x9d   : > { %v341_v33 = vpop.f32.mrf.mxu1 }
  0x9e   : > { %333 = vmatpush.bf16.msrb.mxu0 %v688_v2 }
  0xa1   : > { %v477_v60 = vpop.permute.xlu1 %476 }
  0xa2   : > { %334 = vmatpush.bf16.msrb.mxu0 %v687_v3 }
  0xa5   : > { %633 = vmatmul.msk.bf16.gmra.mxu3 %vm249_vm0, %v697_v24  ;;  %651 = vmatmul.msk.bf16.vlgmr.msrb.gmra.mxu0 %vm249_vm0, %v691_v25  ;;  %v343_v38 = vpop.f32.mrf.mxu1  ;;  %v487_v25 = vpop.permute.xlu0 %486 }
  0xa6   : > { %413 = vmatpush.bf16.msra.mxu0 %v392_v9 }
  0xaa   : > { %414 = vmatpush.bf16.msra.mxu0 %v390_v10  ;;  %681 = vmatmul.msk.bf16.gmra.mxu2 %vm249_vm0, %v701_v28  ;;  %v482_v10 = vpop.permute.xlu2 %481 }
  0xad   : > { %v346_v49 = vpop.f32.mrf.mxu1 }
  0xae   : > { %415 = vmatpush.bf16.msra.mxu0 %v388_v13 }
  0xb2   : > { %416 = vmatpush.bf16.msra.mxu0 %v386_v17 }
  0xb5   : > { %634 = vmatmul.msk.bf16.gmra.mxu3 %vm249_vm0, %v698_v30  ;;  %679 = vmatmul.msk.bf16.vlgmr.msra.gmra.mxu0 %vm249_vm0, %v699_v31  ;;  %v348_v62 = vpop.f32.mrf.mxu1 }
  0xba   : > { %682 = vmatmul.msk.bf16.gmra.mxu2 %vm249_vm0, %v702_v32 }
  0xbd   : > { %v351_v16 = vpop.f32.mrf.mxu1 }
  0xc5   : > { %v353_v32 = vpop.f32.mrf.mxu1 }
 0x112   : > { %v271_v34 = vpop.f32.mrf.mxu0 }
 0x118   : > { %v276_v35 = vpop.f32.mrf.mxu3 }
 0x119   : > { %v342_v36 = vadd.f32 %v341_v33, %v276_v35 }
 0x11a   : > { %v273_v37 = vpop.f32.mrf.mxu0 }
 0x11d   : > { %v423_v40 = vpop.f32.mrf.mxu2 }
 0x11e   : > { %v440_v42 = vadd.f32 %v423_v40, %v342_v36 }
 0x120   : > { %v496_v43 = vadd.f32 %v467_v41, %v440_v42  ;;  %v278_v44 = vpop.f32.mrf.mxu3 }
 0x121   : > { %v344_v48 = vadd.f32 %v343_v38, %v278_v44 }
 0x122   : > { %v504_v45 = vmax.f32 %v496_v43, 0.0  ;;  %v336_v46 = vpop.f32.mrf.mxu0 }
 0x123   : > { %v337_v1 = vadd.f32 %v336_v46, %v271_v34 }
 0x124   : > { %v512_v47 = vpack.c.bf16 %v504_v45, %v504_v45 }
 0x125   : > { %v425_v50 = vpop.f32.mrf.mxu2 }
 0x126   : > { %521 = vst.msk [vmem:[%s853_s11 + $0x8] sm:$0xf] %vm518_vm1, %v512_v47  ;;  %v441_v52 = vadd.f32 %v425_v50, %v344_v48 }
 0x128   : > { %v497_v53 = vadd.f32 %v472_v51, %v441_v52  ;;  %v281_v54 = vpop.f32.mrf.mxu3 }
 0x129   : > { %v347_v56 = vadd.f32 %v346_v49, %v281_v54 }
 0x12a   : > { %v505_v55 = vmax.f32 %v497_v53, 0.0  ;;  %v338_v57 = vpop.f32.mrf.mxu0 }
 0x12b   : > { %v339_v15 = vadd.f32 %v338_v57, %v273_v37  ;;  %v492_v37 = vpop.permute.xlu1 %491 }
 0x12c   : > { %v513_v58 = vpack.c.bf16 %v505_v55, %v505_v55 }
 0x12d   : > { %v428_v59 = vpop.f32.mrf.mxu2 }
 0x12e   : > { %522 = vst.msk [vmem:[%s853_s11 + $0xc] sm:$0xf] %vm518_vm1, %v513_v58  ;;  %v442_v61 = vadd.f32 %v428_v59, %v347_v56 }
 0x130   : > { %v498_v63 = vadd.f32 %v477_v60, %v442_v61  ;;  %v283_v0 = vpop.f32.mrf.mxu3 }
 0x131   : > { %v349_v7 = vadd.f32 %v348_v62, %v283_v0 }
 0x132   : > { %v506_v2 = vmax.f32 %v498_v63, 0.0  ;;  %v418_v3 = vpop.f32.mrf.mxu0 }
 0x133   : > { %v438_v4 = vadd.f32 %v418_v3, %v337_v1 }
 0x134   : > { %v514_v6 = vpack.c.bf16 %v506_v2, %v506_v2 }
 0x135   : > { %v494_v8 = vadd.f32 %v457_v39, %v438_v4  ;;  %v430_v9 = vpop.f32.mrf.mxu2 }
 0x136   : > { %523 = vst.msk [vmem:[%s853_s11 + $0x10] sm:$0xf] %vm518_vm1, %v514_v6  ;;  %v443_v11 = vadd.f32 %v430_v9, %v349_v7 }
 0x137   : > { %v502_v12 = vmax.f32 %v494_v8, 0.0 }
 0x138   : > { %v499_v13 = vadd.f32 %v482_v10, %v443_v11  ;;  %v286_v14 = vpop.f32.mrf.mxu3 }
 0x139   : > { %v510_v17 = vpack.c.bf16 %v502_v12, %v502_v12  ;;  %v352_v19 = vadd.f32 %v351_v16, %v286_v14 }
 0x13a   : > { %v507_v18 = vmax.f32 %v499_v13, 0.0  ;;  %v420_v20 = vpop.f32.mrf.mxu0 }
 0x13b   : > { %519 = vst.msk [vmem:[%s853_s11] sm:$0xf] %vm518_vm1, %v510_v17  ;;  %v439_v21 = vadd.f32 %v420_v20, %v339_v15 }
 0x13c   : > { %v515_v22 = vpack.c.bf16 %v507_v18, %v507_v18 }
 0x13d   : > { %v495_v23 = vadd.f32 %v462_v5, %v439_v21  ;;  %v433_v24 = vpop.f32.mrf.mxu2 }
 0x13e   : > { %524 = vst.msk [vmem:[%s853_s11 + $0x14] sm:$0xf] %vm518_vm1, %v515_v22  ;;  %v444_v26 = vadd.f32 %v433_v24, %v352_v19 }
 0x13f   : > { %v503_v27 = vmax.f32 %v495_v23, 0.0 }
 0x140   : > { %v500_v28 = vadd.f32 %v487_v25, %v444_v26  ;;  %v288_v30 = vpop.f32.mrf.mxu3 }
 0x141   : > { %v511_v29 = vpack.c.bf16 %v503_v27, %v503_v27  ;;  %v354_v34 = vadd.f32 %v353_v32, %v288_v30 }
 0x142   : > { %v508_v31 = vmax.f32 %v500_v28, 0.0 }
 0x143   : > { %520 = vst.msk [vmem:[%s853_s11 + $0x4] sm:$0xf] %vm518_vm1, %v511_v29 }
 0x144   : > { %v516_v33 = vpack.c.bf16 %v508_v31, %v508_v31 }
 0x145   : > { %v435_v35 = vpop.f32.mrf.mxu2 }
 0x146   : > { %525 = vst.msk [vmem:[%s853_s11 + $0x18] sm:$0xf] %vm518_vm1, %v516_v33  ;;  %v445_v36 = vadd.f32 %v435_v35, %v354_v34 }
 0x148   : > { %v501_v38 = vadd.f32 %v492_v37, %v445_v36 }
 0x14a   : > { %v509_v39 = vmax.f32 %v501_v38, 0.0 }
 0x14c   : > { %v517_v40 = vpack.c.bf16 %v509_v39, %v509_v39 }
 0x14e   : > { %526 = vst.msk [vmem:[%s853_s11 + $0x1c] sm:$0xf] %vm518_vm1, %v517_v40 }
 0x14f PF: > { %s13_s12 = sadd.s32 1, %s735_s12  }
 0x150   : > { %p10_p4 = scmp.ge.s32.totalorder %s13_s12, 4  }
 0x152   :  { %12 = sbr.rel (!%p10_p4) target bundleno = 1 (0x1), region = 64 }

// kernel: reg_convcnp_forward.25
= control target key start
LH: loop header
LB: loop body
LE: loop exit
PB: predicated region body
PF: predicated region fallthrough
CT: control target
= control target key end

     0   :  { %s760_s12 = smov 0   ;;  %s874_s0 = inlined_call_operand.vmem [shape: bf16[2,64,10], index: 0, kind: input, shape index: {}]   ;;  %s875_s1 = inlined_call_operand.vmem [shape: bf16[3,64,64], index: 1, kind: input, shape index: {}]   ;;  %s876_s2 = inlined_call_operand.vmem [shape: f32[64,1], index: 2, kind: input, shape index: {}]   ;;  %s877_s3 = inlined_call_operand.vmem [shape: bf16[2,64,8], index: 3, kind: output, shape index: {}]  }
   0x1 LB: > { %s582_s13 = sadd.s32 4294967295, %s735_s12   ;;  %p586_p0 = scmp.ge.s32.totalorder %s735_s12, 1  ;;  %s735_s12 = sphi %s760_s12, %s13_s12  }
   0x2   : > { %p137_p1 = scmp.lt.s32.totalorder %s735_s12, 3 }
   0x4   : > { %p138_p2 = pnand %p586_p0, %p137_p1 }
   0x5   : > { %p161_p3 = scmp.lt.s32.totalorder (!%p138_p2), %s582_s13, 1  ;;  %s737_s18 = smov (!%p138_p2), 127  }
   0x6   : > { %141 = sbr.rel (%p138_p2) target bundleno = 335 (0x14f), region = 32  ;;  %s738_s19 = smov (!%p138_p2), 126  }
   0xb   : > { %s879_s13 = smov (!%p161_p3, %s582_s13), 1  ;;  %vm249_vm0 = vcmask 523264   ;;  %v692_v4 = vld [vmem:[%s875_s1 + $0x8] sm:$0xff]  ;;  %v693_v7 = vld [vmem:[%s875_s1 + $0x10] sm:$0xff]  ;;  %v739_v12 = vmov 0   ;;  %v695_v15 = vld [vmem:[%s875_s1 + $0x20] sm:$0xff] }
   0xc   : > { %s685_s14 = sshll.u32 %s879_s13, 5  ;;  %v448_v11 = vld [vmem:[%s876_s2 + $0x10] sm:$0xff]  ;;  %728 = vset.pattern.permute.xlu1 %v739_v12  ;;  %727 = vset.pattern.permute.xlu0 %v739_v12  ;;  %v696_v16 = vld [vmem:[%s875_s1 + $0x28] sm:$0xff]  ;;  %v694_v18 = vld [vmem:[%s875_s1 + $0x18] sm:$0xff]  ;;  %vm518_vm1 = vcmask 60416  }
   0xd   : > { %s165_s17 = scalar_lea.vmem %s874_s0, %s685_s14  ;;  %726 = vset.pattern.permute.xlu2 %v739_v12  ;;  %v700_v19 = vld [vmem:[%s875_s1 + $0x48] sm:$0xff]  ;;  %v450_v20 = vld [vmem:[%s876_s2 + $0x20] sm:$0xff]  ;;  %v453_v23 = vld [vmem:[%s876_s2 + $0x38] sm:$0xff]  ;;  %s853_s11 = scalar_lea.vmem %s877_s3, %s685_s14 }
   0xe   : > { %v690_v0 = vld [vmem:[%s165_s17 + $0x18] sm:$0xff]  ;;  %v689_v1 = vld [vmem:[%s165_s17 + $0x10] sm:$0xff]  ;;  %v688_v2 = vld [vmem:[%s165_s17 + $0x8] sm:$0xff] }
   0xf   : > { %243 = vrot.lane.b32.xlu0 %v690_v0, %s737_s18  ;;  %241 = vrot.lane.b32.xlu1 %v689_v1, %s737_s18  ;;  %v687_v3 = vld [vmem:[%s165_s17] sm:$0xff]  ;;  %v447_v22 = vld [vmem:[%s876_s2 + $0x8] sm:$0xff] }
  0x10   : > { %239 = vrot.lane.b32.xlu2 %v688_v2, %s737_s18  ;;  %707 = vmatpush.bf16.msra.mxu1 %v690_v0  ;;  %v446_v21 = vld [vmem:[%s876_s2] sm:$0xff]  ;;  %v697_v24 = vld [vmem:[%s875_s1 + $0x30] sm:$0xff]  ;;  %v449_v26 = vld [vmem:[%s876_s2 + $0x18] sm:$0xff] }
  0x11   : > { %v691_v25 = vld [vmem:[%s875_s1] sm:$0xff]  ;;  %v452_v27 = vld [vmem:[%s876_s2 + $0x30] sm:$0xff]  ;;  %v451_v29 = vld [vmem:[%s876_s2 + $0x28] sm:$0xff] }
  0x12   : > { %v701_v28 = vld [vmem:[%s875_s1 + $0x50] sm:$0xff]  ;;  %v698_v30 = vld [vmem:[%s875_s1 + $0x38] sm:$0xff]  ;;  %v699_v31 = vld [vmem:[%s875_s1 + $0x40] sm:$0xff] }
  0x13   : > { %v702_v32 = vld [vmem:[%s875_s1 + $0x58] sm:$0xff] }
  0x14   : > { %708 = vmatpush.bf16.msra.mxu1 %v689_v1 }
  0x17   : > { %391 = vrot.lane.b32.xlu0 %v690_v0, %s738_s19  ;;  %389 = vrot.lane.b32.xlu1 %v689_v1, %s738_s19 }
  0x18   : > { %387 = vrot.lane.b32.xlu2 %v688_v2, %s738_s19  ;;  %709 = vmatpush.bf16.msra.mxu1 %v688_v2 }
  0x1c   : > { %710 = vmatpush.bf16.msra.mxu1 %v687_v3 }
  0x1f   : > { %237 = vrot.lane.b32.xlu0 %v687_v3, %s737_s18  ;;  %385 = vrot.lane.b32.xlu1 %v687_v3, %s738_s19 }
  0x20   : > { %652 = vmatmul.msk.bf16.vlgmr.msra.gmra.mxu1 %vm249_vm0, %v692_v4  ;;  %456 = vperm.xlu2 %726, %v446_v21  }
  0x27   : > { %466 = vperm.xlu1 %728, %v448_v11   ;;  %461 = vperm.xlu0 %727, %v447_v22  }
  0x28   : > { %471 = vperm.xlu2 %726, %v449_v26  }
  0x2f   : > { %476 = vperm.xlu1 %728, %v450_v20   ;;  %486 = vperm.xlu0 %727, %v452_v27  }
  0x30   : > { %653 = vmatmul.msk.bf16.gmra.mxu1 %vm249_vm0, %v693_v7  ;;  %481 = vperm.xlu2 %726, %v451_v29  }
  0x37   : > { %491 = vperm.xlu1 %728, %v453_v23  }
  0x40   : > { %654 = vmatmul.msk.bf16.gmra.mxu1 %vm249_vm0, %v694_v18 }
  0x6a   : > { %v240_v8 = vpop.permute.xlu2 %239 }
  0x72   : > { %v388_v13 = vpop.permute.xlu2 %387 }
  0x7a   : > { %v457_v39 = vpop.permute.xlu2 %456 }
  0x81   : > { %v244_v5 = vpop.permute.xlu0 %243  ;;  %v242_v6 = vpop.permute.xlu1 %241 }
  0x82   : > { %266 = vmatpush.bf16.msra.mxu0 %v244_v5  ;;  %703 = vmatpush.bf16.msra.mxu3 %v244_v5  ;;  %v472_v51 = vpop.permute.xlu2 %471 }
  0x86   : > { %267 = vmatpush.bf16.msra.mxu0 %v242_v6  ;;  %704 = vmatpush.bf16.msra.mxu3 %v242_v6 }
  0x89   : > { %v392_v9 = vpop.permute.xlu0 %391  ;;  %v390_v10 = vpop.permute.xlu1 %389 }
  0x8a   : > { %268 = vmatpush.bf16.msra.mxu0 %v240_v8  ;;  %705 = vmatpush.bf16.msra.mxu3 %v240_v8 }
  0x8b   : > { %711 = vmatpush.bf16.msra.mxu2 %v392_v9 }
  0x8f   : > { %712 = vmatpush.bf16.msra.mxu2 %v390_v10 }
  0x91   : > { %v238_v14 = vpop.permute.xlu0 %237  ;;  %v386_v17 = vpop.permute.xlu1 %385 }
  0x92   : > { %269 = vmatpush.bf16.msra.mxu0 %v238_v14  ;;  %706 = vmatpush.bf16.msra.mxu3 %v238_v14 }
  0x93   : > { %713 = vmatpush.bf16.msra.mxu2 %v388_v13 }
  0x95   : > { %631 = vmatmul.msk.bf16.vlgmr.msra.gmra.mxu0 %vm249_vm0, %v695_v15  ;;  %632 = vmatmul.msk.bf16.vlgmr.msra.gmra.mxu3 %vm249_vm0, %v696_v16 }
  0x96   : > { %331 = vmatpush.bf16.msrb.mxu0 %v690_v0 }
  0x97   : > { %714 = vmatpush.bf16.msra.mxu2 %v386_v17 }
  0x99   : > { %v467_v41 = vpop.permute.xlu1 %466  ;;  %v462_v5 = vpop.permute.xlu0 %461 }
  0x9a   : > { %332 = vmatpush.bf16.msrb.mxu0 %v689_v1  ;;  %680 = vmatmul.msk.bf16.vlgmr.msra.gmra.mxu2 %vm249_vm0, %v700_v19 }
  0x9d   : > { %v341_v33 = vpop.f32.mrf.mxu1 }
  0x9e   : > { %333 = vmatpush.bf16.msrb.mxu0 %v688_v2 }
  0xa1   : > { %v477_v60 = vpop.permute.xlu1 %476 }
  0xa2   : > { %334 = vmatpush.bf16.msrb.mxu0 %v687_v3 }
  0xa5   : > { %633 = vmatmul.msk.bf16.gmra.mxu3 %vm249_vm0, %v697_v24  ;;  %651 = vmatmul.msk.bf16.vlgmr.msrb.gmra.mxu0 %vm249_vm0, %v691_v25  ;;  %v343_v38 = vpop.f32.mrf.mxu1  ;;  %v487_v25 = vpop.permute.xlu0 %486 }
  0xa6   : > { %413 = vmatpush.bf16.msra.mxu0 %v392_v9 }
  0xaa   : > { %414 = vmatpush.bf16.msra.mxu0 %v390_v10  ;;  %681 = vmatmul.msk.bf16.gmra.mxu2 %vm249_vm0, %v701_v28  ;;  %v482_v10 = vpop.permute.xlu2 %481 }
  0xad   : > { %v346_v49 = vpop.f32.mrf.mxu1 }
  0xae   : > { %415 = vmatpush.bf16.msra.mxu0 %v388_v13 }
  0xb2   : > { %416 = vmatpush.bf16.msra.mxu0 %v386_v17 }
  0xb5   : > { %634 = vmatmul.msk.bf16.gmra.mxu3 %vm249_vm0, %v698_v30  ;;  %679 = vmatmul.msk.bf16.vlgmr.msra.gmra.mxu0 %vm249_vm0, %v699_v31  ;;  %v348_v62 = vpop.f32.mrf.mxu1 }
  0xba   : > { %682 = vmatmul.msk.bf16.gmra.mxu2 %vm249_vm0, %v702_v32 }
  0xbd   : > { %v351_v16 = vpop.f32.mrf.mxu1 }
  0xc5   : > { %v353_v32 = vpop.f32.mrf.mxu1 }
 0x112   : > { %v271_v34 = vpop.f32.mrf.mxu0 }
 0x118   : > { %v276_v35 = vpop.f32.mrf.mxu3 }
 0x119   : > { %v342_v36 = vadd.f32 %v341_v33, %v276_v35 }
 0x11a   : > { %v273_v37 = vpop.f32.mrf.mxu0 }
 0x11d   : > { %v423_v40 = vpop.f32.mrf.mxu2 }
 0x11e   : > { %v440_v42 = vadd.f32 %v423_v40, %v342_v36 }
 0x120   : > { %v496_v43 = vadd.f32 %v467_v41, %v440_v42  ;;  %v278_v44 = vpop.f32.mrf.mxu3 }
 0x121   : > { %v344_v48 = vadd.f32 %v343_v38, %v278_v44 }
 0x122   : > { %v504_v45 = vmax.f32 %v496_v43, 0.0  ;;  %v336_v46 = vpop.f32.mrf.mxu0 }
 0x123   : > { %v337_v1 = vadd.f32 %v336_v46, %v271_v34 }
 0x124   : > { %v512_v47 = vpack.c.bf16 %v504_v45, %v504_v45 }
 0x125   : > { %v425_v50 = vpop.f32.mrf.mxu2 }
 0x126   : > { %521 = vst.msk [vmem:[%s853_s11 + $0x8] sm:$0xf] %vm518_vm1, %v512_v47  ;;  %v441_v52 = vadd.f32 %v425_v50, %v344_v48 }
 0x128   : > { %v497_v53 = vadd.f32 %v472_v51, %v441_v52  ;;  %v281_v54 = vpop.f32.mrf.mxu3 }
 0x129   : > { %v347_v56 = vadd.f32 %v346_v49, %v281_v54 }
 0x12a   : > { %v505_v55 = vmax.f32 %v497_v53, 0.0  ;;  %v338_v57 = vpop.f32.mrf.mxu0 }
 0x12b   : > { %v339_v15 = vadd.f32 %v338_v57, %v273_v37  ;;  %v492_v37 = vpop.permute.xlu1 %491 }
 0x12c   : > { %v513_v58 = vpack.c.bf16 %v505_v55, %v505_v55 }
 0x12d   : > { %v428_v59 = vpop.f32.mrf.mxu2 }
 0x12e   : > { %522 = vst.msk [vmem:[%s853_s11 + $0xc] sm:$0xf] %vm518_vm1, %v513_v58  ;;  %v442_v61 = vadd.f32 %v428_v59, %v347_v56 }
 0x130   : > { %v498_v63 = vadd.f32 %v477_v60, %v442_v61  ;;  %v283_v0 = vpop.f32.mrf.mxu3 }
 0x131   : > { %v349_v7 = vadd.f32 %v348_v62, %v283_v0 }
 0x132   : > { %v506_v2 = vmax.f32 %v498_v63, 0.0  ;;  %v418_v3 = vpop.f32.mrf.mxu0 }
 0x133   : > { %v438_v4 = vadd.f32 %v418_v3, %v337_v1 }
 0x134   : > { %v514_v6 = vpack.c.bf16 %v506_v2, %v506_v2 }
 0x135   : > { %v494_v8 = vadd.f32 %v457_v39, %v438_v4  ;;  %v430_v9 = vpop.f32.mrf.mxu2 }
 0x136   : > { %523 = vst.msk [vmem:[%s853_s11 + $0x10] sm:$0xf] %vm518_vm1, %v514_v6  ;;  %v443_v11 = vadd.f32 %v430_v9, %v349_v7 }
 0x137   : > { %v502_v12 = vmax.f32 %v494_v8, 0.0 }
 0x138   : > { %v499_v13 = vadd.f32 %v482_v10, %v443_v11  ;;  %v286_v14 = vpop.f32.mrf.mxu3 }
 0x139   : > { %v510_v17 = vpack.c.bf16 %v502_v12, %v502_v12  ;;  %v352_v19 = vadd.f32 %v351_v16, %v286_v14 }
 0x13a   : > { %v507_v18 = vmax.f32 %v499_v13, 0.0  ;;  %v420_v20 = vpop.f32.mrf.mxu0 }
 0x13b   : > { %519 = vst.msk [vmem:[%s853_s11] sm:$0xf] %vm518_vm1, %v510_v17  ;;  %v439_v21 = vadd.f32 %v420_v20, %v339_v15 }
 0x13c   : > { %v515_v22 = vpack.c.bf16 %v507_v18, %v507_v18 }
 0x13d   : > { %v495_v23 = vadd.f32 %v462_v5, %v439_v21  ;;  %v433_v24 = vpop.f32.mrf.mxu2 }
 0x13e   : > { %524 = vst.msk [vmem:[%s853_s11 + $0x14] sm:$0xf] %vm518_vm1, %v515_v22  ;;  %v444_v26 = vadd.f32 %v433_v24, %v352_v19 }
 0x13f   : > { %v503_v27 = vmax.f32 %v495_v23, 0.0 }
 0x140   : > { %v500_v28 = vadd.f32 %v487_v25, %v444_v26  ;;  %v288_v30 = vpop.f32.mrf.mxu3 }
 0x141   : > { %v511_v29 = vpack.c.bf16 %v503_v27, %v503_v27  ;;  %v354_v34 = vadd.f32 %v353_v32, %v288_v30 }
 0x142   : > { %v508_v31 = vmax.f32 %v500_v28, 0.0 }
 0x143   : > { %520 = vst.msk [vmem:[%s853_s11 + $0x4] sm:$0xf] %vm518_vm1, %v511_v29 }
 0x144   : > { %v516_v33 = vpack.c.bf16 %v508_v31, %v508_v31 }
 0x145   : > { %v435_v35 = vpop.f32.mrf.mxu2 }
 0x146   : > { %525 = vst.msk [vmem:[%s853_s11 + $0x18] sm:$0xf] %vm518_vm1, %v516_v33  ;;  %v445_v36 = vadd.f32 %v435_v35, %v354_v34 }
 0x148   : > { %v501_v38 = vadd.f32 %v492_v37, %v445_v36 }
 0x14a   : > { %v509_v39 = vmax.f32 %v501_v38, 0.0 }
 0x14c   : > { %v517_v40 = vpack.c.bf16 %v509_v39, %v509_v39 }
 0x14e   : > { %526 = vst.msk [vmem:[%s853_s11 + $0x1c] sm:$0xf] %vm518_vm1, %v517_v40 }
 0x14f PF: > { %s13_s12 = sadd.s32 1, %s735_s12  }
 0x150   : > { %p10_p4 = scmp.ge.s32.totalorder %s13_s12, 4  }
 0x152   :  { %12 = sbr.rel (!%p10_p4) target bundleno = 1 (0x1), region = 64 }

// kernel: reg_convcnp_forward.26
= control target key start
LH: loop header
LB: loop body
LE: loop exit
PB: predicated region body
PF: predicated region fallthrough
CT: control target
= control target key end

     0   :  { %s574_s12 = smov 0   ;;  %s641_s0 = inlined_call_operand.vmem [shape: bf16[2,64,18], index: 0, kind: input, shape index: {}]   ;;  %s642_s1 = inlined_call_operand.vmem [shape: bf16[3,32,64], index: 1, kind: input, shape index: {}]   ;;  %s643_s2 = inlined_call_operand.vmem [shape: f32[32,1], index: 2, kind: input, shape index: {}]   ;;  %s644_s3 = inlined_call_operand.vmem [shape: bf16[2,32,16], index: 3, kind: output, shape index: {}]  }
   0x1 LB: > { %s448_s13 = sadd.s32 4294967295, %s549_s12   ;;  %p452_p0 = scmp.ge.s32.totalorder %s549_s12, 1  ;;  %s549_s12 = sphi %s574_s12, %s13_s12  }
   0x2   : > { %p137_p1 = scmp.lt.s32.totalorder %s549_s12, 3 }
   0x4   : > { %p138_p2 = pnand %p452_p0, %p137_p1 }
   0x5   : > { %p161_p3 = scmp.lt.s32.totalorder (!%p138_p2), %s448_s13, 1  ;;  %s551_s18 = smov (!%p138_p2), 126  }
   0x6   : > { %141 = sbr.rel (%p138_p2) target bundleno = 314 (0x13a), region = 32  ;;  %s552_s19 = smov (!%p138_p2), 127  }
   0xb   : > { %s646_s13 = smov (!%p161_p3, %s448_s13), 1  ;;  %v519_v5 = vld [vmem:[%s642_s1] sm:$0xff]  ;;  %vm231_vm0 = vcmask 523264   ;;  %v520_v7 = vld [vmem:[%s642_s1 + $0x8] sm:$0xff]  ;;  %v354_v11 = vld [vmem:[%s643_s2 + $0x10] sm:$0xff]  ;;  %v553_v12 = vmov 0  }
   0xc   : > { %s513_s14 = sshll.u32 %s646_s13, 5  ;;  %v353_v10 = vld [vmem:[%s643_s2 + $0x8] sm:$0xff]  ;;  %541 = vset.pattern.permute.xlu0 %v553_v12  ;;  %542 = vset.pattern.permute.xlu1 %v553_v12  ;;  %v352_v13 = vld [vmem:[%s643_s2] sm:$0xff]  ;;  %v355_v16 = vld [vmem:[%s643_s2 + $0x18] sm:$0xff]  ;;  %s514_s15 = sshll.u32 %s646_s13, 4  ;;  %vm388_vm1 = vcmask 125952  }
   0xd   : > { %s165_s17 = scalar_lea.vmem %s641_s0, %s513_s14  ;;  %540 = vset.pattern.permute.xlu2 %v553_v12  ;;  %v523_v18 = vld [vmem:[%s642_s1 + $0x20] sm:$0xff]  ;;  %v521_v20 = vld [vmem:[%s642_s1 + $0x10] sm:$0xff]  ;;  %v522_v21 = vld [vmem:[%s642_s1 + $0x18] sm:$0xff] }
   0xe   : > { %v518_v0 = vld [vmem:[%s165_s17 + $0x18] sm:$0xff]  ;;  %v516_v1 = vld [vmem:[%s165_s17 + $0x8] sm:$0xff]  ;;  %v517_v2 = vld [vmem:[%s165_s17 + $0x10] sm:$0xff] }
   0xf   : > { %317 = vrot.lane.b32.xlu0 %v518_v0, %s551_s18  ;;  %313 = vrot.lane.b32.xlu1 %v516_v1, %s551_s18  ;;  %v515_v3 = vld [vmem:[%s165_s17] sm:$0xff]  ;;  %v524_v22 = vld [vmem:[%s642_s1 + $0x28] sm:$0xff] }
  0x10   : > { %225 = vrot.lane.b32.xlu2 %v518_v0, %s552_s19  ;;  %281 = vmatpush.bf16.msra.mxu1 %v518_v0 }
  0x14   : > { %282 = vmatpush.bf16.msra.mxu1 %v517_v2 }
  0x17   : > { %315 = vrot.lane.b32.xlu0 %v517_v2, %s551_s18  ;;  %311 = vrot.lane.b32.xlu1 %v515_v3, %s551_s18  ;;  %s628_s18 = scalar_lea.vmem %s644_s3, %s514_s15 }
  0x18   : > { %223 = vrot.lane.b32.xlu2 %v517_v2, %s552_s19  ;;  %283 = vmatpush.bf16.msra.mxu1 %v516_v1 }
  0x1c   : > { %284 = vmatpush.bf16.msra.mxu1 %v515_v3 }
  0x1f   : > { %221 = vrot.lane.b32.xlu0 %v516_v1, %s552_s19  ;;  %219 = vrot.lane.b32.xlu1 %v515_v3, %s552_s19 }
  0x20   : > { %495 = vmatmul.msk.bf16.vlgmr.msra.gmra.mxu1 %vm231_vm0, %v519_v5  ;;  %358 = vperm.xlu2 %540, %v352_v13  }
  0x27   : > { %363 = vperm.xlu0 %541, %v353_v10   ;;  %368 = vperm.xlu1 %542, %v354_v11  }
  0x28   : > { %373 = vperm.xlu2 %540, %v355_v16  }
  0x30   : > { %496 = vmatmul.msk.bf16.gmra.mxu1 %vm231_vm0, %v520_v7 }
  0x6a   : > { %v226_v4 = vpop.permute.xlu2 %225 }
  0x6b   : > { %242 = vmatpush.bf16.msra.mxu0 %v226_v4  ;;  %525 = vmatpush.bf16.msra.mxu3 %v226_v4 }
  0x72   : > { %v224_v6 = vpop.permute.xlu2 %223 }
  0x73   : > { %243 = vmatpush.bf16.msra.mxu0 %v224_v6  ;;  %526 = vmatpush.bf16.msra.mxu3 %v224_v6 }
  0x7a   : > { %v359_v28 = vpop.permute.xlu2 %358 }
  0x81   : > { %v318_v8 = vpop.permute.xlu0 %317  ;;  %v314_v9 = vpop.permute.xlu1 %313 }
  0x82   : > { %333 = vmatpush.bf16.msra.mxu2 %v318_v8  ;;  %v374_v55 = vpop.permute.xlu2 %373 }
  0x89   : > { %v316_v14 = vpop.permute.xlu0 %315  ;;  %v312_v15 = vpop.permute.xlu1 %311 }
  0x8a   : > { %334 = vmatpush.bf16.msra.mxu2 %v316_v14 }
  0x8e   : > { %335 = vmatpush.bf16.msra.mxu2 %v314_v9 }
  0x91   : > { %v222_v17 = vpop.permute.xlu0 %221  ;;  %v220_v19 = vpop.permute.xlu1 %219 }
  0x92   : > { %244 = vmatpush.bf16.msra.mxu0 %v222_v17  ;;  %336 = vmatpush.bf16.msra.mxu2 %v312_v15 }
  0x93   : > { %527 = vmatpush.bf16.msra.mxu3 %v222_v17 }
  0x95   : > { %509 = vmatmul.msk.bf16.vlgmr.msra.gmra.mxu2 %vm231_vm0, %v523_v18 }
  0x96   : > { %245 = vmatpush.bf16.msra.mxu0 %v220_v19 }
  0x97   : > { %528 = vmatpush.bf16.msra.mxu3 %v220_v19 }
  0x99   : > { %485 = vmatmul.msk.bf16.vlgmr.msra.gmra.mxu0 %vm231_vm0, %v521_v20  ;;  %v364_v36 = vpop.permute.xlu0 %363  ;;  %v369_v45 = vpop.permute.xlu1 %368 }
  0x9a   : > { %486 = vmatmul.msk.bf16.vlgmr.msra.gmra.mxu3 %vm231_vm0, %v522_v21 }
  0x9d   : > { %v286_v23 = vpop.f32.mrf.mxu1 }
  0xa5   : > { %510 = vmatmul.msk.bf16.gmra.mxu2 %vm231_vm0, %v524_v22  ;;  %v288_v26 = vpop.f32.mrf.mxu1 }
  0xad   : > { %v291_v39 = vpop.f32.mrf.mxu1 }
  0xb5   : > { %v293_v49 = vpop.f32.mrf.mxu1 }
 0x116   : > { %v247_v24 = vpop.f32.mrf.mxu0 }
 0x117   : > { %v287_v25 = vadd.f32 %v286_v23, %v247_v24 }
 0x118   : > { %v338_v27 = vpop.f32.mrf.mxu2 }
 0x119   : > { %v348_v29 = vadd.f32 %v338_v27, %v287_v25 }
 0x11b   : > { %v376_v30 = vadd.f32 %v359_v28, %v348_v29 }
 0x11d   : > { %v380_v31 = vmax.f32 %v376_v30, 0.0  ;;  %v252_v38 = vpop.f32.mrf.mxu3 }
 0x11e   : > { %v249_v32 = vpop.f32.mrf.mxu0  ;;  %v292_v41 = vadd.f32 %v291_v39, %v252_v38 }
 0x11f   : > { %v384_v33 = vpack.c.bf16 %v380_v31, %v380_v31  ;;  %v289_v34 = vadd.f32 %v288_v26, %v249_v32 }
 0x120   : > { %v340_v35 = vpop.f32.mrf.mxu2 }
 0x121   : > { %389 = vst.msk [vmem:[%s628_s18] sm:$0xf] %vm388_vm1, %v384_v33  ;;  %v349_v37 = vadd.f32 %v340_v35, %v289_v34 }
 0x123   : > { %v377_v40 = vadd.f32 %v364_v36, %v349_v37 }
 0x125   : > { %v381_v42 = vmax.f32 %v377_v40, 0.0  ;;  %v254_v48 = vpop.f32.mrf.mxu3 }
 0x126   : > { %v294_v51 = vadd.f32 %v293_v49, %v254_v48 }
 0x127   : > { %v385_v43 = vpack.c.bf16 %v381_v42, %v381_v42 }
 0x128   : > { %v343_v44 = vpop.f32.mrf.mxu2 }
 0x129   : > { %390 = vst.msk [vmem:[%s628_s18 + $0x4] sm:$0xf] %vm388_vm1, %v385_v43  ;;  %v350_v46 = vadd.f32 %v343_v44, %v292_v41 }
 0x12b   : > { %v378_v47 = vadd.f32 %v369_v45, %v350_v46 }
 0x12d   : > { %v382_v50 = vmax.f32 %v378_v47, 0.0 }
 0x12f   : > { %v386_v52 = vpack.c.bf16 %v382_v50, %v382_v50 }
 0x130   : > { %v345_v53 = vpop.f32.mrf.mxu2 }
 0x131   : > { %391 = vst.msk [vmem:[%s628_s18 + $0x8] sm:$0xf] %vm388_vm1, %v386_v52  ;;  %v351_v54 = vadd.f32 %v345_v53, %v294_v51 }
 0x133   : > { %v379_v56 = vadd.f32 %v374_v55, %v351_v54 }
 0x135   : > { %v383_v57 = vmax.f32 %v379_v56, 0.0 }
 0x137   : > { %v387_v58 = vpack.c.bf16 %v383_v57, %v383_v57 }
 0x139   : > { %392 = vst.msk [vmem:[%s628_s18 + $0xc] sm:$0xf] %vm388_vm1, %v387_v58 }
 0x13a PF: > { %s13_s12 = sadd.s32 1, %s549_s12  }
 0x13b   : > { %p10_p4 = scmp.ge.s32.totalorder %s13_s12, 4  }
 0x13d   :  { %12 = sbr.rel (!%p10_p4) target bundleno = 1 (0x1), region = 64 }

// kernel: reg_convcnp_forward.27
= control target key start
LH: loop header
LB: loop body
LE: loop exit
PB: predicated region body
PF: predicated region fallthrough
CT: control target
= control target key end

     0   :  { %s534_s12 = smov 0   ;;  %s598_s0 = inlined_call_operand.vmem [shape: bf16[2,32,34], index: 0, kind: input, shape index: {}]   ;;  %s599_s1 = inlined_call_operand.vmem [shape: bf16[3,32,32], index: 1, kind: input, shape index: {}]   ;;  %s600_s2 = inlined_call_operand.vmem [shape: f32[32,1], index: 2, kind: input, shape index: {}]   ;;  %s601_s3 = inlined_call_operand.vmem [shape: bf16[2,32,32], index: 3, kind: output, shape index: {}]  }
   0x1 LB: > { %s420_s13 = sadd.s32 4294967295, %s509_s12   ;;  %p424_p0 = scmp.ge.s32.totalorder %s509_s12, 1  ;;  %s509_s12 = sphi %s534_s12, %s13_s12  }
   0x2   : > { %p137_p1 = scmp.lt.s32.totalorder %s509_s12, 3 }
   0x4   : > { %p138_p2 = pnand %p424_p0, %p137_p1 }
   0x5   : > { %p161_p3 = scmp.lt.s32.totalorder (!%p138_p2), %s420_s13, 1  ;;  %s511_s18 = smov (!%p138_p2), 127  }
   0x6   : > { %141 = sbr.rel (%p138_p2) target bundleno = 306 (0x132), region = 32  ;;  %s512_s19 = smov (!%p138_p2), 126  }
   0xb   : > { %s603_s13 = smov (!%p161_p3, %s420_s13), 1  ;;  %v481_v2 = vld [vmem:[%s599_s1] sm:$0xff]  ;;  %vm211_vm0 = vcmask 261120   ;;  %v482_v3 = vld [vmem:[%s599_s1 + $0x8] sm:$0xff]  ;;  %v326_v4 = vld [vmem:[%s600_s2 + $0x10] sm:$0xff]  ;;  %v513_v7 = vmov 0  }
   0xc   : > { %s477_s14 = sshll.u32 %s603_s13, 4  ;;  %v324_v5 = vld [vmem:[%s600_s2] sm:$0xff]  ;;  %v327_v6 = vld [vmem:[%s600_s2 + $0x18] sm:$0xff]  ;;  %501 = vset.pattern.permute.xlu0 %v513_v7  ;;  %502 = vset.pattern.permute.xlu1 %v513_v7  ;;  %v325_v10 = vld [vmem:[%s600_s2 + $0x8] sm:$0xff]  ;;  %vm360_vm1 = vcmask 257024  }
   0xd   : > { %s165_s17 = scalar_lea.vmem %s598_s0, %s477_s14  ;;  %500 = vset.pattern.permute.xlu2 %v513_v7  ;;  %v483_v13 = vld [vmem:[%s599_s1 + $0x10] sm:$0xff]  ;;  %v485_v14 = vld [vmem:[%s599_s1 + $0x20] sm:$0xff]  ;;  %v484_v15 = vld [vmem:[%s599_s1 + $0x18] sm:$0xff] }
   0xe   : > { %v480_v0 = vld [vmem:[%s165_s17 + $0x8] sm:$0xff]  ;;  %v479_v1 = vld [vmem:[%s165_s17] sm:$0xff]  ;;  %330 = vperm.xlu2 %500, %v324_v5  }
   0xf   : > { %207 = vrot.lane.b32.xlu1 %v480_v0, %s511_s18  ;;  %291 = vrot.lane.b32.xlu0 %v480_v0, %s512_s19  ;;  %v486_v16 = vld [vmem:[%s599_s1 + $0x28] sm:$0xff] }
  0x10   : > { %261 = vmatpush.bf16.msra.mxu1 %v480_v0 }
  0x14   : > { %262 = vmatpush.bf16.msra.mxu1 %v479_v1 }
  0x16   : > { %335 = vperm.xlu2 %500, %v325_v10  }
  0x17   : > { %205 = vrot.lane.b32.xlu1 %v479_v1, %s511_s18  ;;  %289 = vrot.lane.b32.xlu0 %v479_v1, %s512_s19  ;;  %s170_s18 = scalar_lea.vmem %s601_s3, %s477_s14 }
  0x18   : > { %459 = vmatmul.msk.bf16.vlgmr.msra.gmra.mxu1 %vm211_vm0, %v481_v2 }
  0x1f   : > { %340 = vperm.xlu0 %501, %v326_v4   ;;  %345 = vperm.xlu1 %502, %v327_v6  }
  0x28   : > { %460 = vmatmul.msk.bf16.gmra.mxu1 %vm211_vm0, %v482_v3 }
  0x68   : > { %v331_v20 = vpop.permute.xlu2 %330 }
  0x70   : > { %v336_v30 = vpop.permute.xlu2 %335 }
  0x81   : > { %v208_v8 = vpop.permute.xlu1 %207  ;;  %v292_v9 = vpop.permute.xlu0 %291 }
  0x82   : > { %307 = vmatpush.bf16.msra.mxu2 %v292_v9  ;;  %224 = vmatpush.bf16.msra.mxu0 %v208_v8 }
  0x83   : > { %487 = vmatpush.bf16.msra.mxu3 %v208_v8 }
  0x89   : > { %v206_v11 = vpop.permute.xlu1 %205  ;;  %v290_v12 = vpop.permute.xlu0 %289 }
  0x8a   : > { %225 = vmatpush.bf16.msra.mxu0 %v206_v11  ;;  %308 = vmatpush.bf16.msra.mxu2 %v290_v12 }
  0x8b   : > { %488 = vmatpush.bf16.msra.mxu3 %v206_v11 }
  0x8d   : > { %449 = vmatmul.msk.bf16.vlgmr.msra.gmra.mxu0 %vm211_vm0, %v483_v13  ;;  %473 = vmatmul.msk.bf16.vlgmr.msra.gmra.mxu2 %vm211_vm0, %v485_v14 }
  0x8e   : > { %450 = vmatmul.msk.bf16.vlgmr.msra.gmra.mxu3 %vm211_vm0, %v484_v15 }
  0x91   : > { %v341_v39 = vpop.permute.xlu0 %340  ;;  %v346_v48 = vpop.permute.xlu1 %345 }
  0x95   : > { %v264_v17 = vpop.f32.mrf.mxu1 }
  0x9d   : > { %474 = vmatmul.msk.bf16.gmra.mxu2 %vm211_vm0, %v486_v16  ;;  %v266_v21 = vpop.f32.mrf.mxu1 }
  0xa5   : > { %v269_v33 = vpop.f32.mrf.mxu1 }
  0xad   : > { %v271_v43 = vpop.f32.mrf.mxu1 }
 0x10a   : > { %v227_v18 = vpop.f32.mrf.mxu0 }
 0x10b   : > { %v265_v19 = vadd.f32 %v264_v17, %v227_v18 }
 0x110   : > { %v310_v22 = vpop.f32.mrf.mxu2 }
 0x111   : > { %v320_v23 = vadd.f32 %v310_v22, %v265_v19  ;;  %v232_v32 = vpop.f32.mrf.mxu3 }
 0x112   : > { %v229_v25 = vpop.f32.mrf.mxu0  ;;  %v270_v35 = vadd.f32 %v269_v33, %v232_v32 }
 0x113   : > { %v348_v24 = vadd.f32 %v331_v20, %v320_v23  ;;  %v267_v28 = vadd.f32 %v266_v21, %v229_v25 }
 0x115   : > { %v352_v26 = vmax.f32 %v348_v24, 0.0 }
 0x117   : > { %v356_v27 = vpack.c.bf16 %v352_v26, %v352_v26 }
 0x118   : > { %v312_v29 = vpop.f32.mrf.mxu2 }
 0x119   : > { %361 = vst.msk [vmem:[%s170_s18] sm:$0xf] %vm360_vm1, %v356_v27  ;;  %v321_v31 = vadd.f32 %v312_v29, %v267_v28  ;;  %v234_v42 = vpop.f32.mrf.mxu3 }
 0x11a   : > { %v272_v45 = vadd.f32 %v271_v43, %v234_v42 }
 0x11b   : > { %v349_v34 = vadd.f32 %v336_v30, %v321_v31 }
 0x11d   : > { %v353_v36 = vmax.f32 %v349_v34, 0.0 }
 0x11f   : > { %v357_v37 = vpack.c.bf16 %v353_v36, %v353_v36 }
 0x120   : > { %v315_v38 = vpop.f32.mrf.mxu2 }
 0x121   : > { %362 = vst.msk [vmem:[%s170_s18 + $0x4] sm:$0xf] %vm360_vm1, %v357_v37  ;;  %v322_v40 = vadd.f32 %v315_v38, %v270_v35 }
 0x123   : > { %v350_v41 = vadd.f32 %v341_v39, %v322_v40 }
 0x125   : > { %v354_v44 = vmax.f32 %v350_v41, 0.0 }
 0x127   : > { %v358_v46 = vpack.c.bf16 %v354_v44, %v354_v44 }
 0x128   : > { %v317_v47 = vpop.f32.mrf.mxu2 }
 0x129   : > { %363 = vst.msk [vmem:[%s170_s18 + $0x8] sm:$0xf] %vm360_vm1, %v358_v46  ;;  %v323_v49 = vadd.f32 %v317_v47, %v272_v45 }
 0x12b   : > { %v351_v50 = vadd.f32 %v346_v48, %v323_v49 }
 0x12d   : > { %v355_v51 = vmax.f32 %v351_v50, 0.0 }
 0x12f   : > { %v359_v52 = vpack.c.bf16 %v355_v51, %v355_v51 }
 0x131   : > { %364 = vst.msk [vmem:[%s170_s18 + $0xc] sm:$0xf] %vm360_vm1, %v359_v52 }
 0x132 PF: > { %s13_s12 = sadd.s32 1, %s509_s12  }
 0x133   : > { %p10_p4 = scmp.ge.s32.totalorder %s13_s12, 4  }
 0x135   :  { %12 = sbr.rel (!%p10_p4) target bundleno = 1 (0x1), region = 64 }

// kernel: reg_convcnp_forward.28
= control target key start
LH: loop header
LB: loop body
LE: loop exit
PB: predicated region body
PF: predicated region fallthrough
CT: control target
= control target key end

     0   :  { %s442_s12 = smov 0   ;;  %s481_s0 = inlined_call_operand.vmem [shape: bf16[2,32,66], index: 0, kind: input, shape index: {}]   ;;  %s482_s1 = inlined_call_operand.vmem [shape: bf16[3,16,32], index: 1, kind: input, shape index: {}]   ;;  %s483_s2 = inlined_call_operand.vmem [shape: f32[16,1], index: 2, kind: input, shape index: {}]   ;;  %s484_s3 = inlined_call_operand.vmem [shape: bf16[2,16,64], index: 3, kind: output, shape index: {}]  }
   0x1 LB: > { %s353_s13 = sadd.s32 4294967295, %s417_s12   ;;  %p357_p0 = scmp.ge.s32.totalorder %s417_s12, 1  ;;  %s417_s12 = sphi %s442_s12, %s13_s12  }
   0x2   : > { %p137_p1 = scmp.lt.s32.totalorder %s417_s12, 3 }
   0x4   : > { %p138_p2 = pnand %p357_p0, %p137_p1 }
   0x5   : > { %p161_p3 = scmp.lt.s32.totalorder (!%p138_p2), %s353_s13, 1  ;;  %s419_s18 = smov (!%p138_p2), 126  }
   0x6   : > { %141 = sbr.rel (%p138_p2) target bundleno = 290 (0x122), region = 32  ;;  %s420_s19 = smov (!%p138_p2), 127  }
   0xb   : > { %s486_s13 = smov (!%p161_p3, %s353_s13), 1  ;;  %v395_v2 = vld [vmem:[%s482_s1] sm:$0xff]  ;;  %vm202_vm0 = vcmask 261120   ;;  %v421_v4 = vmov 0   ;;  %v278_v5 = vld [vmem:[%s483_s2 + $0x8] sm:$0xff]  ;;  %v397_v8 = vld [vmem:[%s482_s1 + $0x10] sm:$0xff] }
   0xc   : > { %s391_s14 = sshll.u32 %s486_s13, 4  ;;  %v277_v3 = vld [vmem:[%s483_s2] sm:$0xff]  ;;  %409 = vset.pattern.permute.xlu2 %v421_v4  ;;  %410 = vset.pattern.permute.xlu0 %v421_v4  ;;  %v396_v11 = vld [vmem:[%s482_s1 + $0x8] sm:$0xff]  ;;  %s392_s30 = sshll.u32 %s486_s13, 3  ;;  %vm295_vm1 = vcmask 519168  }
   0xd   : > { %s165_s17 = scalar_lea.vmem %s481_s0, %s391_s14  ;;  %281 = vperm.xlu2 %409, %v277_v3   ;;  %s170_s6 = scalar_lea.vmem %s484_s3, %s392_s30 }
   0xe   : > { %v394_v0 = vld [vmem:[%s165_s17 + $0x8] sm:$0xff]  ;;  %v393_v1 = vld [vmem:[%s165_s17] sm:$0xff] }
   0xf   : > { %254 = vrot.lane.b32.xlu0 %v394_v0, %s419_s18  ;;  %252 = vrot.lane.b32.xlu1 %v393_v1, %s419_s18 }
  0x10   : > { %236 = vmatpush.bf16.msra.mxu1 %v394_v0 }
  0x14   : > { %237 = vmatpush.bf16.msra.mxu1 %v393_v1 }
  0x15   : > { %286 = vperm.xlu2 %409, %v278_v5  }
  0x17   : > { %198 = vrot.lane.b32.xlu0 %v394_v0, %s420_s19  ;;  %196 = vrot.lane.b32.xlu1 %v393_v1, %s420_s19 }
  0x18   : > { %381 = vmatmul.msk.bf16.vlgmr.msra.gmra.mxu1 %vm202_vm0, %v395_v2 }
  0x67   : > { %v282_v16 = vpop.permute.xlu2 %281 }
  0x6f   : > { %v287_v26 = vpop.permute.xlu2 %286 }
  0x81   : > { %v255_v6 = vpop.permute.xlu0 %254  ;;  %v253_v7 = vpop.permute.xlu1 %252 }
  0x82   : > { %267 = vmatpush.bf16.msra.mxu2 %v255_v6 }
  0x86   : > { %268 = vmatpush.bf16.msra.mxu2 %v253_v7 }
  0x89   : > { %v199_v9 = vpop.permute.xlu0 %198  ;;  %388 = vmatmul.msk.bf16.vlgmr.msra.gmra.mxu2 %vm202_vm0, %v397_v8  ;;  %v197_v10 = vpop.permute.xlu1 %196 }
  0x8a   : > { %212 = vmatpush.bf16.msra.mxu0 %v199_v9 }
  0x8e   : > { %213 = vmatpush.bf16.msra.mxu0 %v197_v10 }
  0x91   : > { %376 = vmatmul.msk.bf16.vlgmr.msra.gmra.mxu0 %vm202_vm0, %v396_v11 }
  0x95   : > { %v239_v12 = vpop.f32.mrf.mxu1 }
  0x9d   : > { %v241_v20 = vpop.f32.mrf.mxu1 }
 0x10c   : > { %v270_v13 = vpop.f32.mrf.mxu2 }
 0x10e   : > { %v215_v14 = vpop.f32.mrf.mxu0 }
 0x10f   : > { %v240_v15 = vadd.f32 %v239_v12, %v215_v14 }
 0x111   : > { %v275_v17 = vadd.f32 %v270_v13, %v240_v15 }
 0x113   : > { %v289_v18 = vadd.f32 %v282_v16, %v275_v17 }
 0x114   : > { %v272_v24 = vpop.f32.mrf.mxu2 }
 0x115   : > { %v291_v19 = vmax.f32 %v289_v18, 0.0 }
 0x116   : > { %v217_v21 = vpop.f32.mrf.mxu0 }
 0x117   : > { %v293_v22 = vpack.c.bf16 %v291_v19, %v291_v19  ;;  %v242_v23 = vadd.f32 %v241_v20, %v217_v21 }
 0x119   : > { %296 = vst.msk [vmem:[%s170_s6] sm:$0xf] %vm295_vm1, %v293_v22  ;;  %v276_v25 = vadd.f32 %v272_v24, %v242_v23 }
 0x11b   : > { %v290_v27 = vadd.f32 %v287_v26, %v276_v25 }
 0x11d   : > { %v292_v28 = vmax.f32 %v290_v27, 0.0 }
 0x11f   : > { %v294_v29 = vpack.c.bf16 %v292_v28, %v292_v28 }
 0x121   : > { %297 = vst.msk [vmem:[%s170_s6 + $0x4] sm:$0xf] %vm295_vm1, %v294_v29 }
 0x122 PF: > { %s13_s12 = sadd.s32 1, %s417_s12  }
 0x123   : > { %p10_p4 = scmp.ge.s32.totalorder %s13_s12, 4  }
 0x125   :  { %12 = sbr.rel (!%p10_p4) target bundleno = 1 (0x1), region = 64 }

// kernel: reg_convcnp_forward.29
= control target key start
LH: loop header
LB: loop body
LE: loop exit
PB: predicated region body
PF: predicated region fallthrough
CT: control target
= control target key end

     0   :  { %s443_s12 = smov 0   ;;  %s482_s0 = inlined_call_operand.vmem [shape: bf16[2,16,130], index: 0, kind: input, shape index: {}]   ;;  %s483_s1 = inlined_call_operand.vmem [shape: bf16[3,16,16], index: 1, kind: input, shape index: {}]   ;;  %s484_s2 = inlined_call_operand.vmem [shape: f32[16,1], index: 2, kind: input, shape index: {}]   ;;  %s485_s3 = inlined_call_operand.vmem [shape: bf16[2,16,128], index: 3, kind: output, shape index: {}]  }
   0x1 LB: > { %s349_s13 = sadd.s32 4294967295, %s418_s12   ;;  %p353_p0 = scmp.ge.s32.totalorder %s418_s12, 1  ;;  %s418_s12 = sphi %s443_s12, %s13_s12  }
   0x2   : > { %p137_p1 = scmp.lt.s32.totalorder %s418_s12, 3 }
   0x4   : > { %p138_p2 = pnand %p353_p0, %p137_p1 }
   0x5   : > { %p161_p3 = scmp.lt.s32.totalorder (!%p138_p2), %s349_s13, 1  ;;  %s420_s18 = smov (!%p138_p2), 127  }
   0x6   : > { %141 = sbr.rel (%p138_p2) target bundleno = 293 (0x125), region = 32  ;;  %s421_s19 = smov (!%p138_p2), 126  }
   0xb   : > { %s487_s13 = smov (!%p161_p3, %s349_s13), 1  ;;  %v391_v6 = vld [vmem:[%s483_s1] sm:$0xff]  ;;  %vm199_vm0 = vcmask 130048   ;;  %v422_v8 = vmov 0   ;;  %v275_v9 = vld [vmem:[%s484_s2 + $0x8] sm:$0xff]  ;;  %vm196_vm1 = vcmask 1039360  }
   0xc   : > { %s387_s14 = sshll.u32 %s487_s13, 4  ;;  %v274_v7 = vld [vmem:[%s484_s2] sm:$0xff]  ;;  %410 = vset.pattern.permute.xlu2 %v422_v8  ;;  %411 = vset.pattern.permute.xlu0 %v422_v8  ;;  %vm252_vm2 = vcmask 1031168   ;;  %v392_v16 = vld [vmem:[%s483_s1 + $0x8] sm:$0xff]  ;;  %v393_v17 = vld [vmem:[%s483_s1 + $0x10] sm:$0xff]  ;;  %s388_s30 = sshll.u32 %s487_s13, 3 }
   0xd   : > { %s165_s17 = scalar_lea.vmem %s482_s0, %s387_s14  ;;  %278 = vperm.xlu2 %410, %v274_v7   ;;  %s170_s6 = scalar_lea.vmem %s485_s3, %s388_s30 }
   0xe   : > { %v366_v0 = vld [vmem:[%s165_s17] sm:$0xf]  ;;  %v390_v1 = vld [vmem:[%s165_s17 + $0x4] sm:$0xf0]  ;;  %v389_v3 = vld [vmem:[%s165_s17 + $0x4] sm:$0xf] }
   0xf   : > { %v367_v2 = vor.u32 %v390_v1, %v366_v0  ;;  %v368_v4 = vld [vmem:[%s165_s17 + $0x8] sm:$0xf0] }
  0x10   : > { %v371_v5 = vor.u32 %v389_v3, %v368_v4 }
  0x11   : > { %192 = vrot.lane.b32.xlu1 %v367_v2, %s420_s18  ;;  %248 = vrot.lane.b32.xlu0 %v367_v2, %s421_s19 }
  0x12   : > { %233 = vmatpush.bf16.msra.mxu1 %v367_v2 }
  0x15   : > { %377 = vmatmul.msk.bf16.vlgmr.msra.gmra.mxu1 %vm199_vm0, %v391_v6  ;;  %283 = vperm.xlu2 %410, %v275_v9  }
  0x19   : > { %194 = vrot.lane.b32.xlu1 %v371_v5, %s420_s18  ;;  %250 = vrot.lane.b32.xlu0 %v371_v5, %s421_s19 }
  0x67   : > { %v279_v20 = vpop.permute.xlu2 %278 }
  0x6f   : > { %v284_v30 = vpop.permute.xlu2 %283 }
  0x83   : > { %v193_v10 = vpop.permute.xlu1 %192  ;;  %v249_v11 = vpop.permute.xlu0 %248 }
  0x8b   : > { %v195_v12 = vpop.permute.xlu1 %194  ;;  %v251_v13 = vpop.permute.xlu0 %250 }
  0x8c   : > { %v197_v14 = vsel %vm196_vm1, %v193_v10, %v195_v12  ;;  %v253_v15 = vsel %vm252_vm2, %v249_v11, %v251_v13 }
  0x8d   : > { %210 = vmatpush.bf16.msra.mxu0 %v197_v14  ;;  %265 = vmatpush.bf16.msra.mxu2 %v253_v15 }
  0x90   : > { %372 = vmatmul.msk.bf16.vlgmr.msra.gmra.mxu0 %vm199_vm0, %v392_v16  ;;  %384 = vmatmul.msk.bf16.vlgmr.msra.gmra.mxu2 %vm199_vm0, %v393_v17 }
  0x92   : > { %v235_v19 = vpop.f32.mrf.mxu1 }
  0x9a   : > { %v237_v25 = vpop.f32.mrf.mxu1 }
 0x10d   : > { %v212_v18 = vpop.f32.mrf.mxu0 }
 0x10e   : > { %v236_v22 = vadd.f32 %v235_v19, %v212_v18 }
 0x113   : > { %v267_v21 = vpop.f32.mrf.mxu2 }
 0x114   : > { %v272_v24 = vadd.f32 %v267_v21, %v236_v22 }
 0x115   : > { %v214_v23 = vpop.f32.mrf.mxu0 }
 0x116   : > { %v238_v26 = vadd.f32 %v237_v25, %v214_v23  ;;  %v286_v28 = vadd.f32 %v279_v20, %v272_v24 }
 0x118   : > { %v288_v32 = vmax.f32 %v286_v28, 0.0 }
 0x11b   : > { %v269_v27 = vpop.f32.mrf.mxu2 }
 0x11c   : > { %v273_v29 = vadd.f32 %v269_v27, %v238_v26 }
 0x11e   : > { %v287_v31 = vadd.f32 %v284_v30, %v273_v29 }
 0x120   : > { %v289_v33 = vmax.f32 %v287_v31, 0.0 }
 0x122   : > { %v397_v34 = vpack.c.bf16 %v289_v33, %v288_v32 }
 0x124   : > { %398 = vst [vmem:[%s170_s6] sm:$0xff] %v397_v34  }
 0x125 PF: > { %s13_s12 = sadd.s32 1, %s418_s12  }
 0x126   : > { %p10_p4 = scmp.ge.s32.totalorder %s13_s12, 4  }
 0x128   :  { %12 = sbr.rel (!%p10_p4) target bundleno = 1 (0x1), region = 64 }

// kernel: reg_convcnp_forward.30
= control target key start
LH: loop header
LB: loop body
LE: loop exit
PB: predicated region body
PF: predicated region fallthrough
CT: control target
= control target key end

     0   :  { %s338_s12 = smov 0   ;;  %s361_s0 = inlined_call_operand.vmem [shape: bf16[2,8,256], index: 0, kind: input, shape index: {}]   ;;  %s362_s1 = inlined_call_operand.vmem [shape: bf16[1,2,8], index: 1, kind: input, shape index: {}]   ;;  %s363_s2 = inlined_call_operand.vmem [shape: f32[2,1], index: 2, kind: input, shape index: {}]   ;;  %s364_s3 = inlined_call_operand.vmem [shape: f32[2,2,256], index: 3, kind: output, shape index: {}]  }
   0x1 LB: > { %s284_s13 = sadd.s32 4294967295, %s315_s12   ;;  %p288_p0 = scmp.ge.s32.totalorder %s315_s12, 1  ;;  %s315_s12 = sphi %s338_s12, %s13_s12  }
   0x2   : > { %p137_p1 = scmp.lt.s32.totalorder %s315_s12, 3 }
   0x4   : > { %p138_p2 = pnand %p288_p0, %p137_p1 }
   0x5   : > { %p161_p3 = scmp.lt.s32.totalorder (!%p138_p2), %s284_s13, 1 }
   0x6   : > { %141 = sbr.rel (%p138_p2) target bundleno = 157 (0x9d), region = 32 }
   0xb   : > { %v317_v0 = vmov 0   ;;  %v174_v1 = vld [vmem:[%s363_s2] sm:$0x3]  ;;  %s366_s13 = smov (!%p161_p3, %s284_s13), 1  ;;  %vm189_vm0 = vcmask 1043456   ;;  %vm185_vm1 = vcmask 64512  }
   0xc   : > { %308 = vset.pattern.permute.xlu0 %v317_v0  ;;  %s297_s16 = sshll.u32 %s366_s13, 3  ;;  %v173_v9 = vld [vmem:[%s362_s1] sm:$0x1]  ;;  %s298_s22 = sshll.u32 %s366_s13, 2  ;;  %vm225_vm2 = vcmask 1041408  }
   0xd   : > { %177 = vperm.xlu0 %308, %v174_v1   ;;  %s165_s19 = scalar_lea.vmem %s361_s0, %s297_s16  ;;  %s170_s25 = scalar_lea.vmem %s364_s3, %s298_s22 }
   0xe   : > { %v172_v2 = vld [vmem:[%s165_s19] sm:$0xff] }
   0xf   : > { %v181_v3 = vunpack.c.l.b16 %v172_v2  ;;  %v182_v4 = vunpack.c.h.b16 %v172_v2 }
  0x11   : > { %v183_v5 = vpack.c.b16 %v181_v3, %v181_v3  ;;  %v184_v6 = vpack.c.b16 %v182_v4, %v182_v4 }
  0x13   : > { %v191_v7 = vsel %vm189_vm0, %v183_v5, 0  ;;  %v194_v8 = vsel %vm189_vm0, %v184_v6, 0 }
  0x14   : > { %203 = vmatpush.bf16.msra.mxu0 %v191_v7  ;;  %216 = vmatpush.bf16.msra.mxu1 %v194_v8 }
  0x17   : > { %293 = vmatmul.msk.bf16.vlgmr.msra.gmra.mxu0 %vm185_vm1, %v173_v9  ;;  %294 = vmatmul.msk.bf16.vlgmr.msra.gmra.mxu1 %vm185_vm1, %v173_v9 }
  0x7f   : > { %v178_v10 = vpop.permute.xlu0 %177 }
  0x94   : > { %v205_v11 = vpop.f32.mrf.mxu0  ;;  %v218_v12 = vpop.f32.mrf.mxu1 }
  0x95   : > { %v219_v13 = vadd.f32 %v218_v12, %v178_v10  ;;  %v206_v14 = vadd.f32 %v205_v11, %v178_v10 }
  0x97   : > { %v224_v15 = vrot.slane %v219_v13, 6 }
  0x99   : > { %v226_v16 = vsel %vm225_vm2, %v206_v14, %v224_v15 }
  0x9a   : > { %228 = vst [vmem:[%s170_s25] sm:$0xf] %v226_v16 }
  0x9c   : > { %v207_v17 = vpop.f32.mrf.mxu0  ;;  %v220_v18 = vpop.f32.mrf.mxu1 }
  0x9d PF: > { %s13_s12 = sadd.s32 1, %s315_s12  }
  0x9e   : > { %p10_p4 = scmp.ge.s32.totalorder %s13_s12, 4  }
  0xa0   :  { %12 = sbr.rel (!%p10_p4) target bundleno = 1 (0x1), region = 62 }

// kernel: reg_convcnp_forward.31
= control target key start
LH: loop header
LB: loop body
LE: loop exit
PB: predicated region body
PF: predicated region fallthrough
CT: control target
= control target key end

     0   :  { %s546_s17 = smov 0   ;;  %s548_s18 = smov 0   ;;  %s639_s0 = inlined_call_operand.<no memory space> [shape: f32[1,1], index: 0, kind: input, shape index: {}]   ;;  %s640_s1 = inlined_call_operand.vmem [shape: f32[2,8,1], index: 1, kind: input, shape index: {}]   ;;  %s641_s2 = inlined_call_operand.vmem [shape: f32[1,256], index: 2, kind: input, shape index: {}]   ;;  %s642_s3 = inlined_call_operand.vmem [shape: f32[2,256,2], index: 3, kind: input, shape index: {}]   ;;  %s643_s4 = inlined_call_operand.vmem [shape: f32[2,8,2], index: 4, kind: output, shape index: {}]  }
   0x1   :  { %9 = sst [smem:[#allocation3]] %s639_s0  ;;  %s550_s19 = smov 0  }
   0x2   :  { %s552_s20 = smov 0   ;;  %s554_s21 = smov 0  }
   0x3 LB: > { %s24_s0 = sadd.s32 1, %s506_s19  ;;  %s27_s22 = sadd.s32 1, %s510_s20  ;;  %s514_s21 = sphi %s554_s21, %s15_s21   ;;  %s510_s20 = sphi %s552_s20, %s647_s20   ;;  %s506_s19 = sphi %s550_s19, %s646_s19   ;;  %s502_s18 = sphi %s548_s18, %s645_s18   ;;  %s498_s17 = sphi %s546_s17, %s644_s17  }
   0x4   : > { %p25_p0 = scmp.ge.s32.totalorder %s24_s0, 2  ;;  %p420_p1 = scmp.ge.s32.totalorder %s514_s21, 1 }
   0x5   : > { %p199_p2 = scmp.lt.s32.totalorder %s514_s21, 5 }
   0x6   : > { %s649_s0 = smov (%p25_p0, %s24_s0), 0  ;;  %s651_s22 = smov (!%p25_p0, %s27_s22), %s510_s20 }
   0x7   : > { %p200_p3 = pnand %p420_p1, %p199_p2  ;;  %p29_p4 = scmp.ge.s32.totalorder %s651_s22, 2 }
   0x8   : > { %p235_p5 = scmp.lt.s32.totalorder (!%p200_p3), %s502_s18, 1  ;;  %p239_p6 = scmp.lt.s32.totalorder (!%p200_p3), %s498_s17, 1 }
   0x9   : > { %s653_s22 = smov (%p29_p4, %s651_s22), 0  ;;  %203 = sbr.rel (%p200_p3) target bundleno = 295 (0x127), region = 36 }
   0xa   : > { %s422_s23 = sshll.u32 (!%p200_p3), %s498_s17, 4  ;;  %p426_p8 = scmp.ne.s32.totalorder (!%p200_p3), %s498_s17, 0 }
   0xb   : > { %p245_p7 = scmp.lt.s32.totalorder (!%p200_p3), %s422_s23, 31 }
   0xe   : > { %s655_s18 = smov (!%p235_p5, %s502_s18), 1  ;;  %s657_s23 = smov (!%p245_p7, %s422_s23), 31 }
   0xf   : > { %s581_s24 = scalar_select %p239_p6, %s498_s17, 1 }
  0x10   : > { %s421_s25 = sshll.u32 %s655_s18, 3  ;;  %s423_s6 = sshll.u32 %s655_s18, 5 }
  0x11   : > { %s238_s28 = scalar_lea.vmem %s640_s1, %s421_s25  ;;  %s241_s5 = scalar_lea.vmem %s641_s2, %s581_s24 }
  0x12   : > { %s593_s9 = scalar_lea.vmem %s643_s4, %s421_s25  ;;  %s248_s10 = sadd.s32 %s423_s6, %s657_s23 }
  0x13   : > { %s424_s11 = sshll.u32 %s248_s10, 3  ;;  %259 = sbr.rel (%p426_p8) target bundleno = 26 (0x1a), region = 40 }
  0x14   : > { %s598_s14 = scalar_lea.vmem %s642_s3, %s424_s11 }
  0x18   : > { %vm260_vm0 = vcmask 15360   ;;  %v516_v0 = vmov 0.0  }
  0x19   : > { %261 = vst.msk [vmem:[#allocation2] sm:$0xff] %vm260_vm0, %v516_v0 }
  0x1a PF: > { %v263_v1 = vld [vmem:[%s238_s28] sm:$0xff]  ;;  %v295_v2 = vld [vmem:[%s598_s14 + $0x78] sm:$0xff]  ;;  %v294_v3 = vld [vmem:[%s598_s14 + $0x70] sm:$0xff]  ;;  %v517_v4 = vmov 0   ;;  %s262_s15 = sld [smem:[#allocation3]]  ;;  %vm317_vm1 = vcmask 15360  }
  0x1b   : > { %472 = vset.pattern.permute.xlu0 %v517_v4  ;;  %296 = vmatpush.msra.mxu0 %v295_v2  ;;  %v293_v5 = vld [vmem:[%s598_s14 + $0x68] sm:$0xff]  ;;  %v292_v6 = vld [vmem:[%s598_s14 + $0x60] sm:$0xff]  ;;  %v291_v7 = vld [vmem:[%s598_s14 + $0x58] sm:$0xff]  ;;  %p427_p9 = scmp.ne.s32.totalorder %s498_s17, 1 }
  0x1c   : > { %267 = vperm.xlu0 %472, %v263_v1   ;;  %v290_v8 = vld [vmem:[%s598_s14 + $0x50] sm:$0xff]  ;;  %v289_v9 = vld [vmem:[%s598_s14 + $0x48] sm:$0xff]  ;;  %v288_v10 = vld [vmem:[%s598_s14 + $0x40] sm:$0xff] }
  0x1d   : > { %297 = vmatpush.msra.mxu0 %v294_v3  ;;  %v287_v11 = vld [vmem:[%s598_s14 + $0x38] sm:$0xff]  ;;  %v286_v12 = vld [vmem:[%s598_s14 + $0x30] sm:$0xff]  ;;  %v285_v13 = vld [vmem:[%s598_s14 + $0x28] sm:$0xff] }
  0x1e   : > { %v284_v14 = vld [vmem:[%s598_s14 + $0x20] sm:$0xff]  ;;  %v283_v15 = vld [vmem:[%s598_s14 + $0x18] sm:$0xff]  ;;  %v282_v16 = vld [vmem:[%s598_s14 + $0x10] sm:$0xff] }
  0x1f   : > { %298 = vmatpush.msra.mxu0 %v293_v5  ;;  %v281_v17 = vld [vmem:[%s598_s14 + $0x8] sm:$0xff]  ;;  %v280_v18 = vld [vmem:[%s598_s14] sm:$0xff] }
  0x20   : > { %v473_v19 = vld [vmem:[%s241_s5] ss:$0 sm:$0xff]  ;;  %v275_v22 = vstv %s262_s15 }
  0x21   : > { %299 = vmatpush.msra.mxu0 %v292_v6  ;;  %v279_v27 = vld [vmem:[#allocation2] sm:$0xff] }
  0x23   : > { %300 = vmatpush.msra.mxu0 %v291_v7 }
  0x25   : > { %301 = vmatpush.msra.mxu0 %v290_v8 }
  0x27   : > { %302 = vmatpush.msra.mxu0 %v289_v9 }
  0x29   : > { %303 = vmatpush.msra.mxu0 %v288_v10 }
  0x2b   : > { %304 = vmatpush.msra.mxu0 %v287_v11 }
  0x2d   : > { %305 = vmatpush.msra.mxu0 %v286_v12 }
  0x2f   : > { %306 = vmatpush.msra.mxu0 %v285_v13 }
  0x31   : > { %307 = vmatpush.msra.mxu0 %v284_v14 }
  0x33   : > { %308 = vmatpush.msra.mxu0 %v283_v15 }
  0x35   : > { %309 = vmatpush.msra.mxu0 %v282_v16 }
  0x37   : > { %310 = vmatpush.msra.mxu0 %v281_v17 }
  0x39   : > { %311 = vmatpush.msra.mxu0 %v280_v18 }
  0x8e   : > { %v268_v20 = vpop.permute.xlu0 %267 }
  0x8f   : > { %v273_v21 = vsub.f32 %v268_v20, %v473_v19 }
  0x91   : > { %v274_v23 = vmul.f32 %v273_v21, %v273_v21 }
  0x93   : > { %v276_v24 = vmul.f32 %v275_v22, %v274_v23 }
  0x95   : > { %v277_v25 = vmul.f32 1.442695, %v276_v24 }
  0x97   : > { %474 = vpow2.f32 %v277_v25 }
  0x9d   : > { %v475_v26 = vpop.eup %474 }
  0x9e   : > { %312 = vmatmul.f32.vlgmr.msra.gmra.mxu0 %v475_v26 }
 0x11a   : > { %322 = sbr.rel (%p427_p9) target bundleno = 295 (0x127), region = 44 }
 0x11b   : > { %v313_v28 = vpop.f32.mrf.mxu0 }
 0x11c   : > { %v316_v29 = vadd.f32 %v313_v28, %v279_v27 }
 0x11e   : > { %318 = vst.msk [vmem:[#allocation2] sm:$0xff] %vm317_vm1, %v316_v29 }
 0x125   : > { %v323_v30 = vld [vmem:[#allocation2] sm:$0xff] }
 0x126   : > { %324 = vst.msk [vmem:[%s593_s9] sm:$0xff] %vm317_vm1, %v323_v30 }
 0x127 PF: > { %s15_s21 = sadd.s32 1, %s514_s21   ;;  %s644_s17 = smov %s506_s19 }
 0x128   : > { %p12_p10 = scmp.ge.s32.totalorder %s15_s21, 6   ;;  %s645_s18 = smov %s510_s20 }
 0x129   : > { %s646_s19 = smov %s649_s0  ;;  %s647_s20 = smov %s653_s22 }
 0x12a   :  { %14 = sbr.rel (!%p12_p10) target bundleno = 3 (0x3), region = 80 }

</bundles_post_ra>
